<compile_context>
chip_gen: v5e
topology: v5e:2x2
jax: 0.10.0
libtpu: 0.0.40
codegen_flags: <defaults>
</compile_context>

<pallas_src>
import functools

import numpy as np
import jax
import jax.numpy as jnp
from jax.experimental import pallas as pl
from jax.experimental.pallas import tpu as pltpu


# ----------------------------------------------------------------------------
# Pallas kernels
# ----------------------------------------------------------------------------
def _fc_kernel(z_ref, w1_ref, b1_ref, w2_ref, b2_ref, o_ref):
    """relu(relu(z @ W1 + b1) @ W2 + b2); bf16 x bf16 MXU matmuls, f32 accum."""
    z = z_ref[...].astype(jnp.bfloat16)
    h = jnp.dot(z, w1_ref[...], preferred_element_type=jnp.float32)
    h = jnp.maximum(h + b1_ref[...], 0.0)
    o = jnp.dot(h.astype(jnp.bfloat16), w2_ref[...],
                preferred_element_type=jnp.float32)
    o_ref[...] = jnp.maximum(o + b2_ref[...], 0.0)


def _decoder_fused_kernel(x_ref, w1_ref, b1_ref, w2_ref, b2_ref, w3_ref, b3_ref,
                          w4_ref, b4_ref,
                          mw16_ref, mh16_ref, mw64_ref, mh64_ref,
                          mw128_ref, mh128_ref,
                          o_ref, *, nb):
    """Conv/act/resize pipeline for a block of `nb` images, fully batched.

    x_ref  : (32, nb*16)  f32 — lane index = n*16 + y*4 + x (image-major)
    wK     : (9, Cout, Cin) tap weights, bK: (Cout, 1)
    w4/b4  : SMEM scalars for the Cout=1 layer4 conv
    mwN    : (Win, Wout) width-resize matrices, mhN: (Hout, Hin) height matrices
    o_ref  : (nb, 1, 128, 128)
    """
    f32 = jnp.float32

    def conv3x3_leaky(a, h, w, w_ref, b_ref):
        """3x3 same-pad conv on a (Cin, nb*h*w) slab: 9 roll+mask tap matmuls."""
        n = nb * h * w
        cout = w_ref.shape[1]
        pos = jax.lax.broadcasted_iota(jnp.int32, (1, n), 1)
        xi = pos % w
        yi = (pos // w) % h
        acc = jnp.zeros((cout, n), f32)
        for dy in (-1, 0, 1):
            if dy == 0:
                ay = a
            else:
                ay = pltpu.roll(a, shift=(-dy * w) % n, axis=1)
                ym = (yi >= 1) if dy == -1 else (yi <= h - 2)
                ay = jnp.where(ym, ay, 0.0)
            for dx in (-1, 0, 1):
                if dx == 0:
                    axy = ay
                else:
                    axy = pltpu.roll(ay, shift=(-dx) % n, axis=1)
                    xm = (xi >= 1) if dx == -1 else (xi <= w - 2)
                    axy = jnp.where(xm, axy, 0.0)
                k = (dy + 1) * 3 + (dx + 1)
                acc = acc + jnp.dot(w_ref[k], axy, preferred_element_type=f32)
        acc = acc + b_ref[...]
        return jnp.where(acc >= 0.0, acc, 0.01 * acc)          # LeakyReLU(0.01)

    def resize_bilinear(a, h, w, mw_ref, mh_ref):
        """(C, nb*h*w) -> (C*nb, hout, wout): width matmul + batched height matmul."""
        c = a.shape[0]
        wout = mw_ref.shape[1]
        hout = mh_ref.shape[0]
        t = jnp.dot(a.reshape(c * nb * h, w), mw_ref[...],
                    preferred_element_type=f32)                # (c*nb*h, wout)
        t = t.reshape(c * nb, h, wout)
        mh = jnp.broadcast_to(mh_ref[...], (c * nb, hout, h))  # hoisted, once/block
        return jax.lax.dot_general(mh, t, (((2,), (1,)), ((0,), (0,))),
                                   preferred_element_type=f32)  # (c*nb, hout, wout)

    a = x_ref[...]                                               # (32, nb*16)
    a = conv3x3_leaky(a, 4, 4, w1_ref, b1_ref)                   # (16, nb*16)
    a = resize_bilinear(a, 4, 4, mw16_ref, mh16_ref).reshape(16, nb * 256)
    a = conv3x3_leaky(a, 16, 16, w2_ref, b2_ref)                 # (8, nb*256)
    a = resize_bilinear(a, 16, 16, mw64_ref, mh64_ref).reshape(8, nb * 4096)
    a = conv3x3_leaky(a, 64, 64, w3_ref, b3_ref)                 # (4, nb*4096)
    a = resize_bilinear(a, 64, 64, mw128_ref, mh128_ref)         # (4*nb,128,128)

    # layer4: Conv(4->1, 3x3) + bias + Sigmoid on the VPU.  Taps come from
    # sublane (y) / lane (x) rolls of full (nb,128,128) planes + border masks.
    a = a.reshape(4, nb, 128, 128)
    yv = jax.lax.broadcasted_iota(jnp.int32, (1, 128, 1), 1)
    xv = jax.lax.broadcasted_iota(jnp.int32, (1, 1, 128), 2)
    acc = jnp.zeros((nb, 128, 128), f32)
    for ci in range(4):
        plane = a[ci]                                            # (nb,128,128)
        for dy in (-1, 0, 1):
            if dy == 0:
                py = plane
            else:
                py = pltpu.roll(plane, shift=(-dy) % 128, axis=1)
                ym = (yv >= 1) if dy == -1 else (yv <= 126)
                py = jnp.where(ym, py, 0.0)
            for dx in (-1, 0, 1):
                if dx == 0:
                    pxy = py
                else:
                    pxy = pltpu.roll(py, shift=(-dx) % 128, axis=2)
                    xm = (xv >= 1) if dx == -1 else (xv <= 126)
                    pxy = jnp.where(xm, pxy, 0.0)
                acc = acc + w4_ref[ci * 9 + (dy + 1) * 3 + (dx + 1)] * pxy
    o_ref[...] = jax.nn.sigmoid(acc + b4_ref[0]).reshape(o_ref.shape)


# ----------------------------------------------------------------------------
# Wrappers
# ----------------------------------------------------------------------------
def fc_forward(z, w1, b1, w2, b2):
    return pl.pallas_call(
        _fc_kernel,
        out_shape=jax.ShapeDtypeStruct((z.shape[0], w2.shape[1]), jnp.float32),
    )(z, w1, b1, w2, b2)


def decoder_convs_forward(x, p, *, max_images_per_block=8):
    """x: (nimg, 512) flat images -> (nimg, 1, 128, 128), one fused pallas_call."""
    nimg = x.shape[0]
    if nimg <= max_images_per_block:
        nb, num_blocks = nimg, 1
    else:
        nb = max_images_per_block
        num_blocks = pl.cdiv(nimg, nb)
    padded = nb * num_blocks
    if padded != nimg:                       # pad batch, drop the tail afterwards
        x = jnp.pad(x, ((0, padded - nimg), (0, 0)))

    # Channel-major, lane-dense input slab: (32, padded*16), lane = (img, y, x).
    x2d = jnp.transpose(x.reshape(padded, 32, 16), (1, 0, 2)).reshape(32, padded * 16)

    def taps(w):                             # (Cout,Cin,3,3) -> (9, Cout, Cin)
        return jnp.transpose(w, (2, 3, 0, 1)).reshape(9, w.shape[0], w.shape[1])

    w1, b1 = taps(p["c1_w"]), p["c1_b"].reshape(16, 1)
    w2, b2 = taps(p["c2_w"]), p["c2_b"].reshape(8, 1)
    w3, b3 = taps(p["c3_w"]), p["c3_b"].reshape(4, 1)
    w4 = p["c4_w"].reshape(36)               # (cin, ky, kx) scalar order -> SMEM
    b4 = p["c4_b"].reshape(1)

    m16 = bilinear_matrix(16, 4)
    m64 = bilinear_matrix(64, 16)
    m128 = bilinear_matrix(128, 64)

    def full(shape):
        return pl.BlockSpec(shape, lambda i, s=shape: (0,) * len(s))

    kernel = functools.partial(_decoder_fused_kernel, nb=nb)
    out = pl.pallas_call(
        kernel,
        out_shape=jax.ShapeDtypeStruct((padded, 1, 128, 128), jnp.float32),
        grid=(num_blocks,),
        in_specs=[
            pl.BlockSpec((32, nb * 16), lambda i: (0, i)),           # image block
            full((9, 16, 32)), full((16, 1)),
            full((9, 8, 16)), full((8, 1)),
            full((9, 4, 8)), full((4, 1)),
            pl.BlockSpec(memory_space=pltpu.MemorySpace.SMEM),       # layer4 weights
            pl.BlockSpec(memory_space=pltpu.MemorySpace.SMEM),       # layer4 bias
            full((4, 16)), full((16, 4)),                            # 4 -> 16
            full((16, 64)), full((64, 16)),                          # 16 -> 64
            full((64, 128)), full((128, 64)),                        # 64 -> 128
        ],
        out_specs=pl.BlockSpec((nb, 1, 128, 128), lambda i: (i, 0, 0, 0)),
        compiler_params=pltpu.CompilerParams(
            dimension_semantics=("parallel",),
            vmem_limit_bytes=32 * 1024 * 1024),
    )(x2d, w1, b1, w2, b2, w3, b3, w4, b4,
      m16.T, m16, m64.T, m64, m128.T, m128)
    return out[:nimg]


def bilinear_matrix(out_size, in_size):
    """PyTorch F.interpolate(mode='bilinear', align_corners=False) as a matrix."""
    scale = in_size / out_size
    m = np.zeros((out_size, in_size), np.float32)
    for i in range(out_size):
        src = (i + 0.5) * scale - 0.5
        if src < 0.0:
            src = 0.0
        p0 = min(int(np.floor(src)), in_size - 1)
        p1 = min(p0 + 1, in_size - 1)
        l1 = src - p0
        m[i, p0] += 1.0 - l1
        m[i, p1] += l1
    return jnp.asarray(m)


def init_params(key):
    ks = jax.random.split(key, 12)

    def dense(k, fan_in, fan_out, dtype):
        w = jax.random.normal(k, (fan_in, fan_out), jnp.float32) / np.sqrt(fan_in)
        return w.astype(dtype)

    def conv_w(k, cout, cin):
        return jax.random.normal(k, (cout, cin, 3, 3), jnp.float32) / np.sqrt(cin * 9)

    return {
        # FC weights in bf16 (HBM-bound stage); bf16 x bf16 matmul on the MXU.
        "fc_w1": dense(ks[0], 8, 4096, jnp.bfloat16),
        "fc_b1": 0.1 * jax.random.normal(ks[1], (1, 4096), jnp.float32),
        "fc_w2": dense(ks[2], 4096, 256, jnp.bfloat16),
        "fc_b2": 0.1 * jax.random.normal(ks[3], (1, 256), jnp.float32),
        # Conv weights in PyTorch (Cout, Cin, 3, 3) layout; the wrapper reshapes
        # them to tap-major (9, Cout, Cin) for the kernel.
        "c1_w": conv_w(ks[4], 16, 32),
        "c1_b": 0.1 * jax.random.normal(ks[5], (16,), jnp.float32),
        "c2_w": conv_w(ks[6], 8, 16),
        "c2_b": 0.1 * jax.random.normal(ks[7], (8,), jnp.float32),
        "c3_w": conv_w(ks[8], 4, 8),
        "c3_b": 0.1 * jax.random.normal(ks[9], (4,), jnp.float32),
        "c4_w": conv_w(ks[10], 1, 4),
        "c4_b": 0.1 * jax.random.normal(ks[11], (1,), jnp.float32),
    }


def image_decoder_interp_forward(z, p):
    # fclayers: Linear(8,4096)+ReLU, Linear(4096,256)+ReLU
    h = fc_forward(z, p["fc_w1"], p["fc_b1"], p["fc_w2"], p["fc_b2"])   # (B, 256)
    # view(-1, 32, 4, 4): flat reinterpretation (halves the batch), as in PyTorch.
    x = h.reshape(-1, 512)                    # one row per 512-element "image"
    img = decoder_convs_forward(x, p)         # fused layers 1-4
    return img.reshape(-1, 1, 128, 128)


# ----------------------------------------------------------------------------
# Pure-JAX reference (correctness check)
# ----------------------------------------------------------------------------
def _reference_forward(z, p):
    # FC stage mirrors the bf16-weight design choice (same as the kernel).
    h = jnp.dot(z.astype(jnp.bfloat16), p["fc_w1"],
                preferred_element_type=jnp.float32) + p["fc_b1"]
    h = jnp.maximum(h, 0.0)
    h = jnp.dot(h.astype(jnp.bfloat16), p["fc_w2"],
                preferred_element_type=jnp.float32) + p["fc_b2"]
    h = jnp.maximum(h, 0.0)
    x = h.reshape(-1, 32, 4, 4)

    def conv(x, w, b):
        y = jax.lax.conv_general_dilated(
            x, w, window_strides=(1, 1), padding=((1, 1), (1, 1)),
            dimension_numbers=("NCHW", "OIHW", "NCHW"))
        return y + b.reshape(1, -1, 1, 1)

    def leaky(x):
        return jnp.where(x >= 0.0, x, 0.01 * x)

    def resize(x, m):
        return jnp.einsum("oh,bchw,pw->bcop", m, x, m)

    m16 = bilinear_matrix(16, 4)
    m64 = bilinear_matrix(64, 16)
    m128 = bilinear_matrix(128, 64)

    x = resize(leaky(conv(x, p["c1_w"], p["c1_b"])), m16)
    x = resize(leaky(conv(x, p["c2_w"], p["c2_b"])), m64)
    x = resize(leaky(conv(x, p["c3_w"], p["c3_b"])), m128)
    x = jax.nn.sigmoid(conv(x, p["c4_w"], p["c4_b"]))
    return x.reshape(-1, 1, 128, 128)


if __name__ == "__main__":
    key = jax.random.PRNGKey(0)
    k_params, k_z = jax.random.split(key)
    params = init_params(k_params)

    B, latent_dim = 2, 8
    z = jax.random.normal(k_z, (B, latent_dim), jnp.float32)

    out = image_decoder_interp_forward(z, params)
    out = jax.block_until_ready(out)

    assert out.shape == (B * 256 // 512, 1, 128, 128), out.shape
    assert bool(jnp.all(jnp.isfinite(out)))

    ref = jax.block_until_ready(_reference_forward(z, params))
    max_err = float(jnp.max(jnp.abs(out - ref)))
    assert max_err < 5e-3, f"mismatch vs pure-JAX reference: {max_err}"

    print("KERNEL_OK")
</pallas_src>

<mosaic_0001>
module attributes {stable_mosaic.version = 11 : i64} {
  func.func @_fc_kernel(%arg0: memref<2x8xf32, #tpu.memory_space<vmem>>, %arg1: memref<8x4096xbf16, #tpu.memory_space<vmem>>, %arg2: memref<1x4096xf32, #tpu.memory_space<vmem>>, %arg3: memref<4096x256xbf16, #tpu.memory_space<vmem>>, %arg4: memref<1x256xf32, #tpu.memory_space<vmem>>, %arg5: memref<2x256xf32, #tpu.memory_space<vmem>>) attributes {dimension_semantics = [], scalar_prefetch = 0 : i64, scratch_operands = 0 : i64, tpu.core_type = #tpu.core_type<tc>} {
    %c0 = arith.constant 0 : index
    %c0_0 = arith.constant 0 : index
    %0 = vector.load %arg0[%c0, %c0_0] : memref<2x8xf32, #tpu.memory_space<vmem>>, vector<2x8xf32>
    %1 = arith.truncf %0 : vector<2x8xf32> to vector<2x8xbf16>
    %c0_1 = arith.constant 0 : index
    %c0_2 = arith.constant 0 : index
    %2 = vector.load %arg1[%c0_1, %c0_2] : memref<8x4096xbf16, #tpu.memory_space<vmem>>, vector<8x4096xbf16>
    %cst = arith.constant dense<0.000000e+00> : vector<2x4096xf32>
    %3 = tpu.matmul %1, %2, %cst {dimension_numbers = #tpu.dot_dimension_numbers<[1], [0], [0], [1], [0, 0, 1, 1], [], []>} : vector<2x8xbf16>, vector<8x4096xbf16>, vector<2x4096xf32> -> vector<2x4096xf32>
    %c0_3 = arith.constant 0 : index
    %c0_4 = arith.constant 0 : index
    %4 = vector.load %arg2[%c0_3, %c0_4] : memref<1x4096xf32, #tpu.memory_space<vmem>>, vector<1x4096xf32>
    %5 = vector.broadcast %4 : vector<1x4096xf32> to vector<2x4096xf32>
    %6 = arith.addf %3, %5 : vector<2x4096xf32>
    %cst_5 = arith.constant 0.000000e+00 : f32
    %7 = vector.broadcast %cst_5 : f32 to vector<2x4096xf32>
    %8 = arith.maximumf %6, %7 : vector<2x4096xf32>
    %9 = arith.truncf %8 : vector<2x4096xf32> to vector<2x4096xbf16>
    %c0_6 = arith.constant 0 : index
    %c0_7 = arith.constant 0 : index
    %10 = vector.load %arg3[%c0_6, %c0_7] : memref<4096x256xbf16, #tpu.memory_space<vmem>>, vector<4096x256xbf16>
    %cst_8 = arith.constant dense<0.000000e+00> : vector<2x256xf32>
    %11 = tpu.matmul %9, %10, %cst_8 {dimension_numbers = #tpu.dot_dimension_numbers<[1], [0], [0], [1], [0, 0, 1, 1], [], []>} : vector<2x4096xbf16>, vector<4096x256xbf16>, vector<2x256xf32> -> vector<2x256xf32>
    %c0_9 = arith.constant 0 : index
    %c0_10 = arith.constant 0 : index
    %12 = vector.load %arg4[%c0_9, %c0_10] : memref<1x256xf32, #tpu.memory_space<vmem>>, vector<1x256xf32>
    %13 = vector.broadcast %12 : vector<1x256xf32> to vector<2x256xf32>
    %14 = arith.addf %11, %13 : vector<2x256xf32>
    %cst_11 = arith.constant 0.000000e+00 : f32
    %15 = vector.broadcast %cst_11 : f32 to vector<2x256xf32>
    %16 = arith.maximumf %14, %15 : vector<2x256xf32>
    %c0_12 = arith.constant 0 : index
    %c0_13 = arith.constant 0 : index
    %17 = vector.load %arg5[%c0_12, %c0_13] : memref<2x256xf32, #tpu.memory_space<vmem>>, vector<2x256xf32>
    tpu.vector_store %arg5[%c0_12, %c0_13], %16 {strides = array<i32>} : memref<2x256xf32, #tpu.memory_space<vmem>>, vector<2x256xf32>,
    return
  }
}

</mosaic_0001>

<bundles_post_ra>
// kernel: tpu_custom_call.1
= control target key start
LH: loop header
LB: loop body
LE: loop exit
PB: predicated region body
PF: predicated region fallthrough
CT: control target
= control target key end

     0   :  { %10 = vsyncpa [#allocation3], 0  ;;  %s7961_s0 = inlined_call_operand.hbm [shape: f32[2,8], index: 0, kind: input, shape index: {}]   ;;  %s7962_s1 = inlined_call_operand.hbm [shape: bf16[8,4096], index: 1, kind: input, shape index: {}]   ;;  %s7963_s2 = inlined_call_operand.hbm [shape: f32[1,4096], index: 2, kind: input, shape index: {}]   ;;  %s7964_s3 = inlined_call_operand.hbm [shape: bf16[4096,256], index: 3, kind: input, shape index: {}]   ;;  %s7965_s4 = inlined_call_operand.hbm [shape: f32[1,256], index: 4, kind: input, shape index: {}]   ;;  %s7966_s5 = inlined_call_operand.hbm [shape: f32[2,256], index: 5, kind: output, shape index: {}]  }
   0x1   :  { %11 = vsyncpa [#allocation6], 0 }
   0x2   :  { %12 = vsyncpa [#allocation9], 0  ;;  %s30_s20 = sshll.u32 %s7962_s1, 4  ;;  %s31_s20 = int_to_ptr.hbm [resolvable:$true] %s30_s20 }
   0x3   :  { %13 = vsyncpa [#allocation4], 0  ;;  %s7534_s21 = smov [#allocation5]   ;;  %s51_s25 = sshll.u32 %s7964_s3, 4  ;;  %s52_s25 = int_to_ptr.hbm [resolvable:$true] %s51_s25 }
   0x4   :  { %s32_s22 = sshll.u32 %s7534_s21, 4  ;;  %s7535_s26 = smov [#allocation8]   ;;  %s33_s22 = int_to_ptr.vmem [resolvable:$true] %s32_s22 }
   0x5   :  { %35 = dma.hbm_to_vmem [thread:$0]  %s31_s20, 2048, %s33_s22, [#allocation6]  }
   0x6   :  { %s53_s27 = sshll.u32 %s7535_s26, 4  ;;  %s7536_s28 = smov 128   ;;  %s54_s27 = int_to_ptr.vmem [resolvable:$true] %s53_s27 }
   0x7   :  { %s7537_s29 = smov 8   ;;  %s19_s1 = sshll.u32 %s7961_s0, 4  ;;  %s20_s1 = int_to_ptr.hbm [resolvable:$true] %s19_s1 }
   0x8   :  { %59 = dma.hbm_to_vmem [thread:$0]  %s52_s25, 65536, %s54_s27, [#allocation9], %s7536_s28, %s7536_s28, %s7537_s29  }
   0x9   :  { %s7538_s7 = smov [#allocation2]   ;;  %s41_s3 = sshll.u32 %s7963_s2, 4  ;;  %s42_s3 = int_to_ptr.hbm [resolvable:$true] %s41_s3 }
   0xa   :  { %s21_s8 = sshll.u32 %s7538_s7, 4  ;;  %s7539_s11 = smov [#allocation7]   ;;  %s22_s8 = int_to_ptr.vmem [resolvable:$true] %s21_s8 }
   0xb   :  { %24 = dma.hbm_to_vmem [thread:$0]  %s20_s1, 32, %s22_s8, [#allocation3]  }
   0xc   :  { %s43_s12 = sshll.u32 %s7539_s11, 4  ;;  %s65_s15 = sshll.u32 %s7965_s4, 4  ;;  %s44_s12 = int_to_ptr.vmem [resolvable:$true] %s43_s12  ;;  %s66_s15 = int_to_ptr.hbm [resolvable:$true] %s65_s15 }
   0xd   :  { %46 = dma.hbm_to_vmem [thread:$0]  %s42_s3, 512, %s44_s12, [#allocation6]  }
   0xe   :  { %s7540_s0 = smov [#allocation10]  }
   0xf   :  { %s67_s16 = sshll.u32 %s7540_s0, 4  ;;  %s68_s16 = int_to_ptr.vmem [resolvable:$true] %s67_s16 }
  0x10   :  { %70 = dma.hbm_to_vmem [thread:$0]  %s66_s15, 32, %s68_s16, [#allocation9]  }
  0x11   :  { %7526 = dma.done.wait [#allocation3], 32  }
  0x12   :  { %7527 = vsyncadd [#allocation3], 4294967264 }
  0x13   :  { %7528 = dma.done.wait [#allocation6], 2560  }
  0x14   :  { %7529 = vsyncadd [#allocation6], 4294964736 }
  0x15   :  { %7530 = dma.done.wait [#allocation9], 65568  }
  0x16   :  { %7531 = vsyncadd [#allocation9], 4294901728  ;;  %v94_v0 = vld [vmem:[#allocation5] sm:$0xff]  ;;  %vm266_vm0 = vcmask 1043456   ;;  %v95_v1 = vld [vmem:[#allocation5 + $0x8] sm:$0xff]  ;;  %vm262_vm1 = vcmask 64512  }
  0x17   :  { %v92_v2 = vld [vmem:[#allocation2] sm:$0x3]  ;;  %v198_v3 = vunpack.c.l.b16 %v94_v0  ;;  %v199_v4 = vunpack.c.h.b16 %v94_v0  ;;  %v200_v5 = vunpack.c.l.b16 %v95_v1  ;;  %v201_v6 = vunpack.c.h.b16 %v95_v1  ;;  %v96_v7 = vld [vmem:[#allocation5 + $0x10] sm:$0xff]  ;;  %v98_v21 = vld [vmem:[#allocation5 + $0x20] sm:$0xff]  ;;  %s7541_s2 = smov [#allocation11]   ;;  %s4769_s19 = sshll.u32 %s7966_s5, 4  ;;  %s4770_s19 = int_to_ptr.hbm [resolvable:$true] %s4769_s19 }
  0x18   :  { %v97_v8 = vld [vmem:[#allocation5 + $0x18] sm:$0xff]  ;;  %v7587_v9 = vpack.c.bf16 %v92_v2, %v92_v2  ;;  %v202_v10 = vunpack.c.l.b16 %v96_v7  ;;  %v203_v11 = vunpack.c.h.b16 %v96_v7  ;;  %v99_v22 = vld [vmem:[#allocation5 + $0x28] sm:$0xff]  ;;  %v206_v30 = vunpack.c.l.b16 %v98_v21  ;;  %v100_v44 = vld [vmem:[#allocation5 + $0x30] sm:$0xff]  ;;  %s4767_s4 = sshll.u32 %s7541_s2, 4  ;;  %s4768_s4 = int_to_ptr.vmem [resolvable:$true] %s4767_s4 }
  0x19   :  { %v204_v12 = vunpack.c.l.b16 %v97_v8  ;;  %v230_v13 = vpack.c.b16 %v198_v3, %v198_v3  ;;  %v231_v14 = vpack.c.b16 %v199_v4, %v199_v4  ;;  %v232_v15 = vpack.c.b16 %v200_v5, %v200_v5  ;;  %v101_v45 = vld [vmem:[#allocation5 + $0x38] sm:$0xff]  ;;  %v102_v58 = vld [vmem:[#allocation5 + $0x40] sm:$0xff]  ;;  %v103_v59 = vld [vmem:[#allocation5 + $0x48] sm:$0xff] }
  0x1a   :  { %v233_v16 = vpack.c.b16 %v201_v6, %v201_v6  ;;  %v234_v17 = vpack.c.b16 %v202_v10, %v202_v10  ;;  %v235_v18 = vpack.c.b16 %v203_v11, %v203_v11  ;;  %v205_v20 = vunpack.c.h.b16 %v97_v8  ;;  %v104_v8 = vld [vmem:[#allocation5 + $0x50] sm:$0xff]  ;;  %v105_v10 = vld [vmem:[#allocation5 + $0x58] sm:$0xff] }
  0x1b   :  { %v236_v19 = vpack.c.b16 %v204_v12, %v204_v12  ;;  %v268_v23 = vsel %vm266_vm0, %v230_v13, 0  ;;  %v271_v24 = vsel %vm266_vm0, %v231_v14, 0  ;;  %v274_v25 = vsel %vm266_vm0, %v232_v15, 0 }
  0x1c   :  { %v277_v26 = vsel %vm266_vm0, %v233_v16, 0  ;;  %370 = vmatpush.bf16.msra.mxu0 %v268_v23  ;;  %383 = vmatpush.bf16.msra.mxu1 %v271_v24  ;;  %v280_v27 = vsel %vm266_vm0, %v234_v17, 0  ;;  %v283_v28 = vsel %vm266_vm0, %v235_v18, 0  ;;  %v237_v29 = vpack.c.b16 %v205_v20, %v205_v20  ;;  %v106_v23 = vld [vmem:[#allocation5 + $0x60] sm:$0xff]  ;;  %v107_v24 = vld [vmem:[#allocation5 + $0x68] sm:$0xff] }
  0x1d   :  { %396 = vmatpush.bf16.msra.mxu2 %v274_v25  ;;  %409 = vmatpush.bf16.msra.mxu3 %v277_v26  ;;  %v207_v31 = vunpack.c.h.b16 %v98_v21  ;;  %v208_v32 = vunpack.c.l.b16 %v99_v22  ;;  %v209_v33 = vunpack.c.h.b16 %v99_v22  ;;  %v286_v34 = vsel %vm266_vm0, %v236_v19, 0 }
  0x1e   :  { %v289_v35 = vsel %vm266_vm0, %v237_v29, 0  ;;  %v238_v36 = vpack.c.b16 %v206_v30, %v206_v30  ;;  %v210_v46 = vunpack.c.l.b16 %v100_v44  ;;  %v211_v47 = vunpack.c.h.b16 %v100_v44 }
  0x1f   :  { %4781 = vmatmul.msk.bf16.vlgmr.msra.gmra.mxu0 %vm262_vm1, %v7587_v9  ;;  %4782 = vmatmul.msk.bf16.vlgmr.msra.gmra.mxu1 %vm262_vm1, %v7587_v9  ;;  %v239_v37 = vpack.c.b16 %v207_v31, %v207_v31  ;;  %v240_v38 = vpack.c.b16 %v208_v32, %v208_v32  ;;  %v241_v39 = vpack.c.b16 %v209_v33, %v209_v33  ;;  %v212_v48 = vunpack.c.l.b16 %v101_v45 }
  0x20   :  { %422 = vmatpush.bf16.msrb.mxu0 %v280_v27  ;;  %435 = vmatpush.bf16.msrb.mxu1 %v283_v28  ;;  %v292_v40 = vsel %vm266_vm0, %v238_v36, 0  ;;  %v213_v49 = vunpack.c.h.b16 %v101_v45  ;;  %v242_v50 = vpack.c.b16 %v210_v46, %v210_v46  ;;  %v243_v51 = vpack.c.b16 %v211_v47, %v211_v47 }
  0x21   :  { %4783 = vmatmul.msk.bf16.vlgmr.msra.gmra.mxu2 %vm262_vm1, %v7587_v9  ;;  %4784 = vmatmul.msk.bf16.vlgmr.msra.gmra.mxu3 %vm262_vm1, %v7587_v9  ;;  %v295_v41 = vsel %vm266_vm0, %v239_v37, 0  ;;  %v298_v42 = vsel %vm266_vm0, %v240_v38, 0  ;;  %v301_v43 = vsel %vm266_vm0, %v241_v39, 0  ;;  %v244_v52 = vpack.c.b16 %v212_v48, %v212_v48  ;;  %v108_v37 = vld [vmem:[#allocation5 + $0x70] sm:$0xff]  ;;  %v109_v38 = vld [vmem:[#allocation5 + $0x78] sm:$0xff] }
  0x22   :  { %448 = vmatpush.bf16.msrb.mxu2 %v286_v34  ;;  %461 = vmatpush.bf16.msrb.mxu3 %v289_v35  ;;  %v245_v53 = vpack.c.b16 %v213_v49, %v213_v49  ;;  %v304_v54 = vsel %vm266_vm0, %v242_v50, 0  ;;  %v307_v55 = vsel %vm266_vm0, %v243_v51, 0  ;;  %v214_v60 = vunpack.c.l.b16 %v102_v58  ;;  %v4871_v51 = vld [vmem:[#allocation8 + $0x70] sm:$0xf] }
  0x23   :  { %v310_v56 = vsel %vm266_vm0, %v244_v52, 0  ;;  %v215_v61 = vunpack.c.h.b16 %v102_v58  ;;  %v216_v62 = vunpack.c.l.b16 %v103_v59  ;;  %v217_v63 = vunpack.c.h.b16 %v103_v59  ;;  %v6876_v52 = vld [vmem:[#allocation8 + $0x74] sm:$0xf0] }
  0x24   :  { %474 = vmatpush.bf16.msra.mxu0 %v292_v40  ;;  %487 = vmatpush.bf16.msra.mxu1 %v295_v41  ;;  %v313_v57 = vsel %vm266_vm0, %v245_v53, 0  ;;  %v246_v0 = vpack.c.b16 %v214_v60, %v214_v60  ;;  %v218_v11 = vunpack.c.l.b16 %v104_v8  ;;  %v219_v12 = vunpack.c.h.b16 %v104_v8  ;;  %v4935_v53 = vld [vmem:[#allocation8 + $0xf0] sm:$0xf]  ;;  %v6924_v58 = vld [vmem:[#allocation8 + $0x1f4] sm:$0xf0] }
  0x25   :  { %v247_v1 = vpack.c.b16 %v215_v61, %v215_v61  ;;  %v248_v2 = vpack.c.b16 %v216_v62, %v216_v62  ;;  %v249_v3 = vpack.c.b16 %v217_v63, %v217_v63  ;;  %v220_v13 = vunpack.c.l.b16 %v105_v10  ;;  %v4863_v61 = vld [vmem:[#allocation8 + $0x60] sm:$0xf]  ;;  %v6874_v62 = vld [vmem:[#allocation8 + $0x64] sm:$0xf0] }
  0x26   :  { %500 = vmatpush.bf16.msra.mxu2 %v298_v42  ;;  %513 = vmatpush.bf16.msra.mxu3 %v301_v43  ;;  %v316_v4 = vsel %vm266_vm0, %v246_v0, 0  ;;  %v221_v14 = vunpack.c.h.b16 %v105_v10  ;;  %v250_v15 = vpack.c.b16 %v218_v11, %v218_v11  ;;  %v251_v16 = vpack.c.b16 %v219_v12, %v219_v12  ;;  %v4855_v10 = vld [vmem:[#allocation8 + $0x50] sm:$0xf]  ;;  %v6872_v11 = vld [vmem:[#allocation8 + $0x54] sm:$0xf0] }
  0x27   :  { %v319_v5 = vsel %vm266_vm0, %v247_v1, 0  ;;  %v322_v6 = vsel %vm266_vm0, %v248_v2, 0  ;;  %v325_v7 = vsel %vm266_vm0, %v249_v3, 0  ;;  %v252_v17 = vpack.c.b16 %v220_v13, %v220_v13  ;;  %v4927_v1 = vld [vmem:[#allocation8 + $0xe0] sm:$0xf] }
  0x28   :  { %v253_v18 = vpack.c.b16 %v221_v14, %v221_v14  ;;  %v328_v19 = vsel %vm266_vm0, %v250_v15, 0  ;;  %v331_v20 = vsel %vm266_vm0, %v251_v16, 0  ;;  %v222_v25 = vunpack.c.l.b16 %v106_v23  ;;  %v6890_v2 = vld [vmem:[#allocation8 + $0xe4] sm:$0xf0]  ;;  %v4991_v3 = vld [vmem:[#allocation8 + $0x160] sm:$0xf] }
  0x29   :  { %v334_v21 = vsel %vm266_vm0, %v252_v17, 0  ;;  %v223_v26 = vunpack.c.h.b16 %v106_v23  ;;  %v224_v27 = vunpack.c.l.b16 %v107_v24  ;;  %v225_v28 = vunpack.c.h.b16 %v107_v24  ;;  %v4919_v14 = vld [vmem:[#allocation8 + $0xd0] sm:$0xf]  ;;  %v6888_v15 = vld [vmem:[#allocation8 + $0xd4] sm:$0xf0] }
  0x2a   :  { %v337_v22 = vsel %vm266_vm0, %v253_v18, 0  ;;  %v254_v29 = vpack.c.b16 %v222_v25, %v222_v25  ;;  %v226_v39 = vunpack.c.l.b16 %v108_v37  ;;  %v227_v40 = vunpack.c.h.b16 %v108_v37  ;;  %v4983_v16 = vld [vmem:[#allocation8 + $0x150] sm:$0xf]  ;;  %v6904_v17 = vld [vmem:[#allocation8 + $0x154] sm:$0xf0] }
  0x2b   :  { %v255_v30 = vpack.c.b16 %v223_v26, %v223_v26  ;;  %v256_v31 = vpack.c.b16 %v224_v27, %v224_v27  ;;  %v257_v32 = vpack.c.b16 %v225_v28, %v225_v28  ;;  %v228_v41 = vunpack.c.l.b16 %v109_v38  ;;  %v5047_v18 = vld [vmem:[#allocation8 + $0x1d0] sm:$0xf]  ;;  %v6870_v23 = vld [vmem:[#allocation8 + $0x44] sm:$0xf0]  ;;  %v4911_v26 = vld [vmem:[#allocation8 + $0xc0] sm:$0xf] }
  0x2c   :  { %v340_v33 = vsel %vm266_vm0, %v254_v29, 0  ;;  %v229_v42 = vunpack.c.h.b16 %v109_v38  ;;  %v258_v43 = vpack.c.b16 %v226_v39, %v226_v39  ;;  %v259_v44 = vpack.c.b16 %v227_v40, %v227_v40  ;;  %v6886_v27 = vld [vmem:[#allocation8 + $0xc4] sm:$0xf0]  ;;  %v4975_v28 = vld [vmem:[#allocation8 + $0x140] sm:$0xf] }
  0x2d   :  { %v343_v34 = vsel %vm266_vm0, %v255_v30, 0  ;;  %v346_v35 = vsel %vm266_vm0, %v256_v31, 0  ;;  %v349_v36 = vsel %vm266_vm0, %v257_v32, 0  ;;  %v260_v45 = vpack.c.b16 %v228_v41, %v228_v41  ;;  %v6902_v29 = vld [vmem:[#allocation8 + $0x144] sm:$0xf0] }
  0x2e   :  { %v261_v46 = vpack.c.b16 %v229_v42, %v229_v42  ;;  %v352_v47 = vsel %vm266_vm0, %v258_v43, 0  ;;  %v355_v48 = vsel %vm266_vm0, %v259_v44, 0  ;;  %v4872_v59 = vor.u32 %v6876_v52, %v4871_v51  ;;  %v5039_v30 = vld [vmem:[#allocation8 + $0x1c0] sm:$0xf]  ;;  %v6918_v31 = vld [vmem:[#allocation8 + $0x1c4] sm:$0xf0] }
  0x2f   :  { %4785 = vmatmul.msk.bf16.vlgmr.msrb.gmra.mxu0 %vm262_vm1, %v7587_v9  ;;  %4786 = vmatmul.msk.bf16.vlgmr.msrb.gmra.mxu1 %vm262_vm1, %v7587_v9  ;;  %v358_v49 = vsel %vm266_vm0, %v260_v45, 0  ;;  %v4928_v8 = vor.u32 %v6890_v2, %v4927_v1  ;;  %v4984_v24 = vor.u32 %v6904_v17, %v4983_v16  ;;  %v5040_v37 = vor.u32 %v6918_v31, %v5039_v30  ;;  %v4903_v38 = vld [vmem:[#allocation8 + $0xb0] sm:$0xf]  ;;  %v6884_v39 = vld [vmem:[#allocation8 + $0xb4] sm:$0xf0] }
  0x30   :  { %526 = vmatpush.bf16.msrb.mxu0 %v304_v54  ;;  %539 = vmatpush.bf16.msrb.mxu1 %v307_v55  ;;  %v361_v50 = vsel %vm266_vm0, %v261_v46, 0  ;;  %v6892_v54 = vld [vmem:[#allocation8 + $0xf4] sm:$0xf0]  ;;  %v4999_v55 = vld [vmem:[#allocation8 + $0x170] sm:$0xf]  ;;  %v4904_v45 = vor.u32 %v6884_v39, %v4903_v38  ;;  %vm4758_vm2 = vcmask 1041408  }
  0x31   :  { %4787 = vmatmul.msk.bf16.vlgmr.msrb.gmra.mxu2 %vm262_vm1, %v7587_v9  ;;  %4788 = vmatmul.msk.bf16.vlgmr.msrb.gmra.mxu3 %vm262_vm1, %v7587_v9  ;;  %v4936_v60 = vor.u32 %v6892_v54, %v4935_v53  ;;  %v4967_v40 = vld [vmem:[#allocation8 + $0x130] sm:$0xf]  ;;  %v6900_v41 = vld [vmem:[#allocation8 + $0x134] sm:$0xf0]  ;;  %v4831_v46 = vld [vmem:[#allocation8 + $0x20] sm:$0xf] }
  0x32   :  { %552 = vmatpush.bf16.msrb.mxu2 %v310_v56  ;;  %565 = vmatpush.bf16.msrb.mxu3 %v313_v57  ;;  %v6908_v56 = vld [vmem:[#allocation8 + $0x174] sm:$0xf0]  ;;  %v5063_v57 = vld [vmem:[#allocation8 + $0x1f0] sm:$0xf]  ;;  %v6882_v51 = vld [vmem:[#allocation8 + $0xa4] sm:$0xf0] }
  0x33   :  { %v5000_v63 = vor.u32 %v6908_v56, %v4999_v55  ;;  %v5064_v0 = vor.u32 %v6924_v58, %v5063_v57  ;;  %v5031_v42 = vld [vmem:[#allocation8 + $0x1b0] sm:$0xf]  ;;  %v6916_v43 = vld [vmem:[#allocation8 + $0x1b4] sm:$0xf0]  ;;  %v4959_v52 = vld [vmem:[#allocation8 + $0x120] sm:$0xf] }
  0x34   :  { %v6898_v53 = vld [vmem:[#allocation8 + $0x124] sm:$0xf0]  ;;  %v5023_v54 = vld [vmem:[#allocation8 + $0x1a0] sm:$0xf]  ;;  %v4823_v58 = vld [vmem:[#allocation8 + $0x10] sm:$0xf] }
  0x35   :  { %v6914_v55 = vld [vmem:[#allocation8 + $0x1a4] sm:$0xf0]  ;;  %v6896_v1 = vld [vmem:[#allocation8 + $0x114] sm:$0xf0]  ;;  %v5015_v2 = vld [vmem:[#allocation8 + $0x190] sm:$0xf] }
  0x36   :  { %v6910_v16 = vld [vmem:[#allocation8 + $0x184] sm:$0xf0]  ;;  %v5183_v39 = vld [vmem:[#allocation8 + $0x2e0] sm:$0xf] }
  0x3f   :  { %4789 = vmatmul.msk.bf16.vlgmr.msra.gmra.mxu0 %vm262_vm1, %v7587_v9  ;;  %4790 = vmatmul.msk.bf16.vlgmr.msra.gmra.mxu1 %vm262_vm1, %v7587_v9 }
  0x40   :  { %578 = vmatpush.bf16.msra.mxu0 %v316_v4  ;;  %591 = vmatpush.bf16.msra.mxu1 %v319_v5  ;;  %v6906_v4 = vld [vmem:[#allocation8 + $0x164] sm:$0xf0]  ;;  %v5055_v5 = vld [vmem:[#allocation8 + $0x1e0] sm:$0xf] }
  0x41   :  { %4791 = vmatmul.msk.bf16.vlgmr.msra.gmra.mxu2 %vm262_vm1, %v7587_v9  ;;  %4792 = vmatmul.msk.bf16.vlgmr.msra.gmra.mxu3 %vm262_vm1, %v7587_v9  ;;  %v4992_v12 = vor.u32 %v6906_v4, %v4991_v3  ;;  %v6912_v3 = vld [vmem:[#allocation8 + $0x194] sm:$0xf0]  ;;  %v4815_v4 = vld [vmem:[#allocation8] sm:$0xf] }
  0x42   :  { %604 = vmatpush.bf16.msra.mxu2 %v322_v6  ;;  %617 = vmatpush.bf16.msra.mxu3 %v325_v7  ;;  %v6922_v6 = vld [vmem:[#allocation8 + $0x1e4] sm:$0xf0]  ;;  %v4864_v7 = vor.u32 %v6874_v62, %v4863_v61  ;;  %v5024_v61 = vor.u32 %v6914_v55, %v5023_v54  ;;  %v4887_v62 = vld [vmem:[#allocation8 + $0x90] sm:$0xf]  ;;  %v6936_v54 = vld [vmem:[#allocation8 + $0x254] sm:$0xf0] }
  0x43   :  { %v5056_v13 = vor.u32 %v6922_v6, %v5055_v5  ;;  %v6862_v5 = vld [vmem:[#allocation8 + $0x4] sm:$0xf0]  ;;  %v7685_v6 = vld [vmem:[#allocation7] sm:$0xff]  ;;  %v5175_v55 = vld [vmem:[#allocation8 + $0x2d0] sm:$0xf] }
  0x44   :  { %v118_v17 = vperm.slane %v7685_v6, 0 }
  0x4f   :  { %4793 = vmatmul.msk.bf16.vlgmr.msrb.gmra.mxu0 %vm262_vm1, %v7587_v9  ;;  %4794 = vmatmul.msk.bf16.vlgmr.msrb.gmra.mxu1 %vm262_vm1, %v7587_v9 }
  0x50   :  { %630 = vmatpush.bf16.msrb.mxu0 %v328_v19  ;;  %643 = vmatpush.bf16.msrb.mxu1 %v331_v20  ;;  %v6920_v19 = vld [vmem:[#allocation8 + $0x1d4] sm:$0xf0]  ;;  %v4856_v20 = vor.u32 %v6872_v11, %v4855_v10  ;;  %v6878_v10 = vld [vmem:[#allocation8 + $0x84] sm:$0xf0]  ;;  %v4943_v11 = vld [vmem:[#allocation8 + $0x100] sm:$0xf] }
  0x51   :  { %4795 = vmatmul.msk.bf16.vlgmr.msrb.gmra.mxu2 %vm262_vm1, %v7587_v9  ;;  %4796 = vmatmul.msk.bf16.vlgmr.msrb.gmra.mxu3 %vm262_vm1, %v7587_v9  ;;  %v5048_v25 = vor.u32 %v6920_v19, %v5047_v18  ;;  %v119_v18 = vperm.slane %v7685_v6, 1  ;;  %v5127_v19 = vld [vmem:[#allocation8 + $0x270] sm:$0xf] }
  0x52   :  { %656 = vmatpush.bf16.msrb.mxu2 %v334_v21  ;;  %669 = vmatpush.bf16.msrb.mxu3 %v337_v22  ;;  %v4920_v21 = vor.u32 %v6888_v15, %v4919_v14  ;;  %v4847_v22 = vld [vmem:[#allocation8 + $0x40] sm:$0xf]  ;;  %v6894_v14 = vld [vmem:[#allocation8 + $0x104] sm:$0xf0] }
  0x53   :  { %v4848_v32 = vor.u32 %v6870_v23, %v4847_v22  ;;  %v5007_v15 = vld [vmem:[#allocation8 + $0x180] sm:$0xf]  ;;  %v6956_v22 = vld [vmem:[#allocation8 + $0x2f4] sm:$0xf0]  ;;  %v5255_v23 = vld [vmem:[#allocation8 + $0x370] sm:$0xf] }
  0x54   :  { %v5008_v30 = vor.u32 %v6910_v16, %v5007_v15  ;;  %v6950_v15 = vld [vmem:[#allocation8 + $0x2c4] sm:$0xf0]  ;;  %v5231_v16 = vld [vmem:[#allocation8 + $0x340] sm:$0xf] }
  0x5f   :  { %4797 = vmatmul.msk.bf16.vlgmr.msra.gmra.mxu0 %vm262_vm1, %v7587_v9  ;;  %4798 = vmatmul.msk.bf16.vlgmr.msra.gmra.mxu1 %vm262_vm1, %v7587_v9 }
  0x60   :  { %682 = vmatpush.bf16.msra.mxu0 %v340_v33  ;;  %695 = vmatpush.bf16.msra.mxu1 %v343_v34  ;;  %v4912_v33 = vor.u32 %v6886_v27, %v4911_v26  ;;  %v4839_v34 = vld [vmem:[#allocation8 + $0x30] sm:$0xf]  ;;  %v6972_v26 = vld [vmem:[#allocation8 + $0x374] sm:$0xf0] }
  0x61   :  { %4799 = vmatmul.msk.bf16.vlgmr.msra.gmra.mxu2 %vm262_vm1, %v7587_v9  ;;  %4800 = vmatmul.msk.bf16.vlgmr.msra.gmra.mxu3 %vm262_vm1, %v7587_v9  ;;  %v5319_v27 = vld [vmem:[#allocation8 + $0x3f0] sm:$0xf] }
  0x62   :  { %708 = vmatpush.bf16.msra.mxu2 %v346_v35  ;;  %721 = vmatpush.bf16.msra.mxu3 %v349_v36  ;;  %v6868_v35 = vld [vmem:[#allocation8 + $0x34] sm:$0xf0]  ;;  %v4976_v36 = vor.u32 %v6902_v29, %v4975_v28  ;;  %v4944_v29 = vor.u32 %v6894_v14, %v4943_v11 }
  0x63   :  { %v4840_v44 = vor.u32 %v6868_v35, %v4839_v34  ;;  %v6988_v28 = vld [vmem:[#allocation8 + $0x3f4] sm:$0xf0]  ;;  %v6938_v34 = vld [vmem:[#allocation8 + $0x264] sm:$0xf0] }
  0x64   :  { %v5320_v38 = vor.u32 %v6988_v28, %v5319_v27 }
  0x6f   :  { %4801 = vmatmul.msk.bf16.vlgmr.msrb.gmra.mxu0 %vm262_vm1, %v7587_v9  ;;  %4802 = vmatmul.msk.bf16.vlgmr.msrb.gmra.mxu1 %vm262_vm1, %v7587_v9 }
  0x70   :  { %734 = vmatpush.bf16.msrb.mxu0 %v352_v47  ;;  %747 = vmatpush.bf16.msrb.mxu1 %v355_v48  ;;  %v6866_v47 = vld [vmem:[#allocation8 + $0x24] sm:$0xf0]  ;;  %v4968_v48 = vor.u32 %v6900_v41, %v4967_v40  ;;  %v5247_v41 = vld [vmem:[#allocation8 + $0x360] sm:$0xf] }
  0x71   :  { %4803 = vmatmul.msk.bf16.vlgmr.msrb.gmra.mxu2 %vm262_vm1, %v7587_v9  ;;  %4804 = vmatmul.msk.bf16.vlgmr.msrb.gmra.mxu3 %vm262_vm1, %v7587_v9  ;;  %v4832_v56 = vor.u32 %v6866_v47, %v4831_v46  ;;  %v6954_v40 = vld [vmem:[#allocation8 + $0x2e4] sm:$0xf0]  ;;  %v120_v47 = vperm.slane %v7685_v6, 2 }
  0x72   :  { %760 = vmatpush.bf16.msrb.mxu2 %v358_v49  ;;  %773 = vmatpush.bf16.msrb.mxu3 %v361_v50  ;;  %v5032_v49 = vor.u32 %v6916_v43, %v5031_v42  ;;  %v4895_v50 = vld [vmem:[#allocation8 + $0xa0] sm:$0xf]  ;;  %v6986_v46 = vld [vmem:[#allocation8 + $0x3e4] sm:$0xf0] }
  0x73   :  { %v4896_v57 = vor.u32 %v6882_v51, %v4895_v50 }
  0x7f   :  { %4805 = vmatmul.msk.bf16.vlgmr.msra.gmra.mxu0 %vm262_vm1, %v7587_v9  ;;  %4806 = vmatmul.msk.bf16.vlgmr.msra.gmra.mxu1 %vm262_vm1, %v7587_v9 }
  0x80   :  { %3921 = vmatpush.bf16.msra.mxu0 %v4872_v59  ;;  %3934 = vmatpush.bf16.msra.mxu1 %v4936_v60  ;;  %v6864_v59 = vld [vmem:[#allocation8 + $0x14] sm:$0xf0]  ;;  %v4960_v60 = vor.u32 %v6898_v53, %v4959_v52  ;;  %v5184_v53 = vor.u32 %v6954_v40, %v5183_v39  ;;  %v5087_v40 = vld [vmem:[#allocation8 + $0x220] sm:$0xf] }
  0x81   :  { %4807 = vmatmul.msk.bf16.vlgmr.msra.gmra.mxu2 %vm262_vm1, %v7587_v9  ;;  %4808 = vmatmul.msk.bf16.vlgmr.msra.gmra.mxu3 %vm262_vm1, %v7587_v9 }
  0x82   :  { %3947 = vmatpush.bf16.msra.mxu2 %v5000_v63  ;;  %3960 = vmatpush.bf16.msra.mxu3 %v5064_v0  ;;  %v6880_v63 = vld [vmem:[#allocation8 + $0x94] sm:$0xf0]  ;;  %v4951_v0 = vld [vmem:[#allocation8 + $0x110] sm:$0xf] }
  0x84   :  { %3922 = vmatpush.bf16.msra.mxu0 %v4864_v7  ;;  %3935 = vmatpush.bf16.msra.mxu1 %v4928_v8  ;;  %v4888_v7 = vor.u32 %v6880_v63, %v4887_v62  ;;  %v4879_v8 = vld [vmem:[#allocation8 + $0x80] sm:$0xf]  ;;  %v5303_v63 = vld [vmem:[#allocation8 + $0x3d0] sm:$0xf] }
  0x86   :  { %3948 = vmatpush.bf16.msra.mxu2 %v4992_v12  ;;  %3961 = vmatpush.bf16.msra.mxu3 %v5056_v13  ;;  %v4952_v12 = vor.u32 %v6896_v1, %v4951_v0  ;;  %v5016_v13 = vor.u32 %v6912_v3, %v5015_v2  ;;  %v6984_v0 = vld [vmem:[#allocation8 + $0x3d4] sm:$0xf0] }
  0x87   :  { %v5304_v14 = vor.u32 %v6984_v0, %v5303_v63  ;;  %v125_v63 = vperm.slane %v7685_v6, 7  ;;  %v6944_v0 = vld [vmem:[#allocation8 + $0x294] sm:$0xf0] }
  0x88   :  { %3923 = vmatpush.bf16.msra.mxu0 %v4856_v20  ;;  %3936 = vmatpush.bf16.msra.mxu1 %v4920_v21  ;;  %v6940_v20 = vld [vmem:[#allocation8 + $0x274] sm:$0xf0]  ;;  %v5191_v21 = vld [vmem:[#allocation8 + $0x2f0] sm:$0xf] }
  0x89   :  { %v5128_v31 = vor.u32 %v6940_v20, %v5127_v19  ;;  %v6982_v19 = vld [vmem:[#allocation8 + $0x3c4] sm:$0xf0] }
  0x8a   :  { %3949 = vmatpush.bf16.msra.mxu2 %v4984_v24  ;;  %3962 = vmatpush.bf16.msra.mxu3 %v5048_v25  ;;  %v4816_v24 = vor.u32 %v6862_v5, %v4815_v4  ;;  %v4880_v25 = vor.u32 %v6878_v10, %v4879_v8  ;;  %v5167_v8 = vld [vmem:[#allocation8 + $0x2c0] sm:$0xf] }
  0x8c   :  { %3924 = vmatpush.bf16.msra.mxu0 %v4848_v32  ;;  %3937 = vmatpush.bf16.msra.mxu1 %v4912_v33  ;;  %v5192_v32 = vor.u32 %v6956_v22, %v5191_v21  ;;  %v5119_v33 = vld [vmem:[#allocation8 + $0x260] sm:$0xf] }
  0x8d   :  { %v5120_v52 = vor.u32 %v6938_v34, %v5119_v33  ;;  %v6964_v33 = vld [vmem:[#allocation8 + $0x334] sm:$0xf0]  ;;  %v5287_v34 = vld [vmem:[#allocation8 + $0x3b0] sm:$0xf] }
  0x8e   :  { %3950 = vmatpush.bf16.msra.mxu2 %v4976_v36  ;;  %3963 = vmatpush.bf16.msra.mxu3 %v5040_v37  ;;  %v5256_v37 = vor.u32 %v6972_v26, %v5255_v23  ;;  %v5168_v23 = vor.u32 %v6950_v15, %v5167_v8  ;;  %v6932_v26 = vld [vmem:[#allocation8 + $0x234] sm:$0xf0] }
  0x8f   :  { %4809 = vmatmul.msk.bf16.vlgmr.msrb.gmra.mxu0 %vm262_vm1, %v7587_v9  ;;  %4810 = vmatmul.msk.bf16.vlgmr.msrb.gmra.mxu1 %vm262_vm1, %v7587_v9 }
  0x90   :  { %3925 = vmatpush.bf16.msra.mxu0 %v4840_v44  ;;  %3938 = vmatpush.bf16.msra.mxu1 %v4904_v45  ;;  %v6970_v44 = vld [vmem:[#allocation8 + $0x364] sm:$0xf0]  ;;  %v5311_v45 = vld [vmem:[#allocation8 + $0x3e0] sm:$0xf] }
  0x91   :  { %4811 = vmatmul.msk.bf16.vlgmr.msrb.gmra.mxu2 %vm262_vm1, %v7587_v9  ;;  %4812 = vmatmul.msk.bf16.vlgmr.msrb.gmra.mxu3 %vm262_vm1, %v7587_v9  ;;  %v4824_v9 = vor.u32 %v6864_v59, %v4823_v58  ;;  %v6952_v58 = vld [vmem:[#allocation8 + $0x2d4] sm:$0xf0]  ;;  %v5239_v59 = vld [vmem:[#allocation8 + $0x350] sm:$0xf] }
  0x92   :  { %3951 = vmatpush.bf16.msra.mxu2 %v4968_v48  ;;  %3964 = vmatpush.bf16.msra.mxu3 %v5032_v49  ;;  %v121_v48 = vperm.slane %v7685_v6, 3  ;;  %v5111_v49 = vld [vmem:[#allocation8 + $0x250] sm:$0xf]  ;;  %v5176_v4 = vor.u32 %v6952_v58, %v5175_v55  ;;  %v123_v58 = vperm.slane %v7685_v6, 5 }
  0x93   :  { %v5112_v3 = vor.u32 %v6936_v54, %v5111_v49  ;;  %v6962_v49 = vld [vmem:[#allocation8 + $0x324] sm:$0xf0]  ;;  %v5079_v55 = vld [vmem:[#allocation8 + $0x210] sm:$0xf] }
  0x94   :  { %3926 = vmatpush.bf16.msra.mxu0 %v4832_v56  ;;  %3939 = vmatpush.bf16.msra.mxu1 %v4896_v57  ;;  %v5248_v56 = vor.u32 %v6970_v44, %v5247_v41  ;;  %v5312_v57 = vor.u32 %v6986_v46, %v5311_v45  ;;  %v6930_v41 = vld [vmem:[#allocation8 + $0x224] sm:$0xf0]  ;;  %v5151_v46 = vld [vmem:[#allocation8 + $0x2a0] sm:$0xf] }
  0x96   :  { %3952 = vmatpush.bf16.msra.mxu2 %v4960_v60  ;;  %3965 = vmatpush.bf16.msra.mxu3 %v5024_v61  ;;  %v6968_v60 = vld [vmem:[#allocation8 + $0x354] sm:$0xf0] }
  0x97   :  { %v5240_v5 = vor.u32 %v6968_v60, %v5239_v59 }
  0x98   :  { %3927 = vmatpush.bf16.msra.mxu0 %v4824_v9  ;;  %3940 = vmatpush.bf16.msra.mxu1 %v4888_v7  ;;  %v5103_v9 = vld [vmem:[#allocation8 + $0x240] sm:$0xf]  ;;  %v6934_v7 = vld [vmem:[#allocation8 + $0x244] sm:$0xf0] }
  0x99   :  { %v5104_v22 = vor.u32 %v6934_v7, %v5103_v9  ;;  %v5071_v9 = vld [vmem:[#allocation8 + $0x200] sm:$0xf] }
  0x9a   :  { %3953 = vmatpush.bf16.msra.mxu2 %v4952_v12  ;;  %3966 = vmatpush.bf16.msra.mxu3 %v5016_v13 }
  0x9c   :  { %v372_v35 = vpop.f32.mrf.mxu0  ;;  %v385_v36 = vpop.f32.mrf.mxu1  ;;  %3928 = vmatpush.bf16.msra.mxu0 %v4816_v24  ;;  %3941 = vmatpush.bf16.msra.mxu1 %v4880_v25  ;;  %v5095_v25 = vld [vmem:[#allocation8 + $0x230] sm:$0xf] }
  0x9d   :  { %v373_v42 = vadd.f32 %v372_v35, %v118_v17  ;;  %v386_v43 = vadd.f32 %v385_v36, %v119_v18  ;;  %v6966_v17 = vld [vmem:[#allocation8 + $0x344] sm:$0xf0]  ;;  %v5295_v18 = vld [vmem:[#allocation8 + $0x3c0] sm:$0xf]  ;;  %v6980_v35 = vld [vmem:[#allocation8 + $0x3b4] sm:$0xf0] }
  0x9e   :  { %3954 = vmatpush.bf16.msra.mxu2 %v4944_v29  ;;  %3967 = vmatpush.bf16.msra.mxu3 %v5008_v30  ;;  %v5232_v24 = vor.u32 %v6966_v17, %v5231_v16  ;;  %v5296_v29 = vor.u32 %v6982_v19, %v5295_v18  ;;  %v5159_v30 = vld [vmem:[#allocation8 + $0x2b0] sm:$0xf]  ;;  %v5288_v45 = vor.u32 %v6980_v35, %v5287_v34  ;;  %v7036_v35 = vld [vmem:[#allocation8 + $0x574] sm:$0xf0] }
  0x9f   :  { %v779_v50 = vmax.f32 %v373_v42, 0.0  ;;  %v780_v51 = vmax.f32 %v386_v43, 0.0 }
  0xa0   :  { %3973 = vmatpush.bf16.msrb.mxu0 %v5128_v31  ;;  %3986 = vmatpush.bf16.msrb.mxu1 %v5192_v32  ;;  %v6948_v31 = vld [vmem:[#allocation8 + $0x2b4] sm:$0xf0]  ;;  %v5223_v32 = vld [vmem:[#allocation8 + $0x330] sm:$0xf] }
  0xa1   :  { %v7691_v61 = vpack.c.bf16 %v779_v50, %v779_v50  ;;  %v7693_v62 = vpack.c.bf16 %v780_v51, %v780_v51  ;;  %v5160_v39 = vor.u32 %v6948_v31, %v5159_v30  ;;  %v5224_v44 = vor.u32 %v6964_v33, %v5223_v32  ;;  %v5279_v50 = vld [vmem:[#allocation8 + $0x3a0] sm:$0xf]  ;;  %v6978_v51 = vld [vmem:[#allocation8 + $0x3a4] sm:$0xf0]  ;;  %v5447_v30 = vld [vmem:[#allocation8 + $0x4f0] sm:$0xf] }
  0xa2   :  { %3999 = vmatpush.bf16.msrb.mxu2 %v5256_v37  ;;  %4012 = vmatpush.bf16.msrb.mxu3 %v5320_v38  ;;  %v5096_v38 = vor.u32 %v6932_v26, %v5095_v25  ;;  %v5280_v60 = vor.u32 %v6978_v51, %v5279_v50  ;;  %v5383_v25 = vld [vmem:[#allocation8 + $0x470] sm:$0xf]  ;;  %v7004_v26 = vld [vmem:[#allocation8 + $0x474] sm:$0xf0]  ;;  %v7018_v51 = vld [vmem:[#allocation8 + $0x4e4] sm:$0xf0] }
  0xa3   :  { %3929 = vmatmul.bf16.vlgmr.msra.gmra.mxu0 %v7691_v61  ;;  %3942 = vmatmul.bf16.vlgmr.msra.gmra.mxu1 %v7693_v62  ;;  %v7020_v31 = vld [vmem:[#allocation8 + $0x4f4] sm:$0xf0]  ;;  %v5511_v32 = vld [vmem:[#allocation8 + $0x570] sm:$0xf] }
  0xa4   :  { %3974 = vmatpush.bf16.msrb.mxu0 %v5120_v52  ;;  %3987 = vmatpush.bf16.msrb.mxu1 %v5184_v53  ;;  %v398_v1 = vpop.f32.mrf.mxu2  ;;  %v411_v2 = vpop.f32.mrf.mxu3  ;;  %v122_v52 = vperm.slane %v7685_v6, 4  ;;  %v5088_v53 = vor.u32 %v6930_v41, %v5087_v40  ;;  %v5375_v41 = vld [vmem:[#allocation8 + $0x460] sm:$0xf] }
  0xa5   :  { %v399_v10 = vadd.f32 %v398_v1, %v120_v47  ;;  %v412_v11 = vadd.f32 %v411_v2, %v121_v48  ;;  %v374_v12 = vpop.f32.mrf.mxu0  ;;  %v387_v13 = vpop.f32.mrf.mxu1  ;;  %v6946_v47 = vld [vmem:[#allocation8 + $0x2a4] sm:$0xf0]  ;;  %v5215_v48 = vld [vmem:[#allocation8 + $0x320] sm:$0xf]  ;;  %v5207_v1 = vld [vmem:[#allocation8 + $0x310] sm:$0xf] }
  0xa6   :  { %4000 = vmatpush.bf16.msrb.mxu2 %v5248_v56  ;;  %4013 = vmatpush.bf16.msrb.mxu3 %v5312_v57  ;;  %v5152_v54 = vor.u32 %v6946_v47, %v5151_v46  ;;  %v6928_v56 = vld [vmem:[#allocation8 + $0x214] sm:$0xf0]  ;;  %v5143_v57 = vld [vmem:[#allocation8 + $0x290] sm:$0xf]  ;;  %v5216_v59 = vor.u32 %v6962_v49, %v5215_v48  ;;  %v6926_v12 = vld [vmem:[#allocation8 + $0x204] sm:$0xf0]  ;;  %v5512_v49 = vor.u32 %v7036_v35, %v5511_v32 }
  0xa7   :  { %v781_v20 = vmax.f32 %v399_v10, 0.0  ;;  %v782_v21 = vmax.f32 %v412_v11, 0.0  ;;  %v6960_v2 = vld [vmem:[#allocation8 + $0x314] sm:$0xf0]  ;;  %v5080_v10 = vor.u32 %v6928_v56, %v5079_v55  ;;  %v5144_v11 = vor.u32 %v6944_v0, %v5143_v57  ;;  %v5135_v13 = vld [vmem:[#allocation8 + $0x280] sm:$0xf] }
  0xa8   :  { %3975 = vmatpush.bf16.msrb.mxu0 %v5112_v3  ;;  %3988 = vmatpush.bf16.msrb.mxu1 %v5176_v4  ;;  %v5271_v3 = vld [vmem:[#allocation8 + $0x390] sm:$0xf]  ;;  %v6976_v4 = vld [vmem:[#allocation8 + $0x394] sm:$0xf0]  ;;  %v5208_v18 = vor.u32 %v6960_v2, %v5207_v1  ;;  %v5072_v33 = vor.u32 %v6926_v12, %v5071_v9  ;;  %v7002_v46 = vld [vmem:[#allocation8 + $0x464] sm:$0xf0] }
  0xa9   :  { %v7697_v27 = vpack.c.bf16 %v781_v20, %v781_v20  ;;  %v7699_v28 = vpack.c.bf16 %v782_v21, %v782_v21  ;;  %v5272_v19 = vor.u32 %v6976_v4, %v5271_v3  ;;  %v5199_v20 = vld [vmem:[#allocation8 + $0x300] sm:$0xf]  ;;  %v6958_v21 = vld [vmem:[#allocation8 + $0x304] sm:$0xf0]  ;;  %v5367_v3 = vld [vmem:[#allocation8 + $0x450] sm:$0xf] }
  0xaa   :  { %4001 = vmatpush.bf16.msrb.mxu2 %v5240_v5  ;;  %4014 = vmatpush.bf16.msrb.mxu3 %v5304_v14  ;;  %v124_v5 = vperm.slane %v7685_v6, 6  ;;  %v6942_v14 = vld [vmem:[#allocation8 + $0x284] sm:$0xf0]  ;;  %v5263_v6 = vld [vmem:[#allocation8 + $0x380] sm:$0xf] }
  0xab   :  { %3955 = vmatmul.bf16.vlgmr.msra.gmra.mxu2 %v7697_v27  ;;  %3968 = vmatmul.bf16.vlgmr.msra.gmra.mxu3 %v7699_v28  ;;  %v5136_v34 = vor.u32 %v6942_v14, %v5135_v13  ;;  %v5439_v47 = vld [vmem:[#allocation8 + $0x4e0] sm:$0xf]  ;;  %v7034_v55 = vld [vmem:[#allocation8 + $0x564] sm:$0xf0]  ;;  %v7000_v4 = vld [vmem:[#allocation8 + $0x454] sm:$0xf0] }
  0xac   :  { %3976 = vmatpush.bf16.msrb.mxu0 %v5104_v22  ;;  %3989 = vmatpush.bf16.msrb.mxu1 %v5168_v23  ;;  %v400_v36 = vpop.f32.mrf.mxu2  ;;  %v413_v37 = vpop.f32.mrf.mxu3  ;;  %v5567_v56 = vld [vmem:[#allocation8 + $0x5e0] sm:$0xf]  ;;  %v7050_v57 = vld [vmem:[#allocation8 + $0x5e4] sm:$0xf0]  ;;  %v5440_v2 = vor.u32 %v7018_v51, %v5439_v47  ;;  %v7032_v12 = vld [vmem:[#allocation8 + $0x554] sm:$0xf0] }
  0xad   :  { %v424_v42 = vpop.f32.mrf.mxu0  ;;  %v437_v43 = vpop.f32.mrf.mxu1  ;;  %v5575_v36 = vld [vmem:[#allocation8 + $0x5f0] sm:$0xf]  ;;  %v7052_v37 = vld [vmem:[#allocation8 + $0x5f4] sm:$0xf0]  ;;  %v5343_v47 = vld [vmem:[#allocation8 + $0x420] sm:$0xf] }
  0xae   :  { %4002 = vmatpush.bf16.msrb.mxu2 %v5232_v24  ;;  %4015 = vmatpush.bf16.msrb.mxu3 %v5296_v29  ;;  %v425_v22 = vadd.f32 %v424_v42, %v122_v52  ;;  %v438_v23 = vadd.f32 %v437_v43, %v123_v58  ;;  %v6974_v24 = vld [vmem:[#allocation8 + $0x384] sm:$0xf0]  ;;  %v5576_v50 = vor.u32 %v7052_v37, %v5575_v36  ;;  %v5503_v52 = vld [vmem:[#allocation8 + $0x560] sm:$0xf]  ;;  %v5559_v13 = vld [vmem:[#allocation8 + $0x5d0] sm:$0xf] }
  0xaf   :  { %v5264_v40 = vor.u32 %v6974_v24, %v5263_v6  ;;  %v5504_v9 = vor.u32 %v7034_v55, %v5503_v52  ;;  %v7048_v14 = vld [vmem:[#allocation8 + $0x5d4] sm:$0xf0]  ;;  %v7014_v6 = vld [vmem:[#allocation8 + $0x4c4] sm:$0xf0]  ;;  %v5407_v51 = vld [vmem:[#allocation8 + $0x4a0] sm:$0xf] }
  0xb0   :  { %3977 = vmatpush.bf16.msrb.mxu0 %v5096_v38  ;;  %3990 = vmatpush.bf16.msrb.mxu1 %v5160_v39  ;;  %v5200_v39 = vor.u32 %v6958_v21, %v5199_v20  ;;  %v783_v42 = vmax.f32 %v425_v22, 0.0  ;;  %v784_v43 = vmax.f32 %v438_v23, 0.0  ;;  %v5560_v20 = vor.u32 %v7048_v14, %v5559_v13  ;;  %v5423_v21 = vld [vmem:[#allocation8 + $0x4c0] sm:$0xf]  ;;  %v6996_v35 = vld [vmem:[#allocation8 + $0x434] sm:$0xf0] }
  0xb1   :  { %v5487_v22 = vld [vmem:[#allocation8 + $0x540] sm:$0xf]  ;;  %v7010_v52 = vld [vmem:[#allocation8 + $0x4a4] sm:$0xf0]  ;;  %v5399_v14 = vld [vmem:[#allocation8 + $0x490] sm:$0xf] }
  0xb2   :  { %4003 = vmatpush.bf16.msrb.mxu2 %v5224_v44  ;;  %4016 = vmatpush.bf16.msrb.mxu3 %v5288_v45  ;;  %v5384_v44 = vor.u32 %v7004_v26, %v5383_v25  ;;  %v5448_v45 = vor.u32 %v7020_v31, %v5447_v30  ;;  %v7713_v0 = vpack.c.bf16 %v783_v42, %v783_v42  ;;  %v7030_v25 = vld [vmem:[#allocation8 + $0x544] sm:$0xf0]  ;;  %v5551_v26 = vld [vmem:[#allocation8 + $0x5c0] sm:$0xf]  ;;  %v5543_v42 = vld [vmem:[#allocation8 + $0x5b0] sm:$0xf] }
  0xb3   :  { %v7715_v1 = vpack.c.bf16 %v784_v43, %v784_v43  ;;  %v5488_v36 = vor.u32 %v7030_v25, %v5487_v22  ;;  %v7044_v43 = vld [vmem:[#allocation8 + $0x5b4] sm:$0xf0] }
  0xb4   :  { %3978 = vmatpush.bf16.msrb.mxu0 %v5088_v53  ;;  %3991 = vmatpush.bf16.msrb.mxu1 %v5152_v54  ;;  %v450_v7 = vpop.f32.mrf.mxu2  ;;  %v463_v8 = vpop.f32.mrf.mxu3 }
  0xb5   :  { %v464_v15 = vadd.f32 %v463_v8, %v125_v63  ;;  %v426_v16 = vpop.f32.mrf.mxu0  ;;  %v439_v17 = vpop.f32.mrf.mxu1  ;;  %v451_v29 = vadd.f32 %v450_v7, %v124_v5  ;;  %v5376_v63 = vor.u32 %v7002_v46, %v5375_v41  ;;  %v5568_v7 = vor.u32 %v7050_v57, %v5567_v56  ;;  %v5431_v8 = vld [vmem:[#allocation8 + $0x4d0] sm:$0xf]  ;;  %v7028_v41 = vld [vmem:[#allocation8 + $0x534] sm:$0xf0]  ;;  %v7026_v56 = vld [vmem:[#allocation8 + $0x524] sm:$0xf0] }
  0xb6   :  { %4004 = vmatpush.bf16.msrb.mxu2 %v5216_v59  ;;  %4017 = vmatpush.bf16.msrb.mxu3 %v5280_v60  ;;  %v5359_v17 = vld [vmem:[#allocation8 + $0x440] sm:$0xf] }
  0xb7   :  { %v786_v38 = vmax.f32 %v464_v15, 0.0  ;;  %v785_v48 = vmax.f32 %v451_v29, 0.0  ;;  %v5368_v15 = vor.u32 %v7000_v4, %v5367_v3  ;;  %v7046_v29 = vld [vmem:[#allocation8 + $0x5c4] sm:$0xf0]  ;;  %v5535_v57 = vld [vmem:[#allocation8 + $0x5a0] sm:$0xf] }
  0xb8   :  { %3979 = vmatpush.bf16.msrb.mxu0 %v5080_v10  ;;  %3992 = vmatpush.bf16.msrb.mxu1 %v5144_v11  ;;  %v7016_v10 = vld [vmem:[#allocation8 + $0x4d4] sm:$0xf0]  ;;  %v5495_v11 = vld [vmem:[#allocation8 + $0x550] sm:$0xf]  ;;  %v5552_v37 = vor.u32 %v7046_v29, %v5551_v26  ;;  %v6990_v26 = vld [vmem:[#allocation8 + $0x404] sm:$0xf0] }
  0xb9   :  { %v7707_v58 = vpack.c.bf16 %v786_v38, %v786_v38  ;;  %v7717_v5 = vpack.c.bf16 %v785_v48, %v785_v48  ;;  %v5432_v16 = vor.u32 %v7016_v10, %v5431_v8  ;;  %v5415_v38 = vld [vmem:[#allocation8 + $0x4b0] sm:$0xf]  ;;  %v6994_v48 = vld [vmem:[#allocation8 + $0x424] sm:$0xf0]  ;;  %v5408_v8 = vor.u32 %v7010_v52, %v5407_v51  ;;  %v5391_v29 = vld [vmem:[#allocation8 + $0x480] sm:$0xf] }
  0xba   :  { %4005 = vmatpush.bf16.msrb.mxu2 %v5208_v18  ;;  %4018 = vmatpush.bf16.msrb.mxu3 %v5272_v19  ;;  %v6998_v18 = vld [vmem:[#allocation8 + $0x444] sm:$0xf0]  ;;  %v5496_v19 = vor.u32 %v7032_v12, %v5495_v11  ;;  %v5335_v10 = vld [vmem:[#allocation8 + $0x410] sm:$0xf]  ;;  %v6992_v11 = vld [vmem:[#allocation8 + $0x414] sm:$0xf0] }
  0xbb   :  { %v5360_v32 = vor.u32 %v6998_v18, %v5359_v17  ;;  %v7024_v17 = vld [vmem:[#allocation8 + $0x514] sm:$0xf0]  ;;  %v5527_v18 = vld [vmem:[#allocation8 + $0x590] sm:$0xf]  ;;  %v5336_v22 = vor.u32 %v6992_v11, %v5335_v10 }
  0xbc   :  { %3980 = vmatpush.bf16.msrb.mxu0 %v5072_v33  ;;  %3993 = vmatpush.bf16.msrb.mxu1 %v5136_v34  ;;  %v452_v53 = vpop.f32.mrf.mxu2  ;;  %v465_v54 = vpop.f32.mrf.mxu3  ;;  %v5424_v33 = vor.u32 %v7014_v6, %v5423_v21  ;;  %v5351_v34 = vld [vmem:[#allocation8 + $0x430] sm:$0xf]  ;;  %v5327_v6 = vld [vmem:[#allocation8 + $0x400] sm:$0xf]  ;;  %v7100_v51 = vld [vmem:[#allocation8 + $0x774] sm:$0xf0] }
  0xbd   :  { %v7709_v59 = vpop.f32.mrf.mxu0  ;;  %v7711_v60 = vpop.f32.mrf.mxu1  ;;  %v5471_v53 = vld [vmem:[#allocation8 + $0x520] sm:$0xf]  ;;  %v5831_v52 = vld [vmem:[#allocation8 + $0x7f0] sm:$0xf] }
  0xbe   :  { %4006 = vmatpush.bf16.msrb.mxu2 %v5200_v39  ;;  %4019 = vmatpush.bf16.msrb.mxu3 %v5264_v40  ;;  %v7012_v39 = vld [vmem:[#allocation8 + $0x4b4] sm:$0xf0]  ;;  %v5479_v40 = vld [vmem:[#allocation8 + $0x530] sm:$0xf]  ;;  %v5472_v12 = vor.u32 %v7026_v56, %v5471_v53  ;;  %v5631_v56 = vld [vmem:[#allocation8 + $0x660] sm:$0xf] }
  0xbf   :  { %3981 = vmatmul.bf16.vlgmr.msrb.gmra.mxu0 %v7713_v0  ;;  %3994 = vmatmul.bf16.vlgmr.msrb.gmra.mxu1 %v7715_v1  ;;  %v5416_v46 = vor.u32 %v7012_v39, %v5415_v38  ;;  %v7116_v53 = vld [vmem:[#allocation8 + $0x7f4] sm:$0xf0] }
  0xc0   :  { %4025 = vmatpush.bf16.msra.mxu0 %v5384_v44  ;;  %4038 = vmatpush.bf16.msra.mxu1 %v5448_v45  ;;  %v7727_v44 = vld [vmem:[#allocation7 + $0x8] sm:$0xff]  ;;  %v5352_v45 = vor.u32 %v6996_v35, %v5351_v34  ;;  %v5519_v35 = vld [vmem:[#allocation8 + $0x580] sm:$0xf] }
  0xc1   :  { %4007 = vmatmul.bf16.vlgmr.msrb.gmra.mxu2 %v7717_v5  ;;  %4020 = vmatmul.bf16.vlgmr.msrb.gmra.mxu3 %v7707_v58  ;;  %v126_v4 = vperm.slane %v7727_v44, 0  ;;  %v129_v21 = vperm.slane %v7727_v44, 3  ;;  %v7022_v34 = vld [vmem:[#allocation8 + $0x504] sm:$0xf0] }
  0xc2   :  { %4051 = vmatpush.bf16.msra.mxu2 %v5512_v49  ;;  %4064 = vmatpush.bf16.msra.mxu3 %v5576_v50  ;;  %v5480_v49 = vor.u32 %v7028_v41, %v5479_v40  ;;  %v5544_v50 = vor.u32 %v7044_v43, %v5543_v42  ;;  %v7038_v40 = vld [vmem:[#allocation8 + $0x584] sm:$0xf0]  ;;  %v5639_v41 = vld [vmem:[#allocation8 + $0x670] sm:$0xf]  ;;  %v7068_v42 = vld [vmem:[#allocation8 + $0x674] sm:$0xf0] }
  0xc4   :  { %4026 = vmatpush.bf16.msra.mxu0 %v5376_v63  ;;  %4039 = vmatpush.bf16.msra.mxu1 %v5440_v2  ;;  %v7723_v23 = vpop.f32.mrf.mxu2  ;;  %v7725_v24 = vpop.f32.mrf.mxu3  ;;  %v7042_v63 = vld [vmem:[#allocation8 + $0x5a4] sm:$0xf0] }
  0xc5   :  { %v478_v30 = vpop.f32.mrf.mxu0  ;;  %v491_v31 = vpop.f32.mrf.mxu1  ;;  %v5536_v13 = vor.u32 %v7042_v63, %v5535_v57  ;;  %v5640_v63 = vor.u32 %v7068_v42, %v5639_v41  ;;  %v7112_v41 = vld [vmem:[#allocation8 + $0x7d4] sm:$0xf0] }
  0xc6   :  { %4052 = vmatpush.bf16.msra.mxu2 %v5504_v9  ;;  %4065 = vmatpush.bf16.msra.mxu3 %v5568_v7  ;;  %v127_v9 = vperm.slane %v7727_v44, 1  ;;  %v5344_v7 = vor.u32 %v6994_v48, %v5343_v47  ;;  %v7006_v30 = vld [vmem:[#allocation8 + $0x484] sm:$0xf0]  ;;  %v5703_v48 = vld [vmem:[#allocation8 + $0x6f0] sm:$0xf] }
  0xc8   :  { %4027 = vmatpush.bf16.msra.mxu0 %v5368_v15  ;;  %4040 = vmatpush.bf16.msra.mxu1 %v5432_v16  ;;  %v7008_v15 = vld [vmem:[#allocation8 + $0x494] sm:$0xf0]  ;;  %v5463_v16 = vld [vmem:[#allocation8 + $0x510] sm:$0xf] }
  0xc9   :  { %v5400_v25 = vor.u32 %v7008_v15, %v5399_v14  ;;  %v5464_v31 = vor.u32 %v7024_v17, %v5463_v16  ;;  %v7098_v14 = vld [vmem:[#allocation8 + $0x764] sm:$0xf0]  ;;  %v5823_v15 = vld [vmem:[#allocation8 + $0x7e0] sm:$0xf] }
  0xca   :  { %4053 = vmatpush.bf16.msra.mxu2 %v5496_v19  ;;  %4066 = vmatpush.bf16.msra.mxu3 %v5560_v20  ;;  %v7040_v19 = vld [vmem:[#allocation8 + $0x594] sm:$0xf0]  ;;  %v128_v20 = vperm.slane %v7727_v44, 2  ;;  %v7114_v16 = vld [vmem:[#allocation8 + $0x7e4] sm:$0xf0] }
  0xcc   :  { %4028 = vmatpush.bf16.msra.mxu0 %v5360_v32  ;;  %4041 = vmatpush.bf16.msra.mxu1 %v5424_v33  ;;  %v504_v54 = vpop.f32.mrf.mxu2  ;;  %v517_v55 = vpop.f32.mrf.mxu3  ;;  %v5528_v32 = vor.u32 %v7040_v19, %v5527_v18  ;;  %v5455_v33 = vld [vmem:[#allocation8 + $0x500] sm:$0xf]  ;;  %v503_v43 = vadd.f32 %v7723_v23, %v128_v20  ;;  %v7066_v23 = vld [vmem:[#allocation8 + $0x664] sm:$0xf0] }
  0xcd   :  { %v7729_v2 = vpop.f32.mrf.mxu0  ;;  %v7731_v3 = vpop.f32.mrf.mxu1  ;;  %v5456_v54 = vor.u32 %v7022_v34, %v5455_v33  ;;  %v5520_v55 = vor.u32 %v7038_v40, %v5519_v35  ;;  %v5632_v17 = vor.u32 %v7066_v23, %v5631_v56  ;;  %v5687_v34 = vld [vmem:[#allocation8 + $0x6d0] sm:$0xf]  ;;  %v7080_v35 = vld [vmem:[#allocation8 + $0x6d4] sm:$0xf0] }
  0xce   :  { %4054 = vmatpush.bf16.msra.mxu2 %v5488_v36  ;;  %4067 = vmatpush.bf16.msra.mxu3 %v5552_v37  ;;  %v477_v36 = vadd.f32 %v7709_v59, %v126_v4  ;;  %v490_v37 = vadd.f32 %v7711_v60, %v127_v9  ;;  %v5328_v59 = vor.u32 %v6990_v26, %v5327_v6  ;;  %v5695_v9 = vld [vmem:[#allocation8 + $0x6e0] sm:$0xf]  ;;  %v7064_v26 = vld [vmem:[#allocation8 + $0x654] sm:$0xf0]  ;;  %v5815_v40 = vld [vmem:[#allocation8 + $0x7d0] sm:$0xf] }
  0xcf   :  { %v5392_v60 = vor.u32 %v7006_v30, %v5391_v29  ;;  %v5607_v23 = vld [vmem:[#allocation8 + $0x630] sm:$0xf] }
  0xd0   :  { %4029 = vmatpush.bf16.msra.mxu0 %v5352_v45  ;;  %4042 = vmatpush.bf16.msra.mxu1 %v5416_v46  ;;  %v516_v45 = vadd.f32 %v7725_v24, %v129_v21  ;;  %v787_v57 = vmax.f32 %v477_v36, 0.0  ;;  %v788_v24 = vmax.f32 %v490_v37, 0.0  ;;  %v5751_v36 = vld [vmem:[#allocation8 + $0x750] sm:$0xf]  ;;  %v7096_v37 = vld [vmem:[#allocation8 + $0x754] sm:$0xf0] }
  0xd2   :  { %4055 = vmatpush.bf16.msra.mxu2 %v5480_v49  ;;  %4068 = vmatpush.bf16.msra.mxu3 %v5544_v50  ;;  %v7084_v49 = vld [vmem:[#allocation8 + $0x6f4] sm:$0xf0]  ;;  %v5767_v50 = vld [vmem:[#allocation8 + $0x770] sm:$0xf]  ;;  %v790_v10 = vmax.f32 %v516_v45, 0.0  ;;  %v7745_v19 = vpack.c.bf16 %v787_v57, %v787_v57  ;;  %v7747_v20 = vpack.c.bf16 %v788_v24, %v788_v24 }
  0xd3   :  { %v5704_v4 = vor.u32 %v7084_v49, %v5703_v48  ;;  %v5768_v11 = vor.u32 %v7100_v51, %v5767_v50  ;;  %v5615_v45 = vld [vmem:[#allocation8 + $0x640] sm:$0xf]  ;;  %v5816_v48 = vor.u32 %v7112_v41, %v5815_v40  ;;  %v7078_v50 = vld [vmem:[#allocation8 + $0x6c4] sm:$0xf0]  ;;  %v7060_v57 = vld [vmem:[#allocation8 + $0x634] sm:$0xf0] }
  0xd4   :  { %4030 = vmatpush.bf16.msra.mxu0 %v5344_v7  ;;  %4043 = vmatpush.bf16.msra.mxu1 %v5408_v8  ;;  %v7739_v38 = vpop.f32.mrf.mxu2  ;;  %v7741_v39 = vpop.f32.mrf.mxu3  ;;  %v7082_v7 = vld [vmem:[#allocation8 + $0x6e4] sm:$0xf0]  ;;  %v789_v8 = vmax.f32 %v503_v43, 0.0  ;;  %v7751_v30 = vpack.c.bf16 %v790_v10, %v790_v10  ;;  %v5688_v43 = vor.u32 %v7080_v35, %v5687_v34  ;;  %v5679_v49 = vld [vmem:[#allocation8 + $0x6c0] sm:$0xf]  ;;  %v130_v35 = vperm.slane %v7727_v44, 4 }
  0xd5   :  { %v530_v46 = vpop.f32.mrf.mxu0  ;;  %v543_v47 = vpop.f32.mrf.mxu1  ;;  %v5696_v18 = vor.u32 %v7082_v7, %v5695_v9  ;;  %v5807_v51 = vld [vmem:[#allocation8 + $0x7c0] sm:$0xf]  ;;  %v5680_v56 = vor.u32 %v7078_v50, %v5679_v49  ;;  %v5671_v7 = vld [vmem:[#allocation8 + $0x6b0] sm:$0xf]  ;;  %v7106_v34 = vld [vmem:[#allocation8 + $0x7a4] sm:$0xf0] }
  0xd6   :  { %4056 = vmatpush.bf16.msra.mxu2 %v5472_v12  ;;  %4069 = vmatpush.bf16.msra.mxu3 %v5536_v13  ;;  %v5832_v12 = vor.u32 %v7116_v53, %v5831_v52  ;;  %v5759_v13 = vld [vmem:[#allocation8 + $0x760] sm:$0xf]  ;;  %v7749_v29 = vpack.c.bf16 %v789_v8, %v789_v8  ;;  %v7062_v46 = vld [vmem:[#allocation8 + $0x644] sm:$0xf0]  ;;  %v5752_v47 = vor.u32 %v7096_v37, %v5751_v36  ;;  %v7076_v8 = vld [vmem:[#allocation8 + $0x6b4] sm:$0xf0] }
  0xd7   :  { %v7110_v52 = vld [vmem:[#allocation8 + $0x7c4] sm:$0xf0]  ;;  %v5735_v10 = vld [vmem:[#allocation8 + $0x730] sm:$0xf]  ;;  %v131_v36 = vperm.slane %v7727_v44, 5  ;;  %v132_v37 = vperm.slane %v7727_v44, 6 }
  0xd8   :  { %4031 = vmatpush.bf16.msra.mxu0 %v5336_v22  ;;  %4044 = vmatpush.bf16.msra.mxu1 %v5400_v25  ;;  %v5760_v22 = vor.u32 %v7098_v14, %v5759_v13  ;;  %v5623_v25 = vld [vmem:[#allocation8 + $0x650] sm:$0xf]  ;;  %v7108_v13 = vld [vmem:[#allocation8 + $0x7b4] sm:$0xf0]  ;;  %v5608_v14 = vor.u32 %v7060_v57, %v5607_v23  ;;  %v133_v40 = vperm.slane %v7727_v44, 7  ;;  %v529_v57 = vadd.f32 %v7729_v2, %v130_v35 }
  0xd9   :  { %v5624_v42 = vor.u32 %v7064_v26, %v5623_v25  ;;  %v5727_v25 = vld [vmem:[#allocation8 + $0x720] sm:$0xf]  ;;  %v7090_v26 = vld [vmem:[#allocation8 + $0x724] sm:$0xf0]  ;;  %v7088_v44 = vld [vmem:[#allocation8 + $0x714] sm:$0xf0] }
  0xda   :  { %4057 = vmatpush.bf16.msra.mxu2 %v5464_v31  ;;  %4070 = vmatpush.bf16.msra.mxu3 %v5528_v32  ;;  %v5824_v31 = vor.u32 %v7114_v16, %v5823_v15  ;;  %v5672_v15 = vor.u32 %v7076_v8, %v5671_v7  ;;  %v5599_v16 = vld [vmem:[#allocation8 + $0x620] sm:$0xf]  ;;  %v7070_v7 = vld [vmem:[#allocation8 + $0x684] sm:$0xf0]  ;;  %v542_v8 = vadd.f32 %v7731_v3, %v131_v36  ;;  %v6087_v35 = vld [vmem:[#allocation8 + $0x9f0] sm:$0xf] }
  0xdb   :  { %v5583_v23 = vld [vmem:[#allocation8 + $0x600] sm:$0xf]  ;;  %v568_v2 = vadd.f32 %v7741_v39, %v133_v40  ;;  %v7180_v36 = vld [vmem:[#allocation8 + $0x9f4] sm:$0xf0] }
  0xdc   :  { %4032 = vmatpush.bf16.msra.mxu0 %v5328_v59  ;;  %4045 = vmatpush.bf16.msra.mxu1 %v5392_v60  ;;  %v556_v21 = vpop.f32.mrf.mxu2  ;;  %v569_v6 = vpop.f32.mrf.mxu3  ;;  %v5743_v59 = vld [vmem:[#allocation8 + $0x740] sm:$0xf]  ;;  %v7094_v60 = vld [vmem:[#allocation8 + $0x744] sm:$0xf0] }
  0xdd   :  { %v7753_v32 = vpop.f32.mrf.mxu0  ;;  %v7755_v33 = vpop.f32.mrf.mxu1  ;;  %v5744_v24 = vor.u32 %v7094_v60, %v5743_v59  ;;  %v5663_v6 = vld [vmem:[#allocation8 + $0x6a0] sm:$0xf]  ;;  %v5655_v60 = vld [vmem:[#allocation8 + $0x690] sm:$0xf] }
  0xde   :  { %4058 = vmatpush.bf16.msra.mxu2 %v5456_v54  ;;  %4071 = vmatpush.bf16.msra.mxu3 %v5520_v55  ;;  %v5616_v55 = vor.u32 %v7062_v46, %v5615_v45  ;;  %v5591_v46 = vld [vmem:[#allocation8 + $0x610] sm:$0xf] }
  0xdf   :  { %4033 = vmatmul.bf16.vlgmr.msra.gmra.mxu0 %v7745_v19  ;;  %4046 = vmatmul.bf16.vlgmr.msra.gmra.mxu1 %v7747_v20 }
  0xe0   :  { %4077 = vmatpush.bf16.msrb.mxu0 %v5640_v63  ;;  %4090 = vmatpush.bf16.msrb.mxu1 %v5704_v4  ;;  %v5808_v63 = vor.u32 %v7110_v52, %v5807_v51  ;;  %v7072_v51 = vld [vmem:[#allocation8 + $0x694] sm:$0xf0]  ;;  %v5719_v52 = vld [vmem:[#allocation8 + $0x710] sm:$0xf] }
  0xe1   :  { %4059 = vmatmul.bf16.vlgmr.msra.gmra.mxu2 %v7749_v29  ;;  %4072 = vmatmul.bf16.vlgmr.msra.gmra.mxu3 %v7751_v30 }
  0xe2   :  { %4103 = vmatpush.bf16.msrb.mxu2 %v5768_v11  ;;  %4116 = vmatpush.bf16.msrb.mxu3 %v5832_v12  ;;  %v7092_v11 = vld [vmem:[#allocation8 + $0x734] sm:$0xf0]  ;;  %v5799_v12 = vld [vmem:[#allocation8 + $0x7b0] sm:$0xf] }
  0xe3   :  { %v5800_v21 = vor.u32 %v7108_v13, %v5799_v12  ;;  %v5711_v12 = vld [vmem:[#allocation8 + $0x700] sm:$0xf]  ;;  %v7086_v13 = vld [vmem:[#allocation8 + $0x704] sm:$0xf0] }
  0xe4   :  { %4078 = vmatpush.bf16.msrb.mxu0 %v5632_v17  ;;  %4091 = vmatpush.bf16.msrb.mxu1 %v5696_v18  ;;  %v7761_v53 = vpop.f32.mrf.mxu2  ;;  %v7763_v54 = vpop.f32.mrf.mxu3  ;;  %v7058_v17 = vld [vmem:[#allocation8 + $0x624] sm:$0xf0]  ;;  %v5736_v18 = vor.u32 %v7092_v11, %v5735_v10  ;;  %v5720_v10 = vor.u32 %v7088_v44, %v5719_v52  ;;  %v5712_v39 = vor.u32 %v7086_v13, %v5711_v12  ;;  %v5951_v52 = vld [vmem:[#allocation8 + $0x8e0] sm:$0xf] }
  0xe5   :  { %v582_v4 = vpop.f32.mrf.mxu0  ;;  %v595_v9 = vpop.f32.mrf.mxu1  ;;  %v7146_v44 = vld [vmem:[#allocation8 + $0x8e4] sm:$0xf0] }
  0xe6   :  { %4104 = vmatpush.bf16.msrb.mxu2 %v5760_v22  ;;  %4117 = vmatpush.bf16.msrb.mxu3 %v5824_v31  ;;  %v7074_v22 = vld [vmem:[#allocation8 + $0x6a4] sm:$0xf0]  ;;  %v5791_v31 = vld [vmem:[#allocation8 + $0x7a0] sm:$0xf] }
  0xe7   :  { %v5664_v45 = vor.u32 %v7074_v22, %v5663_v6  ;;  %v5792_v49 = vor.u32 %v7106_v34, %v5791_v31  ;;  %v7054_v4 = vld [vmem:[#allocation8 + $0x604] sm:$0xf0]  ;;  %v5647_v9 = vld [vmem:[#allocation8 + $0x680] sm:$0xf]  ;;  %v7148_v6 = vld [vmem:[#allocation8 + $0x8f4] sm:$0xf0] }
  0xe8   :  { %4079 = vmatpush.bf16.msrb.mxu0 %v5624_v42  ;;  %4092 = vmatpush.bf16.msrb.mxu1 %v5688_v43  ;;  %v5600_v43 = vor.u32 %v7058_v17, %v5599_v16  ;;  %v7102_v16 = vld [vmem:[#allocation8 + $0x784] sm:$0xf0]  ;;  %v5895_v17 = vld [vmem:[#allocation8 + $0x870] sm:$0xf]  ;;  %v5648_v31 = vor.u32 %v7070_v7, %v5647_v9  ;;  %v7164_v34 = vld [vmem:[#allocation8 + $0x974] sm:$0xf0]  ;;  %v5952_v7 = vor.u32 %v7146_v44, %v5951_v52 }
  0xe9   :  { %v6023_v22 = vld [vmem:[#allocation8 + $0x970] sm:$0xf]  ;;  %v7140_v44 = vld [vmem:[#allocation8 + $0x8b4] sm:$0xf0] }
  0xea   :  { %4105 = vmatpush.bf16.msrb.mxu2 %v5752_v47  ;;  %4118 = vmatpush.bf16.msrb.mxu3 %v5816_v48  ;;  %v7056_v47 = vld [vmem:[#allocation8 + $0x614] sm:$0xf0]  ;;  %v5728_v48 = vor.u32 %v7090_v26, %v5727_v25  ;;  %v5584_v26 = vor.u32 %v7054_v4, %v5583_v23  ;;  %v6079_v23 = vld [vmem:[#allocation8 + $0x9e0] sm:$0xf]  ;;  %v5927_v52 = vld [vmem:[#allocation8 + $0x8b0] sm:$0xf] }
  0xec   :  { %4080 = vmatpush.bf16.msrb.mxu0 %v5616_v55  ;;  %4093 = vmatpush.bf16.msrb.mxu1 %v5680_v56  ;;  %v608_v41 = vpop.f32.mrf.mxu2  ;;  %v621_v42 = vpop.f32.mrf.mxu3  ;;  %v5783_v55 = vld [vmem:[#allocation8 + $0x790] sm:$0xf]  ;;  %v7104_v56 = vld [vmem:[#allocation8 + $0x794] sm:$0xf0] }
  0xed   :  { %v7769_v50 = vpop.f32.mrf.mxu0  ;;  %v7771_v59 = vpop.f32.mrf.mxu1  ;;  %v5784_v11 = vor.u32 %v7104_v56, %v5783_v55  ;;  %v6015_v55 = vld [vmem:[#allocation8 + $0x960] sm:$0xf]  ;;  %v7162_v56 = vld [vmem:[#allocation8 + $0x964] sm:$0xf0] }
  0xee   :  { %4106 = vmatpush.bf16.msrb.mxu2 %v5744_v24  ;;  %4119 = vmatpush.bf16.msrb.mxu3 %v5808_v63  ;;  %v5592_v24 = vor.u32 %v7056_v47, %v5591_v46  ;;  %v5656_v63 = vor.u32 %v7072_v51, %v5655_v60  ;;  %v6024_v60 = vor.u32 %v7164_v34, %v6023_v22 }
  0xef   :  { %v6088_v51 = vor.u32 %v7180_v36, %v6087_v35  ;;  %v6016_v12 = vor.u32 %v7162_v56, %v6015_v55  ;;  %v5871_v35 = vld [vmem:[#allocation8 + $0x840] sm:$0xf]  ;;  %v7126_v36 = vld [vmem:[#allocation8 + $0x844] sm:$0xf0]  ;;  %v5991_v55 = vld [vmem:[#allocation8 + $0x930] sm:$0xf] }
  0xf0   :  { %4081 = vmatpush.bf16.msrb.mxu0 %v5608_v14  ;;  %4094 = vmatpush.bf16.msrb.mxu1 %v5672_v15  ;;  %v5775_v14 = vld [vmem:[#allocation8 + $0x780] sm:$0xf]  ;;  %v555_v15 = vadd.f32 %v7739_v38, %v132_v37  ;;  %v791_v38 = vmax.f32 %v529_v57, 0.0  ;;  %v792_v37 = vmax.f32 %v542_v8, 0.0  ;;  %v7178_v57 = vld [vmem:[#allocation8 + $0x9e4] sm:$0xf0] }
  0xf1   :  { %v5776_v40 = vor.u32 %v7102_v16, %v5775_v14  ;;  %v5879_v8 = vld [vmem:[#allocation8 + $0x850] sm:$0xf]  ;;  %v6080_v13 = vor.u32 %v7178_v57, %v6079_v23  ;;  %v7156_v57 = vld [vmem:[#allocation8 + $0x934] sm:$0xf0] }
  0xf2   :  { %4107 = vmatpush.bf16.msrb.mxu2 %v5736_v18  ;;  %4120 = vmatpush.bf16.msrb.mxu3 %v5800_v21  ;;  %v7132_v18 = vld [vmem:[#allocation8 + $0x874] sm:$0xf0]  ;;  %v5959_v21 = vld [vmem:[#allocation8 + $0x8f0] sm:$0xf] }
  0xf3   :  { %v5896_v46 = vor.u32 %v7132_v18, %v5895_v17  ;;  %v5960_v47 = vor.u32 %v7148_v6, %v5959_v21  ;;  %v5943_v14 = vld [vmem:[#allocation8 + $0x8d0] sm:$0xf]  ;;  %v7160_v18 = vld [vmem:[#allocation8 + $0x954] sm:$0xf0] }
  0xf4   :  { %4082 = vmatpush.bf16.msrb.mxu0 %v5600_v43  ;;  %4095 = vmatpush.bf16.msrb.mxu1 %v5664_v45  ;;  %v7777_v3 = vpop.f32.mrf.mxu2  ;;  %v7779_v25 = vpop.f32.mrf.mxu3  ;;  %v793_v43 = vmax.f32 %v555_v15, 0.0  ;;  %v794_v45 = vmax.f32 %v568_v2, 0.0  ;;  %v7144_v15 = vld [vmem:[#allocation8 + $0x8d4] sm:$0xf0]  ;;  %v6007_v2 = vld [vmem:[#allocation8 + $0x950] sm:$0xf] }
  0xf5   :  { %v634_v41 = vpop.f32.mrf.mxu0  ;;  %v647_v42 = vpop.f32.mrf.mxu1  ;;  %v6071_v21 = vld [vmem:[#allocation8 + $0x9d0] sm:$0xf]  ;;  %v7176_v6 = vld [vmem:[#allocation8 + $0x9d4] sm:$0xf0]  ;;  %v5944_v34 = vor.u32 %v7144_v15, %v5943_v14  ;;  %v5928_v14 = vor.u32 %v7140_v44, %v5927_v52  ;;  %v5855_v15 = vld [vmem:[#allocation8 + $0x820] sm:$0xf] }
  0xf6   :  { %4108 = vmatpush.bf16.msrb.mxu2 %v5728_v48  ;;  %4121 = vmatpush.bf16.msrb.mxu3 %v5792_v49  ;;  %v5887_v48 = vld [vmem:[#allocation8 + $0x860] sm:$0xf]  ;;  %v7130_v49 = vld [vmem:[#allocation8 + $0x864] sm:$0xf0]  ;;  %v7785_v4 = vpack.c.bf16 %v793_v43, %v793_v43  ;;  %v7152_v52 = vld [vmem:[#allocation8 + $0x914] sm:$0xf0] }
  0xf7   :  { %v5888_v9 = vor.u32 %v7130_v49, %v5887_v48  ;;  %v5999_v41 = vld [vmem:[#allocation8 + $0x940] sm:$0xf]  ;;  %v7158_v42 = vld [vmem:[#allocation8 + $0x944] sm:$0xf0]  ;;  %v5863_v48 = vld [vmem:[#allocation8 + $0x830] sm:$0xf] }
  0xf8   :  { %4083 = vmatpush.bf16.msrb.mxu0 %v5592_v24  ;;  %4096 = vmatpush.bf16.msrb.mxu1 %v5656_v63  ;;  %v7781_v24 = vpack.c.bf16 %v791_v38, %v791_v38  ;;  %v7783_v63 = vpack.c.bf16 %v792_v37, %v792_v37  ;;  %v6008_v38 = vor.u32 %v7160_v18, %v6007_v2  ;;  %v6063_v43 = vld [vmem:[#allocation8 + $0x9c0] sm:$0xf]  ;;  %v7124_v49 = vld [vmem:[#allocation8 + $0x834] sm:$0xf0]  ;;  %v7122_v2 = vld [vmem:[#allocation8 + $0x824] sm:$0xf0] }
  0xf9   :  { %v6072_v37 = vor.u32 %v7176_v6, %v6071_v21  ;;  %v5919_v18 = vld [vmem:[#allocation8 + $0x8a0] sm:$0xf]  ;;  %v7138_v21 = vld [vmem:[#allocation8 + $0x8a4] sm:$0xf0]  ;;  %v6039_v44 = vld [vmem:[#allocation8 + $0x990] sm:$0xf] }
  0xfa   :  { %4109 = vmatpush.bf16.msrb.mxu2 %v5720_v10  ;;  %4122 = vmatpush.bf16.msrb.mxu3 %v5784_v11  ;;  %v7128_v10 = vld [vmem:[#allocation8 + $0x854] sm:$0xf0]  ;;  %v7787_v11 = vpack.c.bf16 %v794_v45, %v794_v45  ;;  %v7174_v45 = vld [vmem:[#allocation8 + $0x9c4] sm:$0xf0]  ;;  %v5983_v6 = vld [vmem:[#allocation8 + $0x920] sm:$0xf] }
  0xfc   :  { %4084 = vmatpush.bf16.msrb.mxu0 %v5584_v26  ;;  %4097 = vmatpush.bf16.msrb.mxu1 %v5648_v31  ;;  %v660_v16 = vpop.f32.mrf.mxu2  ;;  %v673_v17 = vpop.f32.mrf.mxu3  ;;  %v5880_v31 = vor.u32 %v7128_v10, %v5879_v8 }
  0xfd   :  { %v7793_v22 = vpop.f32.mrf.mxu0  ;;  %v7795_v26 = vpop.f32.mrf.mxu1  ;;  %v5992_v16 = vor.u32 %v7156_v57, %v5991_v55  ;;  %v7168_v55 = vld [vmem:[#allocation8 + $0x994] sm:$0xf0]  ;;  %v5839_v57 = vld [vmem:[#allocation8 + $0x800] sm:$0xf] }
  0xfe   :  { %4110 = vmatpush.bf16.msrb.mxu2 %v5712_v39  ;;  %4123 = vmatpush.bf16.msrb.mxu3 %v5776_v40  ;;  %v5935_v39 = vld [vmem:[#allocation8 + $0x8c0] sm:$0xf]  ;;  %v7142_v40 = vld [vmem:[#allocation8 + $0x8c4] sm:$0xf0] }
  0xff   :  { %4085 = vmatmul.bf16.vlgmr.msrb.gmra.mxu0 %v7781_v24  ;;  %4098 = vmatmul.bf16.vlgmr.msrb.gmra.mxu1 %v7783_v63 }
 0x100   :  { %4129 = vmatpush.bf16.msra.mxu0 %v5896_v46  ;;  %4142 = vmatpush.bf16.msra.mxu1 %v5960_v47  ;;  %v5872_v46 = vor.u32 %v7126_v36, %v5871_v35  ;;  %v5936_v47 = vor.u32 %v7142_v40, %v5935_v39  ;;  %v7170_v35 = vld [vmem:[#allocation8 + $0x9a4] sm:$0xf0]  ;;  %v5856_v40 = vor.u32 %v7122_v2, %v5855_v15  ;;  %v5903_v15 = vld [vmem:[#allocation8 + $0x880] sm:$0xf] }
 0x101   :  { %4111 = vmatmul.bf16.vlgmr.msrb.gmra.mxu2 %v7785_v4  ;;  %4124 = vmatmul.bf16.vlgmr.msrb.gmra.mxu3 %v7787_v11  ;;  %v7134_v2 = vld [vmem:[#allocation8 + $0x884] sm:$0xf0] }
 0x102   :  { %4155 = vmatpush.bf16.msra.mxu2 %v6024_v60  ;;  %4168 = vmatpush.bf16.msra.mxu3 %v6088_v51  ;;  %v6000_v60 = vor.u32 %v7158_v42, %v5999_v41  ;;  %v6064_v51 = vor.u32 %v7174_v45, %v6063_v43  ;;  %v5920_v41 = vor.u32 %v7138_v21, %v5919_v18  ;;  %v5847_v42 = vld [vmem:[#allocation8 + $0x810] sm:$0xf]  ;;  %v7120_v43 = vld [vmem:[#allocation8 + $0x814] sm:$0xf0]  ;;  %v5967_v21 = vld [vmem:[#allocation8 + $0x900] sm:$0xf] }
 0x103   :  { %v6040_v18 = vor.u32 %v7168_v55, %v6039_v44  ;;  %v7194_v44 = vld [vmem:[#allocation8 + $0xa64] sm:$0xf0] }
 0x104   :  { %4130 = vmatpush.bf16.msra.mxu0 %v5888_v9  ;;  %4143 = vmatpush.bf16.msra.mxu1 %v5952_v7  ;;  %v7797_v56 = vpop.f32.mrf.mxu2  ;;  %v7799_v23 = vpop.f32.mrf.mxu3  ;;  %v6055_v9 = vld [vmem:[#allocation8 + $0x9b0] sm:$0xf]  ;;  %v7172_v7 = vld [vmem:[#allocation8 + $0x9b4] sm:$0xf0] }
 0x105   :  { %v686_v8 = vpop.f32.mrf.mxu0  ;;  %v699_v10 = vpop.f32.mrf.mxu1  ;;  %v6056_v17 = vor.u32 %v7172_v7, %v6055_v9 }
 0x106   :  { %4156 = vmatpush.bf16.msra.mxu2 %v6016_v12  ;;  %4169 = vmatpush.bf16.msra.mxu3 %v6080_v13  ;;  %v7801_v12 = vld [vmem:[#allocation7 + $0x10] sm:$0xff]  ;;  %v5864_v13 = vor.u32 %v7124_v49, %v5863_v48  ;;  %v7136_v48 = vld [vmem:[#allocation8 + $0x894] sm:$0xf0]  ;;  %v5848_v10 = vor.u32 %v7120_v43, %v5847_v42 }
 0x107   :  { %v134_v36 = vperm.slane %v7801_v12, 0  ;;  %v137_v39 = vperm.slane %v7801_v12, 3  ;;  %v5975_v49 = vld [vmem:[#allocation8 + $0x910] sm:$0xf]  ;;  %v7212_v42 = vld [vmem:[#allocation8 + $0xaf4] sm:$0xf0] }
 0x108   :  { %4131 = vmatpush.bf16.msra.mxu0 %v5880_v31  ;;  %4144 = vmatpush.bf16.msra.mxu1 %v5944_v34  ;;  %v7154_v31 = vld [vmem:[#allocation8 + $0x924] sm:$0xf0]  ;;  %v6047_v34 = vld [vmem:[#allocation8 + $0x9a0] sm:$0xf]  ;;  %v6279_v43 = vld [vmem:[#allocation8 + $0xb70] sm:$0xf] }
 0x109   :  { %v5984_v45 = vor.u32 %v7154_v31, %v5983_v6  ;;  %v581_v8 = vadd.f32 %v7753_v32, %v134_v36  ;;  %v7150_v6 = vld [vmem:[#allocation8 + $0x904] sm:$0xf0]  ;;  %v6031_v31 = vld [vmem:[#allocation8 + $0x980] sm:$0xf]  ;;  %v620_v32 = vadd.f32 %v7763_v54, %v137_v39  ;;  %v6151_v36 = vld [vmem:[#allocation8 + $0xa70] sm:$0xf] }
 0x10a   :  { %4157 = vmatpush.bf16.msra.mxu2 %v6008_v38  ;;  %4170 = vmatpush.bf16.msra.mxu3 %v6072_v37  ;;  %v135_v38 = vperm.slane %v7801_v12, 1  ;;  %v136_v37 = vperm.slane %v7801_v12, 2 }
 0x10b   :  { %v798_v39 = vmax.f32 %v620_v32, 0.0 }
 0x10c   :  { %4132 = vmatpush.bf16.msra.mxu0 %v5872_v46  ;;  %4145 = vmatpush.bf16.msra.mxu1 %v5936_v47  ;;  %v6048_v46 = vor.u32 %v7170_v35, %v6047_v34  ;;  %v5911_v47 = vld [vmem:[#allocation8 + $0x890] sm:$0xf]  ;;  %v607_v34 = vadd.f32 %v7761_v53, %v136_v37  ;;  %v7166_v35 = vld [vmem:[#allocation8 + $0x984] sm:$0xf0]  ;;  %v5968_v53 = vor.u32 %v7150_v6, %v5967_v21 }
 0x10d   :  { %v7807_v9 = vpop.f32.mrf.mxu0  ;;  %v7809_v7 = vpop.f32.mrf.mxu1  ;;  %v6032_v37 = vor.u32 %v7166_v35, %v6031_v31  ;;  %v7242_v21 = vld [vmem:[#allocation8 + $0xbe4] sm:$0xf0] }
 0x10e   :  { %4158 = vmatpush.bf16.msra.mxu2 %v6000_v60  ;;  %4171 = vmatpush.bf16.msra.mxu3 %v6064_v51  ;;  %v712_v60 = vpop.f32.mrf.mxu2  ;;  %v725_v51 = vpop.f32.mrf.mxu3  ;;  %v797_v54 = vmax.f32 %v607_v34, 0.0 }
 0x110   :  { %4133 = vmatpush.bf16.msra.mxu0 %v5864_v13  ;;  %4146 = vmatpush.bf16.msra.mxu1 %v5928_v14  ;;  %v5912_v13 = vor.u32 %v7136_v48, %v5911_v47  ;;  %v7118_v14 = vld [vmem:[#allocation8 + $0x804] sm:$0xf0]  ;;  %v7244_v47 = vld [vmem:[#allocation8 + $0xbf4] sm:$0xf0]  ;;  %v795_v48 = vmax.f32 %v581_v8, 0.0  ;;  %v7823_v34 = vpack.c.bf16 %v797_v54, %v797_v54 }
 0x111   :  { %v6271_v8 = vld [vmem:[#allocation8 + $0xb60] sm:$0xf]  ;;  %v7190_v54 = vld [vmem:[#allocation8 + $0xa44] sm:$0xf0] }
 0x112   :  { %4159 = vmatpush.bf16.msra.mxu2 %v5992_v16  ;;  %4172 = vmatpush.bf16.msra.mxu3 %v6056_v17  ;;  %v594_v16 = vadd.f32 %v7755_v33, %v135_v38  ;;  %v5976_v17 = vor.u32 %v7152_v52, %v5975_v49  ;;  %v5840_v33 = vor.u32 %v7118_v14, %v5839_v57  ;;  %v6143_v52 = vld [vmem:[#allocation8 + $0xa60] sm:$0xf] }
 0x113   :  { %v5904_v38 = vor.u32 %v7134_v2, %v5903_v15  ;;  %v6207_v14 = vld [vmem:[#allocation8 + $0xae0] sm:$0xf]  ;;  %v7210_v15 = vld [vmem:[#allocation8 + $0xae4] sm:$0xf0]  ;;  %v7819_v6 = vpack.c.bf16 %v795_v48, %v795_v48  ;;  %7970 = vst [vmem:[#allocation16_spill] sm:$0xff] %v7823_v34  ;;  %v6144_v32 = vor.u32 %v7194_v44, %v6143_v52 }
 0x114   :  { %4134 = vmatpush.bf16.msra.mxu0 %v5856_v40  ;;  %4147 = vmatpush.bf16.msra.mxu1 %v5920_v41  ;;  %v7196_v40 = vld [vmem:[#allocation8 + $0xa74] sm:$0xf0]  ;;  %v6215_v41 = vld [vmem:[#allocation8 + $0xaf0] sm:$0xf]  ;;  %v796_v49 = vmax.f32 %v594_v16, 0.0  ;;  %v6208_v35 = vor.u32 %v7210_v15, %v6207_v14 }
 0x115   :  { %v6152_v60 = vor.u32 %v7196_v40, %v6151_v36  ;;  %v6216_v51 = vor.u32 %v7212_v42, %v6215_v41  ;;  %v738_v2 = vpop.f32.mrf.mxu0  ;;  %v751_v16 = vpop.f32.mrf.mxu1  ;;  %v6135_v36 = vld [vmem:[#allocation8 + $0xa50] sm:$0xf]  ;;  %v7192_v40 = vld [vmem:[#allocation8 + $0xa54] sm:$0xf0]  ;;  %v7825_v41 = vpack.c.bf16 %v798_v39, %v798_v39  ;;  %v6191_v39 = vld [vmem:[#allocation8 + $0xac0] sm:$0xf] }
 0x116   :  { %4160 = vmatpush.bf16.msra.mxu2 %v5984_v45  ;;  %4173 = vmatpush.bf16.msra.mxu3 %v6048_v46  ;;  %v7228_v45 = vld [vmem:[#allocation8 + $0xb74] sm:$0xf0]  ;;  %v6343_v46 = vld [vmem:[#allocation8 + $0xbf0] sm:$0xf]  ;;  %v7815_v55 = vpop.f32.mrf.mxu2  ;;  %v7821_v31 = vpack.c.bf16 %v796_v49, %v796_v49  ;;  %v6136_v49 = vor.u32 %v7192_v40, %v6135_v36  ;;  %v1355_v14 = vld [vmem:[#allocation10] sm:$0x3] }
 0x117   :  { %v6280_v57 = vor.u32 %v7228_v45, %v6279_v43  ;;  %7971 = vst [vmem:[#allocation17_spill] sm:$0xff] %v7825_v41  ;;  %v6263_v45 = vld [vmem:[#allocation8 + $0xb50] sm:$0xf]  ;;  %v7240_v48 = vld [vmem:[#allocation8 + $0xbd4] sm:$0xf0] }
 0x118   :  { %4135 = vmatpush.bf16.msra.mxu0 %v5848_v10  ;;  %4148 = vmatpush.bf16.msra.mxu1 %v5912_v13  ;;  %v7817_v10 = vpop.f32.mrf.mxu3  ;;  %v6344_v13 = vor.u32 %v7244_v47, %v6343_v46  ;;  %v7224_v46 = vld [vmem:[#allocation8 + $0xb54] sm:$0xf0]  ;;  %v6327_v47 = vld [vmem:[#allocation8 + $0xbd0] sm:$0xf]  ;;  %v7222_v15 = vld [vmem:[#allocation8 + $0xb44] sm:$0xf0] }
 0x119   :  { %v6264_v52 = vor.u32 %v7224_v46, %v6263_v45  ;;  %v6328_v44 = vor.u32 %v7240_v48, %v6327_v47  ;;  %v7238_v2 = vld [vmem:[#allocation8 + $0xbc4] sm:$0xf0]  ;;  %v6183_v40 = vld [vmem:[#allocation8 + $0xab0] sm:$0xf]  ;;  %v7236_v45 = vld [vmem:[#allocation8 + $0xbb4] sm:$0xf0] }
 0x11a   :  { %4161 = vmatpush.bf16.msra.mxu2 %v5976_v17  ;;  %4174 = vmatpush.bf16.msra.mxu3 %v6040_v18  ;;  %v7226_v17 = vld [vmem:[#allocation8 + $0xb64] sm:$0xf0]  ;;  %v6335_v18 = vld [vmem:[#allocation8 + $0xbe0] sm:$0xf]  ;;  %v138_v46 = vperm.slane %v7801_v12, 4 }
 0x11b   :  { %v6272_v42 = vor.u32 %v7226_v17, %v6271_v8  ;;  %v6336_v43 = vor.u32 %v7242_v21, %v6335_v18  ;;  %v6319_v8 = vld [vmem:[#allocation8 + $0xbc0] sm:$0xf]  ;;  %v1357_v18 = vperm.slane %v1355_v14, 0  ;;  %v6119_v21 = vld [vmem:[#allocation8 + $0xa30] sm:$0xf] }
 0x11c   :  { %4136 = vmatpush.bf16.msra.mxu0 %v5840_v33  ;;  %4149 = vmatpush.bf16.msra.mxu1 %v5904_v38  ;;  %v6199_v33 = vld [vmem:[#allocation8 + $0xad0] sm:$0xf]  ;;  %v7208_v38 = vld [vmem:[#allocation8 + $0xad4] sm:$0xf0]  ;;  %v6320_v36 = vor.u32 %v7238_v2, %v6319_v8  ;;  %v7218_v14 = vld [vmem:[#allocation8 + $0xb24] sm:$0xf0]  ;;  %v7833_v2 = vadd.f32 %v7769_v50, %v138_v46 }
 0x11d   :  { %v7234_v8 = vld [vmem:[#allocation8 + $0xba4] sm:$0xf0]  ;;  %v6231_v50 = vld [vmem:[#allocation8 + $0xb10] sm:$0xf]  ;;  %v7232_v46 = vld [vmem:[#allocation8 + $0xb94] sm:$0xf0] }
 0x11e   :  { %4162 = vmatpush.bf16.msra.mxu2 %v5968_v53  ;;  %4175 = vmatpush.bf16.msra.mxu3 %v6032_v37  ;;  %v6200_v53 = vor.u32 %v7208_v38, %v6199_v33  ;;  %v6127_v37 = vld [vmem:[#allocation8 + $0xa40] sm:$0xf]  ;;  %v7220_v33 = vld [vmem:[#allocation8 + $0xb34] sm:$0xf0]  ;;  %v6311_v38 = vld [vmem:[#allocation8 + $0xbb0] sm:$0xf] }
 0x11f   :  { %4137 = vmatmul.bf16.vlgmr.msra.gmra.mxu0 %v7819_v6  ;;  %4150 = vmatmul.bf16.vlgmr.msra.gmra.mxu1 %v7821_v31  ;;  %v6128_v16 = vor.u32 %v7190_v54, %v6127_v37  ;;  %v6111_v54 = vld [vmem:[#allocation8 + $0xa20] sm:$0xf] }
 0x120   :  { %4181 = vmatpush.bf16.msrb.mxu0 %v6152_v60  ;;  %4194 = vmatpush.bf16.msrb.mxu1 %v6216_v51  ;;  %v764_v60 = vpop.f32.mrf.mxu2  ;;  %v777_v51 = vpop.f32.mrf.mxu3 }
 0x121   :  { %4163 = vmatmul.bf16.vlgmr.msra.gmra.mxu2 %v7823_v34  ;;  %4176 = vmatmul.bf16.vlgmr.msra.gmra.mxu3 %v7825_v41  ;;  %v3930_v47 = vpop.f32.mrf.mxu0  ;;  %v3943_v48 = vpop.f32.mrf.mxu1  ;;  %v6312_v51 = vor.u32 %v7236_v45, %v6311_v38  ;;  %v7216_v38 = vld [vmem:[#allocation8 + $0xb14] sm:$0xf0]  ;;  %v6295_v45 = vld [vmem:[#allocation8 + $0xb90] sm:$0xf]  ;;  %v6399_v41 = vld [vmem:[#allocation8 + $0xc60] sm:$0xf] }
 0x122   :  { %4207 = vmatpush.bf16.msrb.mxu2 %v6280_v57  ;;  %4220 = vmatpush.bf16.msrb.mxu3 %v6344_v13  ;;  %v7206_v57 = vld [vmem:[#allocation8 + $0xac4] sm:$0xf0]  ;;  %v6255_v13 = vld [vmem:[#allocation8 + $0xb40] sm:$0xf] }
 0x123   :  { %v6192_v17 = vor.u32 %v7206_v57, %v6191_v39  ;;  %v7186_v39 = vld [vmem:[#allocation8 + $0xa24] sm:$0xf0]  ;;  %v6239_v57 = vld [vmem:[#allocation8 + $0xb20] sm:$0xf] }
 0x124   :  { %4182 = vmatpush.bf16.msrb.mxu0 %v6144_v32  ;;  %4195 = vmatpush.bf16.msrb.mxu1 %v6208_v35  ;;  %v7188_v32 = vld [vmem:[#allocation8 + $0xa34] sm:$0xf0]  ;;  %v6256_v35 = vor.u32 %v7222_v15, %v6255_v13  ;;  %v6303_v15 = vld [vmem:[#allocation8 + $0xba0] sm:$0xf]  ;;  %v7258_v34 = vld [vmem:[#allocation8 + $0xc64] sm:$0xf0] }
 0x126   :  { %4208 = vmatpush.bf16.msrb.mxu2 %v6272_v42  ;;  %4221 = vmatpush.bf16.msrb.mxu3 %v6336_v43  ;;  %v7204_v42 = vld [vmem:[#allocation8 + $0xab4] sm:$0xf0]  ;;  %v6247_v43 = vld [vmem:[#allocation8 + $0xb30] sm:$0xf] }
 0x127   :  { %v6184_v37 = vor.u32 %v7204_v42, %v6183_v40  ;;  %v6248_v60 = vor.u32 %v7220_v33, %v6247_v43  ;;  %v6240_v40 = vor.u32 %v7218_v14, %v6239_v57  ;;  %v6304_v42 = vor.u32 %v7234_v8, %v6303_v15  ;;  %v6167_v43 = vld [vmem:[#allocation8 + $0xa90] sm:$0xf]  ;;  %v7200_v33 = vld [vmem:[#allocation8 + $0xa94] sm:$0xf0]  ;;  %v6223_v57 = vld [vmem:[#allocation8 + $0xb00] sm:$0xf] }
 0x128   :  { %4183 = vmatpush.bf16.msrb.mxu0 %v6136_v49  ;;  %4196 = vmatpush.bf16.msrb.mxu1 %v6200_v53  ;;  %v3931_v49 = vadd.f32 %v3930_v47, %v1357_v18  ;;  %v6120_v53 = vor.u32 %v7188_v32, %v6119_v21  ;;  %v141_v18 = vperm.slane %v7801_v12, 7  ;;  %v6112_v21 = vor.u32 %v7186_v39, %v6111_v54  ;;  %v7182_v54 = vld [vmem:[#allocation8 + $0xa04] sm:$0xf0]  ;;  %v6159_v39 = vld [vmem:[#allocation8 + $0xa80] sm:$0xf] }
 0x129   :  { %v799_v47 = vmax.f32 %v7833_v2, 0.0  ;;  %v7214_v14 = vld [vmem:[#allocation8 + $0xb04] sm:$0xf0]  ;;  %v6287_v15 = vld [vmem:[#allocation8 + $0xb80] sm:$0xf] }
 0x12a   :  { %4209 = vmatpush.bf16.msrb.mxu2 %v6264_v52  ;;  %4222 = vmatpush.bf16.msrb.mxu3 %v6328_v44  ;;  %v6175_v52 = vld [vmem:[#allocation8 + $0xaa0] sm:$0xf]  ;;  %v7202_v44 = vld [vmem:[#allocation8 + $0xaa4] sm:$0xf0]  ;;  %v3944_v13 = vadd.f32 %v3943_v48, %v3931_v49  ;;  %v3932_v48 = vpop.f32.mrf.mxu0  ;;  %v672_v2 = vadd.f32 %v7779_v25, %v141_v18  ;;  %v6224_v25 = vor.u32 %v7214_v14, %v6223_v57 }
 0x12b   :  { %v6176_v32 = vor.u32 %v7202_v44, %v6175_v52  ;;  %v6095_v49 = vld [vmem:[#allocation8 + $0xa00] sm:$0xf]  ;;  %v6232_v52 = vor.u32 %v7216_v38, %v6231_v50  ;;  %v6296_v44 = vor.u32 %v7232_v46, %v6295_v45  ;;  %v6471_v48 = vld [vmem:[#allocation8 + $0xcf0] sm:$0xf]  ;;  %v7308_v38 = vld [vmem:[#allocation8 + $0xdf4] sm:$0xf0] }
 0x12c   :  { %4184 = vmatpush.bf16.msrb.mxu0 %v6128_v16  ;;  %4197 = vmatpush.bf16.msrb.mxu1 %v6192_v17  ;;  %v139_v16 = vperm.slane %v7801_v12, 5  ;;  %v140_v17 = vperm.slane %v7801_v12, 6  ;;  %v3945_v12 = vpop.f32.mrf.mxu1  ;;  %v6599_v50 = vld [vmem:[#allocation8 + $0xdf0] sm:$0xf]  ;;  %v802_v46 = vmax.f32 %v672_v2, 0.0 }
 0x12d   :  { %v7276_v12 = vld [vmem:[#allocation8 + $0xcf4] sm:$0xf0] }
 0x12e   :  { %4210 = vmatpush.bf16.msrb.mxu2 %v6256_v35  ;;  %4223 = vmatpush.bf16.msrb.mxu3 %v6320_v36  ;;  %v6103_v35 = vld [vmem:[#allocation8 + $0xa10] sm:$0xf]  ;;  %v7184_v36 = vld [vmem:[#allocation8 + $0xa14] sm:$0xf0]  ;;  %v659_v8 = vadd.f32 %v7777_v3, %v140_v17 }
 0x130   :  { %4185 = vmatpush.bf16.msrb.mxu0 %v6120_v53  ;;  %4198 = vmatpush.bf16.msrb.mxu1 %v6184_v37  ;;  %v6104_v53 = vor.u32 %v7184_v36, %v6103_v35  ;;  %v6168_v37 = vor.u32 %v7200_v33, %v6167_v43  ;;  %v7230_v35 = vld [vmem:[#allocation8 + $0xb84] sm:$0xf0]  ;;  %v6407_v36 = vld [vmem:[#allocation8 + $0xc70] sm:$0xf]  ;;  %v7260_v43 = vld [vmem:[#allocation8 + $0xc74] sm:$0xf0] }
 0x131   :  { %v6288_v17 = vor.u32 %v7230_v35, %v6287_v15  ;;  %v801_v18 = vmax.f32 %v659_v8, 0.0  ;;  %v6400_v15 = vor.u32 %v7258_v34, %v6399_v41  ;;  %v6391_v35 = vld [vmem:[#allocation8 + $0xc50] sm:$0xf]  ;;  %v7304_v41 = vld [vmem:[#allocation8 + $0xdd4] sm:$0xf0] }
 0x132   :  { %4211 = vmatpush.bf16.msrb.mxu2 %v6248_v60  ;;  %4224 = vmatpush.bf16.msrb.mxu3 %v6312_v51  ;;  %v7198_v60 = vld [vmem:[#allocation8 + $0xa84] sm:$0xf0]  ;;  %v646_v51 = vadd.f32 %v7771_v59, %v139_v16  ;;  %v6535_v59 = vld [vmem:[#allocation8 + $0xd70] sm:$0xf]  ;;  %v6096_v16 = vor.u32 %v7182_v54, %v6095_v49  ;;  %v6463_v49 = vld [vmem:[#allocation8 + $0xce0] sm:$0xf] }
 0x133   :  { %v7274_v54 = vld [vmem:[#allocation8 + $0xce4] sm:$0xf0]  ;;  %v7848_v14 = vpack.c.bf16 %v801_v18, %v801_v18  ;;  %v6583_v34 = vld [vmem:[#allocation8 + $0xdd0] sm:$0xf] }
 0x134   :  { %4186 = vmatpush.bf16.msrb.mxu0 %v6112_v21  ;;  %4199 = vmatpush.bf16.msrb.mxu1 %v6176_v32  ;;  %v3956_v21 = vpop.f32.mrf.mxu2  ;;  %v3969_v32 = vpop.f32.mrf.mxu3  ;;  %v800_v45 = vmax.f32 %v646_v51, 0.0  ;;  %v6591_v51 = vld [vmem:[#allocation8 + $0xde0] sm:$0xf]  ;;  %v6464_v8 = vor.u32 %v7274_v54, %v6463_v49  ;;  %v7270_v18 = vld [vmem:[#allocation8 + $0xcc4] sm:$0xf0] }
 0x135   :  { %v3957_v33 = vadd.f32 %v3956_v21, %v3944_v13  ;;  %v6408_v13 = vor.u32 %v7260_v43, %v6407_v36  ;;  %v6472_v21 = vor.u32 %v7276_v12, %v6471_v48  ;;  %v7256_v36 = vld [vmem:[#allocation8 + $0xc54] sm:$0xf0]  ;;  %v7850_v43 = vpack.c.bf16 %v802_v46, %v802_v46  ;;  %v6455_v48 = vld [vmem:[#allocation8 + $0xcd0] sm:$0xf]  ;;  %v6511_v46 = vld [vmem:[#allocation8 + $0xd40] sm:$0xf] }
 0x136   :  { %4212 = vmatpush.bf16.msrb.mxu2 %v6240_v40  ;;  %4225 = vmatpush.bf16.msrb.mxu3 %v6304_v42  ;;  %v6160_v40 = vor.u32 %v7198_v60, %v6159_v39  ;;  %v7292_v42 = vld [vmem:[#allocation8 + $0xd74] sm:$0xf0]  ;;  %v6527_v39 = vld [vmem:[#allocation8 + $0xd60] sm:$0xf]  ;;  %v7290_v60 = vld [vmem:[#allocation8 + $0xd64] sm:$0xf0]  ;;  %v7846_v57 = vpack.c.bf16 %v800_v45, %v800_v45 }
 0x137   :  { %v7842_v3 = vadd.f32 %v3969_v32, %v3957_v33  ;;  %7972 = vst [vmem:[#allocation18_spill] sm:$0xff] %v7850_v43  ;;  %v7272_v12 = vld [vmem:[#allocation8 + $0xcd4] sm:$0xf0] }
 0x138   :  { %4187 = vmatpush.bf16.msrb.mxu0 %v6104_v53  ;;  %4200 = vmatpush.bf16.msrb.mxu1 %v6168_v37  ;;  %v6536_v53 = vor.u32 %v7292_v42, %v6535_v59  ;;  %v6600_v37 = vor.u32 %v7308_v38, %v6599_v50  ;;  %v6519_v59 = vld [vmem:[#allocation8 + $0xd50] sm:$0xf]  ;;  %v6456_v42 = vor.u32 %v7272_v12, %v6455_v48  ;;  %v6383_v50 = vld [vmem:[#allocation8 + $0xc40] sm:$0xf]  ;;  %v7254_v38 = vld [vmem:[#allocation8 + $0xc44] sm:$0xf0] }
 0x139   :  { %v7300_v48 = vld [vmem:[#allocation8 + $0xdb4] sm:$0xf0] }
 0x13a   :  { %4213 = vmatpush.bf16.msrb.mxu2 %v6232_v52  ;;  %4226 = vmatpush.bf16.msrb.mxu3 %v6296_v44  ;;  %v7306_v52 = vld [vmem:[#allocation8 + $0xde4] sm:$0xf0]  ;;  %v7844_v44 = vpack.c.bf16 %v799_v47, %v799_v47  ;;  %v6528_v47 = vor.u32 %v7290_v60, %v6527_v39  ;;  %v6384_v39 = vor.u32 %v7254_v38, %v6383_v50  ;;  %v7857_v12 = vld [vmem:[#allocation7 + $0x18] sm:$0xff]  ;;  %v6495_v38 = vld [vmem:[#allocation8 + $0xd20] sm:$0xf] }
 0x13b   :  { %v6592_v33 = vor.u32 %v7306_v52, %v6591_v51  ;;  %v6375_v51 = vld [vmem:[#allocation8 + $0xc30] sm:$0xf]  ;;  %v7252_v52 = vld [vmem:[#allocation8 + $0xc34] sm:$0xf0]  ;;  %v7266_v50 = vld [vmem:[#allocation8 + $0xca4] sm:$0xf0] }
 0x13c   :  { %4188 = vmatpush.bf16.msrb.mxu0 %v6096_v16  ;;  %4201 = vmatpush.bf16.msrb.mxu1 %v6160_v40  ;;  %v3958_v2 = vpop.f32.mrf.mxu2  ;;  %v3971_v32 = vpop.f32.mrf.mxu3  ;;  %v7288_v16 = vld [vmem:[#allocation8 + $0xd54] sm:$0xf0]  ;;  %v6392_v40 = vor.u32 %v7256_v36, %v6391_v35  ;;  %v6503_v35 = vld [vmem:[#allocation8 + $0xd30] sm:$0xf] }
 0x13d   :  { %v6520_v45 = vor.u32 %v7288_v16, %v6519_v59  ;;  %v3995_v49 = vpop.f32.mrf.mxu1  ;;  %v6439_v2 = vld [vmem:[#allocation8 + $0xcb0] sm:$0xf]  ;;  %v7268_v32 = vld [vmem:[#allocation8 + $0xcb4] sm:$0xf0]  ;;  %v6367_v16 = vld [vmem:[#allocation8 + $0xc20] sm:$0xf] }
 0x13e   :  { %4214 = vmatpush.bf16.msrb.mxu2 %v6224_v25  ;;  %4227 = vmatpush.bf16.msrb.mxu3 %v6288_v17  ;;  %v6584_v25 = vor.u32 %v7304_v41, %v6583_v34  ;;  %v6447_v17 = vld [vmem:[#allocation8 + $0xcc0] sm:$0xf]  ;;  %v6440_v59 = vor.u32 %v7268_v32, %v6439_v2  ;;  %v7250_v34 = vld [vmem:[#allocation8 + $0xc24] sm:$0xf0] }
 0x13f   :  { %4189 = vmatmul.bf16.vlgmr.msrb.gmra.mxu0 %v7844_v44  ;;  %4202 = vmatmul.bf16.vlgmr.msrb.gmra.mxu1 %v7846_v57  ;;  %v6448_v60 = vor.u32 %v7270_v18, %v6447_v17  ;;  %v7282_v17 = vld [vmem:[#allocation8 + $0xd24] sm:$0xf0]  ;;  %v6559_v18 = vld [vmem:[#allocation8 + $0xda0] sm:$0xf] }
 0x140   :  { %4233 = vmatpush.bf16.msra.mxu0 %v6408_v13  ;;  %4246 = vmatpush.bf16.msra.mxu1 %v6472_v21  ;;  %v7286_v13 = vld [vmem:[#allocation8 + $0xd44] sm:$0xf0]  ;;  %v6575_v21 = vld [vmem:[#allocation8 + $0xdc0] sm:$0xf]  ;;  %v6496_v2 = vor.u32 %v7282_v17, %v6495_v38 }
 0x141   :  { %4215 = vmatmul.bf16.vlgmr.msrb.gmra.mxu2 %v7848_v14  ;;  %4228 = vmatmul.bf16.vlgmr.msrb.gmra.mxu3 %v7850_v43  ;;  %v7278_v17 = vld [vmem:[#allocation8 + $0xd04] sm:$0xf0] }
 0x142   :  { %4259 = vmatpush.bf16.msra.mxu2 %v6536_v53  ;;  %4272 = vmatpush.bf16.msra.mxu3 %v6600_v37  ;;  %v7302_v53 = vld [vmem:[#allocation8 + $0xdc4] sm:$0xf0]  ;;  %v3982_v37 = vpop.f32.mrf.mxu0 }
 0x143   :  { %v3983_v54 = vadd.f32 %v3982_v37, %v7842_v3  ;;  %v6376_v3 = vor.u32 %v7252_v52, %v6375_v51  ;;  %v6359_v52 = vld [vmem:[#allocation8 + $0xc10] sm:$0xf] }
 0x144   :  { %4234 = vmatpush.bf16.msra.mxu0 %v6400_v15  ;;  %4247 = vmatpush.bf16.msra.mxu1 %v6464_v8  ;;  %v6512_v15 = vor.u32 %v7286_v13, %v6511_v46  ;;  %v6576_v8 = vor.u32 %v7302_v53, %v6575_v21  ;;  %v7298_v46 = vld [vmem:[#allocation8 + $0xda4] sm:$0xf0]  ;;  %v142_v13 = vperm.slane %v7857_v12, 0  ;;  %v143_v21 = vperm.slane %v7857_v12, 1 }
 0x145   :  { %v3996_v36 = vadd.f32 %v3995_v49, %v3983_v54  ;;  %v3997_v49 = vpop.f32.mrf.mxu1  ;;  %v144_v54 = vperm.slane %v7857_v12, 2  ;;  %v6560_v32 = vor.u32 %v7298_v46, %v6559_v18  ;;  %v6543_v18 = vld [vmem:[#allocation8 + $0xd80] sm:$0xf] }
 0x146   :  { %4260 = vmatpush.bf16.msra.mxu2 %v6528_v47  ;;  %4273 = vmatpush.bf16.msra.mxu3 %v6592_v33  ;;  %v7284_v47 = vld [vmem:[#allocation8 + $0xd34] sm:$0xf0]  ;;  %v6567_v33 = vld [vmem:[#allocation8 + $0xdb0] sm:$0xf]  ;;  %v7294_v49 = vld [vmem:[#allocation8 + $0xd84] sm:$0xf0] }
 0x147   :  { %v6504_v41 = vor.u32 %v7284_v47, %v6503_v35  ;;  %v6423_v35 = vld [vmem:[#allocation8 + $0xc90] sm:$0xf]  ;;  %v711_v46 = vadd.f32 %v7797_v56, %v144_v54 }
 0x148   :  { %4235 = vmatpush.bf16.msra.mxu0 %v6392_v40  ;;  %4248 = vmatpush.bf16.msra.mxu1 %v6456_v42  ;;  %v6568_v40 = vor.u32 %v7300_v48, %v6567_v33  ;;  %v6431_v42 = vld [vmem:[#allocation8 + $0xca0] sm:$0xf]  ;;  %v6487_v47 = vld [vmem:[#allocation8 + $0xd10] sm:$0xf]  ;;  %v7280_v33 = vld [vmem:[#allocation8 + $0xd14] sm:$0xf0] }
 0x149   :  { %v6432_v51 = vor.u32 %v7266_v50, %v6431_v42  ;;  %v6551_v48 = vld [vmem:[#allocation8 + $0xd90] sm:$0xf]  ;;  %v698_v42 = vadd.f32 %v7795_v26, %v143_v21  ;;  %v6488_v50 = vor.u32 %v7280_v33, %v6487_v47  ;;  %v805_v54 = vmax.f32 %v711_v46, 0.0  ;;  %v7320_v46 = vld [vmem:[#allocation8 + $0xe54] sm:$0xf0] }
 0x14a   :  { %4261 = vmatpush.bf16.msra.mxu2 %v6520_v45  ;;  %4274 = vmatpush.bf16.msra.mxu3 %v6584_v25  ;;  %v4008_v45 = vpop.f32.mrf.mxu2  ;;  %v4021_v25 = vpop.f32.mrf.mxu3 }
 0x14b   :  { %v4009_v53 = vadd.f32 %v4008_v45, %v3996_v36  ;;  %v3984_v37 = vpop.f32.mrf.mxu0  ;;  %v7264_v36 = vld [vmem:[#allocation8 + $0xc94] sm:$0xf0]  ;;  %v804_v33 = vmax.f32 %v698_v42, 0.0 }
 0x14c   :  { %4236 = vmatpush.bf16.msra.mxu0 %v6384_v39  ;;  %4249 = vmatpush.bf16.msra.mxu1 %v6448_v60  ;;  %v145_v39 = vperm.slane %v7857_v12, 3  ;;  %v6368_v60 = vor.u32 %v7250_v34, %v6367_v16  ;;  %v7296_v45 = vld [vmem:[#allocation8 + $0xd94] sm:$0xf0]  ;;  %v6351_v37 = vld [vmem:[#allocation8 + $0xc00] sm:$0xf]  ;;  %v6424_v16 = vor.u32 %v7264_v36, %v6423_v35 }
 0x14d   :  { %v7246_v34 = vld [vmem:[#allocation8 + $0xc04] sm:$0xf0]  ;;  %v6552_v38 = vor.u32 %v7296_v45, %v6551_v48  ;;  %v6791_v35 = vld [vmem:[#allocation8 + $0xf70] sm:$0xf]  ;;  %v7372_v36 = vld [vmem:[#allocation8 + $0xff4] sm:$0xf0] }
 0x14e   :  { %4262 = vmatpush.bf16.msra.mxu2 %v6512_v15  ;;  %4275 = vmatpush.bf16.msra.mxu3 %v6576_v8  ;;  %v7248_v15 = vld [vmem:[#allocation8 + $0xc14] sm:$0xf0]  ;;  %v7863_v8 = vadd.f32 %v4021_v25, %v4009_v53  ;;  %v6479_v25 = vld [vmem:[#allocation8 + $0xd00] sm:$0xf]  ;;  %v6352_v26 = vor.u32 %v7246_v34, %v6351_v37  ;;  %v7338_v37 = vld [vmem:[#allocation8 + $0xee4] sm:$0xf0] }
 0x14f   :  { %v6480_v56 = vor.u32 %v7278_v17, %v6479_v25  ;;  %v6783_v34 = vld [vmem:[#allocation8 + $0xf60] sm:$0xf] }
 0x150   :  { %4237 = vmatpush.bf16.msra.mxu0 %v6376_v3  ;;  %4250 = vmatpush.bf16.msra.mxu1 %v6440_v59  ;;  %v685_v3 = vadd.f32 %v7793_v22, %v142_v13  ;;  %v6360_v59 = vor.u32 %v7248_v15, %v6359_v52  ;;  %v724_v22 = vadd.f32 %v7799_v23, %v145_v39  ;;  %v6727_v52 = vld [vmem:[#allocation8 + $0xef0] sm:$0xf]  ;;  %v7340_v15 = vld [vmem:[#allocation8 + $0xef4] sm:$0xf0] }
 0x151   :  { %v6544_v23 = vor.u32 %v7294_v49, %v6543_v18  ;;  %v6728_v45 = vor.u32 %v7340_v15, %v6727_v52  ;;  %v6647_v18 = vld [vmem:[#allocation8 + $0xe50] sm:$0xf]  ;;  %v7336_v52 = vld [vmem:[#allocation8 + $0xed4] sm:$0xf0] }
 0x152   :  { %4263 = vmatpush.bf16.msra.mxu2 %v6504_v41  ;;  %4276 = vmatpush.bf16.msra.mxu3 %v6568_v40  ;;  %v6415_v41 = vld [vmem:[#allocation8 + $0xc80] sm:$0xf]  ;;  %v7262_v40 = vld [vmem:[#allocation8 + $0xc84] sm:$0xf0]  ;;  %v4010_v13 = vpop.f32.mrf.mxu2  ;;  %v4023_v53 = vpop.f32.mrf.mxu3  ;;  %v803_v47 = vmax.f32 %v685_v3, 0.0  ;;  %v806_v39 = vmax.f32 %v724_v22, 0.0 }
 0x153   :  { %v6416_v21 = vor.u32 %v7262_v40, %v6415_v41  ;;  %v6655_v13 = vld [vmem:[#allocation8 + $0xe60] sm:$0xf]  ;;  %v7322_v53 = vld [vmem:[#allocation8 + $0xe64] sm:$0xf0]  ;;  %v6775_v15 = vld [vmem:[#allocation8 + $0xf50] sm:$0xf] }
 0x154   :  { %4238 = vmatpush.bf16.msra.mxu0 %v6368_v60  ;;  %4251 = vmatpush.bf16.msra.mxu1 %v6432_v51  ;;  %v6663_v60 = vld [vmem:[#allocation8 + $0xe70] sm:$0xf]  ;;  %v7324_v51 = vld [vmem:[#allocation8 + $0xe74] sm:$0xf0]  ;;  %v7354_v41 = vld [vmem:[#allocation8 + $0xf64] sm:$0xf0]  ;;  %v7869_v42 = vpack.c.bf16 %v803_v47, %v803_v47  ;;  %v6656_v25 = vor.u32 %v7322_v53, %v6655_v13  ;;  %v7875_v22 = vpack.c.bf16 %v806_v39, %v806_v39 }
 0x155   :  { %v6664_v48 = vor.u32 %v7324_v51, %v6663_v60  ;;  %v6847_v3 = vld [vmem:[#allocation8 + $0xfe0] sm:$0xf]  ;;  %v7370_v40 = vld [vmem:[#allocation8 + $0xfe4] sm:$0xf0]  ;;  %v6784_v49 = vor.u32 %v7354_v41, %v6783_v34  ;;  %v6711_v51 = vld [vmem:[#allocation8 + $0xed0] sm:$0xf] }
 0x156   :  { %4264 = vmatpush.bf16.msra.mxu2 %v6496_v2  ;;  %4277 = vmatpush.bf16.msra.mxu3 %v6560_v32  ;;  %v7356_v2 = vld [vmem:[#allocation8 + $0xf74] sm:$0xf0]  ;;  %v6855_v32 = vld [vmem:[#allocation8 + $0xff0] sm:$0xf]  ;;  %v6848_v60 = vor.u32 %v7370_v40, %v6847_v3  ;;  %v7350_v39 = vld [vmem:[#allocation8 + $0xf44] sm:$0xf0] }
 0x157   :  { %v6792_v43 = vor.u32 %v7356_v2, %v6791_v35  ;;  %v7352_v35 = vld [vmem:[#allocation8 + $0xf54] sm:$0xf0]  ;;  %v6712_v2 = vor.u32 %v7336_v52, %v6711_v51  ;;  %v6631_v34 = vld [vmem:[#allocation8 + $0xe30] sm:$0xf] }
 0x158   :  { %4239 = vmatpush.bf16.msra.mxu0 %v6360_v59  ;;  %4252 = vmatpush.bf16.msra.mxu1 %v6424_v16  ;;  %v6856_v59 = vor.u32 %v7372_v36, %v6855_v32  ;;  %v6719_v16 = vld [vmem:[#allocation8 + $0xee0] sm:$0xf]  ;;  %v7318_v36 = vld [vmem:[#allocation8 + $0xe44] sm:$0xf0]  ;;  %v6776_v47 = vor.u32 %v7352_v35, %v6775_v15  ;;  %v7316_v41 = vld [vmem:[#allocation8 + $0xe34] sm:$0xf0] }
 0x159   :  { %v6720_v17 = vor.u32 %v7338_v37, %v6719_v16  ;;  %v6639_v32 = vld [vmem:[#allocation8 + $0xe40] sm:$0xf]  ;;  %v7364_v51 = vld [vmem:[#allocation8 + $0xfb4] sm:$0xf0]  ;;  %v6632_v52 = vor.u32 %v7316_v41, %v6631_v34  ;;  %v7314_v35 = vld [vmem:[#allocation8 + $0xe24] sm:$0xf0] }
 0x15a   :  { %4265 = vmatpush.bf16.msra.mxu2 %v6488_v50  ;;  %4278 = vmatpush.bf16.msra.mxu3 %v6552_v38  ;;  %v7871_v50 = vpack.c.bf16 %v804_v33, %v804_v33  ;;  %v7873_v38 = vpack.c.bf16 %v805_v54, %v805_v54  ;;  %v6767_v54 = vld [vmem:[#allocation8 + $0xf40] sm:$0xf]  ;;  %v6640_v16 = vor.u32 %v7318_v36, %v6639_v32  ;;  %v6615_v34 = vld [vmem:[#allocation8 + $0xe10] sm:$0xf]  ;;  %v7312_v41 = vld [vmem:[#allocation8 + $0xe14] sm:$0xf0] }
 0x15b   :  { %v6768_v3 = vor.u32 %v7350_v39, %v6767_v54  ;;  %v6751_v32 = vld [vmem:[#allocation8 + $0xf20] sm:$0xf]  ;;  %v146_v54 = vperm.slane %v7857_v12, 4  ;;  %v147_v39 = vperm.slane %v7857_v12, 5 }
 0x15c   :  { %4240 = vmatpush.bf16.msra.mxu0 %v6352_v26  ;;  %4253 = vmatpush.bf16.msra.mxu1 %v6416_v21  ;;  %v6839_v26 = vld [vmem:[#allocation8 + $0xfd0] sm:$0xf]  ;;  %v7368_v21 = vld [vmem:[#allocation8 + $0xfd4] sm:$0xf0]  ;;  %v4034_v13 = vpop.f32.mrf.mxu0  ;;  %v4047_v53 = vpop.f32.mrf.mxu1 }
 0x15d   :  { %v6840_v33 = vor.u32 %v7368_v21, %v6839_v26 }
 0x15e   :  { %4266 = vmatpush.bf16.msra.mxu2 %v6480_v56  ;;  %4279 = vmatpush.bf16.msra.mxu3 %v6544_v23  ;;  %v6703_v56 = vld [vmem:[#allocation8 + $0xec0] sm:$0xf]  ;;  %v7334_v23 = vld [vmem:[#allocation8 + $0xec4] sm:$0xf0] }
 0x15f   :  { %4241 = vmatmul.bf16.vlgmr.msra.gmra.mxu0 %v7869_v42  ;;  %4254 = vmatmul.bf16.vlgmr.msra.gmra.mxu1 %v7871_v50  ;;  %v6704_v37 = vor.u32 %v7334_v23, %v6703_v56  ;;  %v6815_v56 = vld [vmem:[#allocation8 + $0xfa0] sm:$0xf]  ;;  %v7362_v23 = vld [vmem:[#allocation8 + $0xfa4] sm:$0xf0] }
 0x160   :  { %4285 = vmatpush.bf16.msrb.mxu0 %v6664_v48  ;;  %4298 = vmatpush.bf16.msrb.mxu1 %v6728_v45  ;;  %v6831_v48 = vld [vmem:[#allocation8 + $0xfc0] sm:$0xf]  ;;  %v7366_v45 = vld [vmem:[#allocation8 + $0xfc4] sm:$0xf0] }
 0x161   :  { %4267 = vmatmul.bf16.vlgmr.msra.gmra.mxu2 %v7873_v38  ;;  %4280 = vmatmul.bf16.vlgmr.msra.gmra.mxu3 %v7875_v22  ;;  %v6832_v40 = vor.u32 %v7366_v45, %v6831_v48 }
 0x162   :  { %4311 = vmatpush.bf16.msrb.mxu2 %v6792_v43  ;;  %4324 = vmatpush.bf16.msrb.mxu3 %v6856_v59  ;;  %v6648_v43 = vor.u32 %v7320_v46, %v6647_v18  ;;  %v4035_v59 = vadd.f32 %v4034_v13, %v7863_v8  ;;  %v6759_v18 = vld [vmem:[#allocation8 + $0xf30] sm:$0xf]  ;;  %v6623_v8 = vld [vmem:[#allocation8 + $0xe20] sm:$0xf] }
 0x164   :  { %4286 = vmatpush.bf16.msrb.mxu0 %v6656_v25  ;;  %4299 = vmatpush.bf16.msrb.mxu1 %v6720_v17  ;;  %v6695_v25 = vld [vmem:[#allocation8 + $0xeb0] sm:$0xf]  ;;  %v7332_v17 = vld [vmem:[#allocation8 + $0xeb4] sm:$0xf0]  ;;  %v4048_v46 = vadd.f32 %v4047_v53, %v4035_v59  ;;  %v4060_v36 = vpop.f32.mrf.mxu2  ;;  %v4036_v45 = vpop.f32.mrf.mxu0  ;;  %v148_v53 = vperm.slane %v7857_v12, 6  ;;  %v149_v59 = vperm.slane %v7857_v12, 7  ;;  %v737_v12 = vadd.f32 %v7807_v9, %v146_v54 }
 0x165   :  { %v6696_v15 = vor.u32 %v7332_v17, %v6695_v25  ;;  %v4049_v13 = vpop.f32.mrf.mxu1  ;;  %v6816_v25 = vor.u32 %v7362_v23, %v6815_v56  ;;  %v6679_v17 = vld [vmem:[#allocation8 + $0xe90] sm:$0xf]  ;;  %v6875_v45 = vld [vmem:[#allocation8 + $0x74] sm:$0xf] }
 0x166   :  { %4312 = vmatpush.bf16.msrb.mxu2 %v6784_v49  ;;  %4325 = vmatpush.bf16.msrb.mxu3 %v6848_v60  ;;  %v7348_v49 = vld [vmem:[#allocation8 + $0xf34] sm:$0xf0]  ;;  %v6823_v60 = vld [vmem:[#allocation8 + $0xfb0] sm:$0xf]  ;;  %v4061_v48 = vadd.f32 %v4060_v36, %v4048_v46  ;;  %v6607_v36 = vld [vmem:[#allocation8 + $0xe00] sm:$0xf]  ;;  %v763_v56 = vadd.f32 %v7815_v55, %v148_v53  ;;  %v776_v9 = vadd.f32 %v7817_v10, %v149_v59 }
 0x167   :  { %v6760_v26 = vor.u32 %v7348_v49, %v6759_v18  ;;  %v6824_v21 = vor.u32 %v7364_v51, %v6823_v60  ;;  %v7328_v18 = vld [vmem:[#allocation8 + $0xe94] sm:$0xf0]  ;;  %v6743_v46 = vld [vmem:[#allocation8 + $0xf10] sm:$0xf]  ;;  %v4873_v13 = vld [vmem:[#allocation8 + $0x78] sm:$0xf0] }
 0x168   :  { %4287 = vmatpush.bf16.msrb.mxu0 %v6648_v43  ;;  %4300 = vmatpush.bf16.msrb.mxu1 %v6712_v2  ;;  %v6687_v43 = vld [vmem:[#allocation8 + $0xea0] sm:$0xf]  ;;  %v7330_v2 = vld [vmem:[#allocation8 + $0xea4] sm:$0xf0]  ;;  %v7344_v49 = vld [vmem:[#allocation8 + $0xf14] sm:$0xf0] }
 0x169   :  { %v6807_v60 = vld [vmem:[#allocation8 + $0xf90] sm:$0xf]  ;;  %v7360_v51 = vld [vmem:[#allocation8 + $0xf94] sm:$0xf0]  ;;  %v809_v53 = vmax.f32 %v763_v56, 0.0  ;;  %v810_v59 = vmax.f32 %v776_v9, 0.0 }
 0x16a   :  { %4313 = vmatpush.bf16.msrb.mxu2 %v6776_v47  ;;  %4326 = vmatpush.bf16.msrb.mxu3 %v6840_v33  ;;  %v4073_v47 = vpop.f32.mrf.mxu3  ;;  %v7346_v33 = vld [vmem:[#allocation8 + $0xf24] sm:$0xf0]  ;;  %v4857_v56 = vld [vmem:[#allocation8 + $0x58] sm:$0xf0] }
 0x16b   :  { %v7898_v9 = vpack.c.bf16 %v810_v59, %v810_v59  ;;  %v4977_v59 = vld [vmem:[#allocation8 + $0x148] sm:$0xf0] }
 0x16c   :  { %4288 = vmatpush.bf16.msrb.mxu0 %v6640_v16  ;;  %4301 = vmatpush.bf16.msrb.mxu1 %v6704_v37  ;;  %v6624_v16 = vor.u32 %v7314_v35, %v6623_v8  ;;  %v6688_v37 = vor.u32 %v7330_v2, %v6687_v43  ;;  %v7310_v8 = vld [vmem:[#allocation8 + $0xe04] sm:$0xf0]  ;;  %v6671_v35 = vld [vmem:[#allocation8 + $0xe80] sm:$0xf]  ;;  %v6744_v43 = vor.u32 %v7344_v49, %v6743_v46  ;;  %v4062_v23 = vpop.f32.mrf.mxu2 }
 0x16d   :  { %v6808_v2 = vor.u32 %v7360_v51, %v6807_v60  ;;  %v4876_v46 = vor.u32 %v6875_v45, %v4873_v13  ;;  %v6873_v60 = vld [vmem:[#allocation8 + $0x64] sm:$0xf]  ;;  %v4865_v51 = vld [vmem:[#allocation8 + $0x68] sm:$0xf0]  ;;  %v6887_v45 = vld [vmem:[#allocation8 + $0xd4] sm:$0xf] }
 0x16e   :  { %4314 = vmatpush.bf16.msrb.mxu2 %v6768_v3  ;;  %4327 = vmatpush.bf16.msrb.mxu3 %v6832_v40  ;;  %v7886_v3 = vadd.f32 %v4073_v47, %v4061_v48  ;;  %v6752_v40 = vor.u32 %v7346_v33, %v6751_v32  ;;  %v6735_v32 = vld [vmem:[#allocation8 + $0xf00] sm:$0xf]  ;;  %v7342_v47 = vld [vmem:[#allocation8 + $0xf04] sm:$0xf0]  ;;  %v4921_v13 = vld [vmem:[#allocation8 + $0xd8] sm:$0xf0] }
 0x16f   :  { %v6799_v33 = vld [vmem:[#allocation8 + $0xf80] sm:$0xf]  ;;  %v7358_v48 = vld [vmem:[#allocation8 + $0xf84] sm:$0xf0]  ;;  %v6736_v55 = vor.u32 %v7342_v47, %v6735_v32  ;;  %v4868_v32 = vor.u32 %v6873_v60, %v4865_v51 }
 0x170   :  { %4289 = vmatpush.bf16.msrb.mxu0 %v6632_v52  ;;  %4302 = vmatpush.bf16.msrb.mxu1 %v6696_v15  ;;  %v6616_v52 = vor.u32 %v7312_v41, %v6615_v34  ;;  %v6680_v15 = vor.u32 %v7328_v18, %v6679_v17  ;;  %v6907_v34 = vld [vmem:[#allocation8 + $0x174] sm:$0xf]  ;;  %v5001_v41 = vld [vmem:[#allocation8 + $0x178] sm:$0xf0]  ;;  %v807_v17 = vmax.f32 %v737_v12, 0.0  ;;  %v6800_v10 = vor.u32 %v7358_v48, %v6799_v33 }
 0x171   :  { %v5004_v23 = vor.u32 %v6907_v34, %v5001_v41  ;;  %v6921_v12 = vld [vmem:[#allocation8 + $0x1e4] sm:$0xf]  ;;  %v6871_v33 = vld [vmem:[#allocation8 + $0x54] sm:$0xf]  ;;  %v4924_v41 = vor.u32 %v6887_v45, %v4921_v13 }
 0x172   :  { %4315 = vmatpush.bf16.msrb.mxu2 %v6760_v26  ;;  %4328 = vmatpush.bf16.msrb.mxu3 %v6824_v21  ;;  %v7326_v26 = vld [vmem:[#allocation8 + $0xe84] sm:$0xf0]  ;;  %v750_v21 = vadd.f32 %v7809_v7, %v147_v39  ;;  %v4075_v54 = vpop.f32.mrf.mxu3  ;;  %v6608_v7 = vor.u32 %v7310_v8, %v6607_v36  ;;  %v4929_v36 = vld [vmem:[#allocation8 + $0xe8] sm:$0xf0]  ;;  %v6905_v8 = vld [vmem:[#allocation8 + $0x164] sm:$0xf] }
 0x173   :  { %v6672_v39 = vor.u32 %v7326_v26, %v6671_v35  ;;  %v4993_v35 = vld [vmem:[#allocation8 + $0x168] sm:$0xf0]  ;;  %v6919_v34 = vld [vmem:[#allocation8 + $0x1d4] sm:$0xf] }
 0x174   :  { %4290 = vmatpush.bf16.msrb.mxu0 %v6624_v16  ;;  %4303 = vmatpush.bf16.msrb.mxu1 %v6688_v37  ;;  %v6891_v16 = vld [vmem:[#allocation8 + $0xf4] sm:$0xf]  ;;  %v4937_v37 = vld [vmem:[#allocation8 + $0xf8] sm:$0xf0]  ;;  %v808_v18 = vmax.f32 %v750_v21, 0.0  ;;  %v7892_v21 = vpack.c.bf16 %v807_v17, %v807_v17  ;;  %v4996_v54 = vor.u32 %v6905_v8, %v4993_v35 }
 0x175   :  { %v4940_v49 = vor.u32 %v6891_v16, %v4937_v37  ;;  %v5057_v26 = vld [vmem:[#allocation8 + $0x1e8] sm:$0xf0]  ;;  %v6903_v16 = vld [vmem:[#allocation8 + $0x154] sm:$0xf]  ;;  %v4985_v37 = vld [vmem:[#allocation8 + $0x158] sm:$0xf0] }
 0x176   :  { %4316 = vmatpush.bf16.msrb.mxu2 %v6752_v40  ;;  %4329 = vmatpush.bf16.msrb.mxu3 %v6816_v25  ;;  %v6923_v40 = vld [vmem:[#allocation8 + $0x1f4] sm:$0xf]  ;;  %v5065_v25 = vld [vmem:[#allocation8 + $0x1f8] sm:$0xf0]  ;;  %v5060_v48 = vor.u32 %v6921_v12, %v5057_v26  ;;  %v4988_v17 = vor.u32 %v6903_v16, %v4985_v37  ;;  %v4833_v16 = vld [vmem:[#allocation8 + $0x28] sm:$0xf0] }
 0x177   :  { %v4841_v8 = vld [vmem:[#allocation8 + $0x38] sm:$0xf0]  ;;  %v6883_v26 = vld [vmem:[#allocation8 + $0xb4] sm:$0xf] }
 0x178   :  { %4291 = vmatpush.bf16.msrb.mxu0 %v6616_v52  ;;  %4304 = vmatpush.bf16.msrb.mxu1 %v6680_v15  ;;  %v5068_v52 = vor.u32 %v6923_v40, %v5065_v25  ;;  %v6889_v15 = vld [vmem:[#allocation8 + $0xe4] sm:$0xf]  ;;  %v4849_v25 = vld [vmem:[#allocation8 + $0x48] sm:$0xf0] }
 0x179   :  { %v4932_v47 = vor.u32 %v6889_v15, %v4929_v36  ;;  %v6869_v40 = vld [vmem:[#allocation8 + $0x44] sm:$0xf]  ;;  %v6867_v36 = vld [vmem:[#allocation8 + $0x34] sm:$0xf] }
 0x17a   :  { %4317 = vmatpush.bf16.msrb.mxu2 %v6744_v43  ;;  %4330 = vmatpush.bf16.msrb.mxu3 %v6808_v2  ;;  %v7894_v43 = vpack.c.bf16 %v808_v18, %v808_v18  ;;  %v7896_v2 = vpack.c.bf16 %v809_v53, %v809_v53  ;;  %v6901_v53 = vld [vmem:[#allocation8 + $0x144] sm:$0xf]  ;;  %v4844_v45 = vor.u32 %v6867_v36, %v4841_v8  ;;  %v6879_v36 = vld [vmem:[#allocation8 + $0x94] sm:$0xf]  ;;  %v4889_v8 = vld [vmem:[#allocation8 + $0x98] sm:$0xf0] }
 0x17b   :  { %v4980_v35 = vor.u32 %v6901_v53, %v4977_v59 }
 0x17c   :  { %4292 = vmatpush.bf16.msrb.mxu0 %v6608_v7  ;;  %4305 = vmatpush.bf16.msrb.mxu1 %v6672_v39  ;;  %v5049_v7 = vld [vmem:[#allocation8 + $0x1d8] sm:$0xf0]  ;;  %v4860_v39 = vor.u32 %v6871_v33, %v4857_v56  ;;  %v4086_v60 = vpop.f32.mrf.mxu0  ;;  %v4099_v51 = vpop.f32.mrf.mxu1 }
 0x17d   :  { %v5052_v18 = vor.u32 %v6919_v34, %v5049_v7  ;;  %v4969_v56 = vld [vmem:[#allocation8 + $0x138] sm:$0xf0]  ;;  %v6881_v7 = vld [vmem:[#allocation8 + $0xa4] sm:$0xf] }
 0x17e   :  { %4318 = vmatpush.bf16.msrb.mxu2 %v6736_v55  ;;  %4331 = vmatpush.bf16.msrb.mxu3 %v6800_v10  ;;  %v6885_v55 = vld [vmem:[#allocation8 + $0xc4] sm:$0xf]  ;;  %v4913_v10 = vld [vmem:[#allocation8 + $0xc8] sm:$0xf0] }
 0x17f   :  { %4293 = vmatmul.bf16.vlgmr.msrb.gmra.mxu0 %v7892_v21  ;;  %4306 = vmatmul.bf16.vlgmr.msrb.gmra.mxu1 %v7894_v43  ;;  %v4916_v15 = vor.u32 %v6885_v55, %v4913_v10  ;;  %v5025_v55 = vld [vmem:[#allocation8 + $0x1a8] sm:$0xf0] }
 0x180   :  { %4337 = vmatpush.bf16.msra.mxu0 %v4876_v46  ;;  %4350 = vmatpush.bf16.msra.mxu1 %v4940_v49  ;;  %v6917_v46 = vld [vmem:[#allocation8 + $0x1c4] sm:$0xf]  ;;  %v5041_v49 = vld [vmem:[#allocation8 + $0x1c8] sm:$0xf0] }
 0x181   :  { %4319 = vmatmul.bf16.vlgmr.msrb.gmra.mxu2 %v7896_v2  ;;  %4332 = vmatmul.bf16.vlgmr.msrb.gmra.mxu3 %v7898_v9  ;;  %v5044_v12 = vor.u32 %v6917_v46, %v5041_v49 }
 0x182   :  { %4363 = vmatpush.bf16.msra.mxu2 %v5004_v23  ;;  %4376 = vmatpush.bf16.msra.mxu3 %v5068_v52  ;;  %v4087_v23 = vadd.f32 %v4086_v60, %v7886_v3  ;;  %v4852_v52 = vor.u32 %v6869_v40, %v4849_v25  ;;  %v6865_v3 = vld [vmem:[#allocation8 + $0x24] sm:$0xf]  ;;  %v6863_v60 = vld [vmem:[#allocation8 + $0x14] sm:$0xf] }
 0x183   :  { %v4836_v46 = vor.u32 %v6865_v3, %v4833_v16  ;;  %v6893_v16 = vld [vmem:[#allocation8 + $0x104] sm:$0xf] }
 0x184   :  { %4338 = vmatpush.bf16.msra.mxu0 %v4868_v32  ;;  %4351 = vmatpush.bf16.msra.mxu1 %v4932_v47  ;;  %v4905_v32 = vld [vmem:[#allocation8 + $0xb8] sm:$0xf0]  ;;  %v6899_v47 = vld [vmem:[#allocation8 + $0x134] sm:$0xf]  ;;  %v4100_v33 = vadd.f32 %v4099_v51, %v4087_v23  ;;  %v4112_v40 = vpop.f32.mrf.mxu2  ;;  %v4125_v25 = vpop.f32.mrf.mxu3 }
 0x185   :  { %v4908_v13 = vor.u32 %v6883_v26, %v4905_v32  ;;  %v4972_v37 = vor.u32 %v6899_v47, %v4969_v56  ;;  %v4088_v53 = vpop.f32.mrf.mxu0  ;;  %v4101_v59 = vpop.f32.mrf.mxu1  ;;  %v4825_v51 = vld [vmem:[#allocation8 + $0x18] sm:$0xf0]  ;;  %v6911_v26 = vld [vmem:[#allocation8 + $0x194] sm:$0xf]  ;;  %v6861_v47 = vld [vmem:[#allocation8 + $0x4] sm:$0xf]  ;;  %v4892_v56 = vor.u32 %v6879_v36, %v4889_v8 }
 0x186   :  { %4364 = vmatpush.bf16.msra.mxu2 %v4996_v54  ;;  %4377 = vmatpush.bf16.msra.mxu3 %v5060_v48  ;;  %v6915_v54 = vld [vmem:[#allocation8 + $0x1b4] sm:$0xf]  ;;  %v5033_v48 = vld [vmem:[#allocation8 + $0x1b8] sm:$0xf0]  ;;  %v4113_v10 = vadd.f32 %v4112_v40, %v4100_v33  ;;  %v4828_v33 = vor.u32 %v6863_v60, %v4825_v51  ;;  %v6937_v36 = vld [vmem:[#allocation8 + $0x264] sm:$0xf] }
 0x187   :  { %v5036_v34 = vor.u32 %v6915_v54, %v5033_v48  ;;  %v5017_v32 = vld [vmem:[#allocation8 + $0x198] sm:$0xf0]  ;;  %v4817_v54 = vld [vmem:[#allocation8 + $0x8] sm:$0xf0]  ;;  %v6877_v48 = vld [vmem:[#allocation8 + $0x84] sm:$0xf] }
 0x188   :  { %4339 = vmatpush.bf16.msra.mxu0 %v4860_v39  ;;  %4352 = vmatpush.bf16.msra.mxu1 %v4924_v41  ;;  %v4897_v39 = vld [vmem:[#allocation8 + $0xa8] sm:$0xf0]  ;;  %v6897_v41 = vld [vmem:[#allocation8 + $0x124] sm:$0xf]  ;;  %v7905_v23 = vadd.f32 %v4125_v25, %v4113_v10  ;;  %v5020_v3 = vor.u32 %v6911_v26, %v5017_v32  ;;  %v6939_v40 = vld [vmem:[#allocation8 + $0x274] sm:$0xf]  ;;  %v4820_v10 = vor.u32 %v6861_v47, %v4817_v54 }
 0x189   :  { %v4900_v49 = vor.u32 %v6881_v7, %v4897_v39  ;;  %v5129_v25 = vld [vmem:[#allocation8 + $0x278] sm:$0xf0]  ;;  %v5121_v8 = vld [vmem:[#allocation8 + $0x268] sm:$0xf0]  ;;  %v6953_v26 = vld [vmem:[#allocation8 + $0x2e4] sm:$0xf] }
 0x18a   :  { %4365 = vmatpush.bf16.msra.mxu2 %v4988_v17  ;;  %4378 = vmatpush.bf16.msra.mxu3 %v5052_v18  ;;  %v4961_v17 = vld [vmem:[#allocation8 + $0x128] sm:$0xf0]  ;;  %v6913_v18 = vld [vmem:[#allocation8 + $0x1a4] sm:$0xf]  ;;  %v5257_v59 = vld [vmem:[#allocation8 + $0x378] sm:$0xf0]  ;;  %v5124_v54 = vor.u32 %v6937_v36, %v5121_v8 }
 0x18b   :  { %v5185_v32 = vld [vmem:[#allocation8 + $0x2e8] sm:$0xf0]  ;;  %v6931_v8 = vld [vmem:[#allocation8 + $0x234] sm:$0xf] }
 0x18c   :  { %4340 = vmatpush.bf16.msra.mxu0 %v4852_v52  ;;  %4353 = vmatpush.bf16.msra.mxu1 %v4916_v15  ;;  %v4964_v52 = vor.u32 %v6897_v41, %v4961_v17  ;;  %v5028_v15 = vor.u32 %v6913_v18, %v5025_v55  ;;  %v4114_v7 = vpop.f32.mrf.mxu2  ;;  %v4127_v39 = vpop.f32.mrf.mxu3  ;;  %v5009_v41 = vld [vmem:[#allocation8 + $0x188] sm:$0xf0]  ;;  %v6955_v17 = vld [vmem:[#allocation8 + $0x2f4] sm:$0xf]  ;;  %v5193_v18 = vld [vmem:[#allocation8 + $0x2f8] sm:$0xf0] }
 0x18d   :  { %v6971_v55 = vld [vmem:[#allocation8 + $0x374] sm:$0xf]  ;;  %v6969_v7 = vld [vmem:[#allocation8 + $0x364] sm:$0xf]  ;;  %v5249_v47 = vld [vmem:[#allocation8 + $0x368] sm:$0xf0] }
 0x18e   :  { %4366 = vmatpush.bf16.msra.mxu2 %v4980_v35  ;;  %4379 = vmatpush.bf16.msra.mxu3 %v5044_v12  ;;  %v6895_v35 = vld [vmem:[#allocation8 + $0x114] sm:$0xf]  ;;  %v4953_v12 = vld [vmem:[#allocation8 + $0x118] sm:$0xf0] }
 0x18f   :  { %v6967_v39 = vld [vmem:[#allocation8 + $0x354] sm:$0xf] }
 0x190   :  { %4341 = vmatpush.bf16.msra.mxu0 %v4844_v45  ;;  %4354 = vmatpush.bf16.msra.mxu1 %v4908_v13  ;;  %v4881_v45 = vld [vmem:[#allocation8 + $0x88] sm:$0xf0]  ;;  %v4956_v13 = vor.u32 %v6895_v35, %v4953_v12  ;;  %v5260_v35 = vor.u32 %v6971_v55, %v5257_v59  ;;  %v6933_v55 = vld [vmem:[#allocation8 + $0x244] sm:$0xf] }
 0x191   :  { %v4884_v53 = vor.u32 %v6877_v48, %v4881_v45  ;;  %v5188_v48 = vor.u32 %v6953_v26, %v5185_v32  ;;  %v6935_v45 = vld [vmem:[#allocation8 + $0x254] sm:$0xf] }
 0x192   :  { %4367 = vmatpush.bf16.msra.mxu2 %v4972_v37  ;;  %4380 = vmatpush.bf16.msra.mxu3 %v5036_v34  ;;  %v4945_v37 = vld [vmem:[#allocation8 + $0x108] sm:$0xf0]  ;;  %v6909_v34 = vld [vmem:[#allocation8 + $0x184] sm:$0xf]  ;;  %v6947_v32 = vld [vmem:[#allocation8 + $0x2b4] sm:$0xf] }
 0x193   :  { %v4948_v60 = vor.u32 %v6893_v16, %v4945_v37  ;;  %v5012_v51 = vor.u32 %v6909_v34, %v5009_v41  ;;  %v6951_v37 = vld [vmem:[#allocation8 + $0x2d4] sm:$0xf]  ;;  %v5177_v34 = vld [vmem:[#allocation8 + $0x2d8] sm:$0xf0] }
 0x194   :  { %4342 = vmatpush.bf16.msra.mxu0 %v4836_v46  ;;  %4355 = vmatpush.bf16.msra.mxu1 %v4900_v49  ;;  %v6987_v46 = vld [vmem:[#allocation8 + $0x3f4] sm:$0xf]  ;;  %v5321_v49 = vld [vmem:[#allocation8 + $0x3f8] sm:$0xf0] }
 0x195   :  { %v5324_v12 = vor.u32 %v6987_v46, %v5321_v49  ;;  %v5241_v41 = vld [vmem:[#allocation8 + $0x358] sm:$0xf0]  ;;  %v5169_v46 = vld [vmem:[#allocation8 + $0x2c8] sm:$0xf0] }
 0x196   :  { %4368 = vmatpush.bf16.msra.mxu2 %v4964_v52  ;;  %4381 = vmatpush.bf16.msra.mxu3 %v5028_v15  ;;  %v5132_v52 = vor.u32 %v6939_v40, %v5129_v25  ;;  %v5196_v15 = vor.u32 %v6955_v17, %v5193_v18  ;;  %v6983_v40 = vld [vmem:[#allocation8 + $0x3d4] sm:$0xf]  ;;  %v5305_v25 = vld [vmem:[#allocation8 + $0x3d8] sm:$0xf0]  ;;  %v5180_v18 = vor.u32 %v6951_v37, %v5177_v34  ;;  %v5233_v49 = vld [vmem:[#allocation8 + $0x348] sm:$0xf0] }
 0x197   :  { %v5308_v59 = vor.u32 %v6983_v40, %v5305_v25  ;;  %v6945_v34 = vld [vmem:[#allocation8 + $0x2a4] sm:$0xf] }
 0x198   :  { %4343 = vmatpush.bf16.msra.mxu0 %v4828_v33  ;;  %4356 = vmatpush.bf16.msra.mxu1 %v4892_v56  ;;  %v6985_v33 = vld [vmem:[#allocation8 + $0x3e4] sm:$0xf]  ;;  %v5313_v56 = vld [vmem:[#allocation8 + $0x3e8] sm:$0xf0] }
 0x199   :  { %v5316_v16 = vor.u32 %v6985_v33, %v5313_v56  ;;  %v5225_v56 = vld [vmem:[#allocation8 + $0x338] sm:$0xf0] }
 0x19a   :  { %4369 = vmatpush.bf16.msra.mxu2 %v4956_v13  ;;  %4382 = vmatpush.bf16.msra.mxu3 %v5020_v3  ;;  %v5113_v13 = vld [vmem:[#allocation8 + $0x258] sm:$0xf0]  ;;  %v5252_v3 = vor.u32 %v6969_v7, %v5249_v47  ;;  %v6963_v47 = vld [vmem:[#allocation8 + $0x334] sm:$0xf] }
 0x19b   :  { %v5116_v17 = vor.u32 %v6935_v45, %v5113_v13  ;;  %v5161_v7 = vld [vmem:[#allocation8 + $0x2b8] sm:$0xf0] }
 0x19c   :  { %4344 = vmatpush.bf16.msra.mxu0 %v4820_v10  ;;  %4357 = vmatpush.bf16.msra.mxu1 %v4884_v53  ;;  %v5105_v10 = vld [vmem:[#allocation8 + $0x248] sm:$0xf0]  ;;  %v5244_v53 = vor.u32 %v6967_v39, %v5241_v41  ;;  %v5164_v13 = vor.u32 %v6947_v32, %v5161_v7  ;;  %v6961_v41 = vld [vmem:[#allocation8 + $0x324] sm:$0xf] }
 0x19d   :  { %v5153_v39 = vld [vmem:[#allocation8 + $0x2a8] sm:$0xf0] }
 0x19e   :  { %4370 = vmatpush.bf16.msra.mxu2 %v4948_v60  ;;  %4383 = vmatpush.bf16.msra.mxu3 %v5012_v51  ;;  %v6981_v60 = vld [vmem:[#allocation8 + $0x3c4] sm:$0xf]  ;;  %v5297_v51 = vld [vmem:[#allocation8 + $0x3c8] sm:$0xf0] }
 0x19f   :  { %4345 = vmatmul.bf16.vlgmr.msra.gmra.mxu0 %v7691_v61  ;;  %4358 = vmatmul.bf16.vlgmr.msra.gmra.mxu1 %v7693_v62  ;;  %v6949_v61 = vld [vmem:[#allocation8 + $0x2c4] sm:$0xf]  ;;  %v5300_v26 = vor.u32 %v6981_v60, %v5297_v51  ;;  %v5073_v7 = vld [vmem:[#allocation8 + $0x208] sm:$0xf0] }
 0x1a0   :  { %4389 = vmatpush.bf16.msrb.mxu0 %v5132_v52  ;;  %4402 = vmatpush.bf16.msrb.mxu1 %v5196_v15  ;;  %v6965_v62 = vld [vmem:[#allocation8 + $0x344] sm:$0xf]  ;;  %v4138_v52 = vpop.f32.mrf.mxu0  ;;  %v5108_v15 = vor.u32 %v6933_v55, %v5105_v10  ;;  %v5172_v36 = vor.u32 %v6949_v61, %v5169_v46  ;;  %v5281_v55 = vld [vmem:[#allocation8 + $0x3a8] sm:$0xf0]  ;;  %v5156_v46 = vor.u32 %v6945_v34, %v5153_v39  ;;  %v5385_v34 = vld [vmem:[#allocation8 + $0x478] sm:$0xf0] }
 0x1a1   :  { %4371 = vmatmul.bf16.vlgmr.msra.gmra.mxu2 %v7697_v27  ;;  %4384 = vmatmul.bf16.vlgmr.msra.gmra.mxu3 %v7699_v28  ;;  %v4151_v27 = vpop.f32.mrf.mxu1  ;;  %v4139_v28 = vadd.f32 %v4138_v52, %v7905_v23  ;;  %v6929_v23 = vld [vmem:[#allocation8 + $0x224] sm:$0xf]  ;;  %v7019_v39 = vld [vmem:[#allocation8 + $0x4f4] sm:$0xf] }
 0x1a2   :  { %4415 = vmatpush.bf16.msrb.mxu2 %v5260_v35  ;;  %4428 = vmatpush.bf16.msrb.mxu3 %v5324_v12  ;;  %v5097_v35 = vld [vmem:[#allocation8 + $0x238] sm:$0xf0]  ;;  %v5236_v12 = vor.u32 %v6965_v62, %v5233_v49  ;;  %v6927_v62 = vld [vmem:[#allocation8 + $0x214] sm:$0xf] }
 0x1a3   :  { %v4152_v33 = vadd.f32 %v4151_v27, %v4139_v28  ;;  %v5100_v45 = vor.u32 %v6931_v8, %v5097_v35  ;;  %v5081_v49 = vld [vmem:[#allocation8 + $0x218] sm:$0xf0]  ;;  %v6943_v27 = vld [vmem:[#allocation8 + $0x294] sm:$0xf] }
 0x1a4   :  { %4390 = vmatpush.bf16.msrb.mxu0 %v5124_v54  ;;  %4403 = vmatpush.bf16.msrb.mxu1 %v5188_v48  ;;  %v6979_v54 = vld [vmem:[#allocation8 + $0x3b4] sm:$0xf]  ;;  %v5289_v48 = vld [vmem:[#allocation8 + $0x3b8] sm:$0xf0]  ;;  %v4164_v40 = vpop.f32.mrf.mxu2  ;;  %v4177_v25 = vpop.f32.mrf.mxu3 }
 0x1a5   :  { %v5292_v37 = vor.u32 %v6979_v54, %v5289_v48  ;;  %v4165_v10 = vadd.f32 %v4164_v40, %v4152_v33  ;;  %v5145_v28 = vld [vmem:[#allocation8 + $0x298] sm:$0xf0]  ;;  %v6975_v8 = vld [vmem:[#allocation8 + $0x394] sm:$0xf]  ;;  %v5137_v33 = vld [vmem:[#allocation8 + $0x288] sm:$0xf0] }
 0x1a6   :  { %4416 = vmatpush.bf16.msrb.mxu2 %v5252_v3  ;;  %4429 = vmatpush.bf16.msrb.mxu3 %v5316_v16  ;;  %v5089_v3 = vld [vmem:[#allocation8 + $0x228] sm:$0xf0]  ;;  %v5228_v16 = vor.u32 %v6963_v47, %v5225_v56  ;;  %v5273_v35 = vld [vmem:[#allocation8 + $0x398] sm:$0xf0]  ;;  %v5148_v32 = vor.u32 %v6943_v27, %v5145_v28  ;;  %v6941_v47 = vld [vmem:[#allocation8 + $0x284] sm:$0xf] }
 0x1a7   :  { %v5092_v61 = vor.u32 %v6929_v23, %v5089_v3  ;;  %v7912_v60 = vadd.f32 %v4177_v25, %v4165_v10  ;;  %v5276_v54 = vor.u32 %v6975_v8, %v5273_v35  ;;  %v6957_v48 = vld [vmem:[#allocation8 + $0x304] sm:$0xf]  ;;  %v7035_v40 = vld [vmem:[#allocation8 + $0x574] sm:$0xf]  ;;  %v5577_v10 = vld [vmem:[#allocation8 + $0x5f8] sm:$0xf0] }
 0x1a8   :  { %4391 = vmatpush.bf16.msrb.mxu0 %v5116_v17  ;;  %4404 = vmatpush.bf16.msrb.mxu1 %v5180_v18  ;;  %v5217_v17 = vld [vmem:[#allocation8 + $0x328] sm:$0xf0]  ;;  %v6977_v18 = vld [vmem:[#allocation8 + $0x3a4] sm:$0xf] }
 0x1a9   :  { %v5220_v51 = vor.u32 %v6961_v41, %v5217_v17  ;;  %v5284_v52 = vor.u32 %v6977_v18, %v5281_v55  ;;  %v5449_v41 = vld [vmem:[#allocation8 + $0x4f8] sm:$0xf0]  ;;  %v5140_v17 = vor.u32 %v6941_v47, %v5137_v33  ;;  %v7051_v55 = vld [vmem:[#allocation8 + $0x5f4] sm:$0xf]  ;;  %v7017_v27 = vld [vmem:[#allocation8 + $0x4e4] sm:$0xf] }
 0x1aa   :  { %4417 = vmatpush.bf16.msrb.mxu2 %v5244_v53  ;;  %4430 = vmatpush.bf16.msrb.mxu3 %v5308_v59  ;;  %v4140_v53 = vpop.f32.mrf.mxu0  ;;  %v4153_v59 = vpop.f32.mrf.mxu1  ;;  %v5513_v18 = vld [vmem:[#allocation8 + $0x578] sm:$0xf0]  ;;  %v5441_v28 = vld [vmem:[#allocation8 + $0x4e8] sm:$0xf0]  ;;  %v7049_v8 = vld [vmem:[#allocation8 + $0x5e4] sm:$0xf] }
 0x1ab   :  { %v5569_v35 = vld [vmem:[#allocation8 + $0x5e8] sm:$0xf0] }
 0x1ac   :  { %4392 = vmatpush.bf16.msrb.mxu0 %v5108_v15  ;;  %4405 = vmatpush.bf16.msrb.mxu1 %v5172_v36  ;;  %v6959_v15 = vld [vmem:[#allocation8 + $0x314] sm:$0xf]  ;;  %v5209_v36 = vld [vmem:[#allocation8 + $0x318] sm:$0xf0]  ;;  %v4166_v23 = vpop.f32.mrf.mxu2  ;;  %v4179_v3 = vpop.f32.mrf.mxu3  ;;  %v5572_v33 = vor.u32 %v7049_v8, %v5569_v35 }
 0x1ad   :  { %v5212_v56 = vor.u32 %v6959_v15, %v5209_v36  ;;  %v7033_v15 = vld [vmem:[#allocation8 + $0x564] sm:$0xf]  ;;  %v5505_v36 = vld [vmem:[#allocation8 + $0x568] sm:$0xf0]  ;;  %v5561_v23 = vld [vmem:[#allocation8 + $0x5d8] sm:$0xf0] }
 0x1ae   :  { %4418 = vmatpush.bf16.msrb.mxu2 %v5236_v12  ;;  %4431 = vmatpush.bf16.msrb.mxu3 %v5300_v26  ;;  %v6925_v12 = vld [vmem:[#allocation8 + $0x204] sm:$0xf]  ;;  %v5084_v26 = vor.u32 %v6927_v62, %v5081_v49  ;;  %v5377_v49 = vld [vmem:[#allocation8 + $0x468] sm:$0xf0]  ;;  %v5508_v47 = vor.u32 %v7033_v15, %v5505_v36  ;;  %v7043_v15 = vld [vmem:[#allocation8 + $0x5b4] sm:$0xf] }
 0x1af   :  { %v5076_v25 = vor.u32 %v6925_v12, %v5073_v7  ;;  %v7001_v62 = vld [vmem:[#allocation8 + $0x464] sm:$0xf]  ;;  %v5369_v7 = vld [vmem:[#allocation8 + $0x458] sm:$0xf0] }
 0x1b0   :  { %4393 = vmatpush.bf16.msrb.mxu0 %v5100_v45  ;;  %4406 = vmatpush.bf16.msrb.mxu1 %v5164_v13  ;;  %v5201_v45 = vld [vmem:[#allocation8 + $0x308] sm:$0xf0]  ;;  %v6973_v13 = vld [vmem:[#allocation8 + $0x384] sm:$0xf]  ;;  %v5380_v12 = vor.u32 %v7001_v62, %v5377_v49  ;;  %v7011_v49 = vld [vmem:[#allocation8 + $0x4b4] sm:$0xf] }
 0x1b1   :  { %v5204_v53 = vor.u32 %v6957_v48, %v5201_v45  ;;  %v7031_v48 = vld [vmem:[#allocation8 + $0x554] sm:$0xf]  ;;  %v5497_v45 = vld [vmem:[#allocation8 + $0x558] sm:$0xf0] }
 0x1b2   :  { %4419 = vmatpush.bf16.msrb.mxu2 %v5228_v16  ;;  %4432 = vmatpush.bf16.msrb.mxu3 %v5292_v37  ;;  %v5265_v16 = vld [vmem:[#allocation8 + $0x388] sm:$0xf0]  ;;  %v7003_v37 = vld [vmem:[#allocation8 + $0x474] sm:$0xf]  ;;  %v5545_v36 = vld [vmem:[#allocation8 + $0x5b8] sm:$0xf0] }
 0x1b3   :  { %v5268_v59 = vor.u32 %v6973_v13, %v5265_v16  ;;  %v7047_v13 = vld [vmem:[#allocation8 + $0x5d4] sm:$0xf] }
 0x1b4   :  { %4394 = vmatpush.bf16.msrb.mxu0 %v5092_v61  ;;  %4407 = vmatpush.bf16.msrb.mxu1 %v5156_v46  ;;  %v5388_v61 = vor.u32 %v7003_v37, %v5385_v34  ;;  %v5452_v46 = vor.u32 %v7019_v39, %v5449_v41  ;;  %v6997_v37 = vld [vmem:[#allocation8 + $0x444] sm:$0xf]  ;;  %v5361_v34 = vld [vmem:[#allocation8 + $0x448] sm:$0xf0]  ;;  %v5500_v39 = vor.u32 %v7031_v48, %v5497_v45 }
 0x1b5   :  { %v5564_v41 = vor.u32 %v7047_v13, %v5561_v23  ;;  %v5473_v48 = vld [vmem:[#allocation8 + $0x528] sm:$0xf0]  ;;  %v7041_v45 = vld [vmem:[#allocation8 + $0x5a4] sm:$0xf] }
 0x1b6   :  { %4420 = vmatpush.bf16.msrb.mxu2 %v5220_v51  ;;  %4433 = vmatpush.bf16.msrb.mxu3 %v5284_v52  ;;  %v5516_v51 = vor.u32 %v7035_v40, %v5513_v18  ;;  %v5580_v52 = vor.u32 %v7051_v55, %v5577_v10  ;;  %v5425_v40 = vld [vmem:[#allocation8 + $0x4c8] sm:$0xf0]  ;;  %v5364_v10 = vor.u32 %v6997_v37, %v5361_v34 }
 0x1b7   :  { %v5553_v18 = vld [vmem:[#allocation8 + $0x5c8] sm:$0xf0] }
 0x1b8   :  { %4395 = vmatpush.bf16.msrb.mxu0 %v5084_v26  ;;  %4408 = vmatpush.bf16.msrb.mxu1 %v5148_v32  ;;  %v5444_v26 = vor.u32 %v7017_v27, %v5441_v28  ;;  %v6999_v32 = vld [vmem:[#allocation8 + $0x454] sm:$0xf]  ;;  %v5481_v28 = vld [vmem:[#allocation8 + $0x538] sm:$0xf0]  ;;  %v5537_v13 = vld [vmem:[#allocation8 + $0x5a8] sm:$0xf0] }
 0x1b9   :  { %v5372_v3 = vor.u32 %v6999_v32, %v5369_v7  ;;  %v5548_v32 = vor.u32 %v7043_v15, %v5545_v36  ;;  %v7009_v7 = vld [vmem:[#allocation8 + $0x4a4] sm:$0xf] }
 0x1ba   :  { %4421 = vmatpush.bf16.msrb.mxu2 %v5212_v56  ;;  %4434 = vmatpush.bf16.msrb.mxu3 %v5276_v54  ;;  %v7015_v56 = vld [vmem:[#allocation8 + $0x4d4] sm:$0xf]  ;;  %v5433_v54 = vld [vmem:[#allocation8 + $0x4d8] sm:$0xf0] }
 0x1bb   :  { %v5436_v16 = vor.u32 %v7015_v56, %v5433_v54 }
 0x1bc   :  { %4396 = vmatpush.bf16.msrb.mxu0 %v5076_v25  ;;  %4409 = vmatpush.bf16.msrb.mxu1 %v5140_v17  ;;  %v5489_v25 = vld [vmem:[#allocation8 + $0x548] sm:$0xf0]  ;;  %v7045_v17 = vld [vmem:[#allocation8 + $0x5c4] sm:$0xf]  ;;  %v4190_v55 = vpop.f32.mrf.mxu0 }
 0x1bd   :  { %v5556_v62 = vor.u32 %v7045_v17, %v5553_v18  ;;  %v5401_v17 = vld [vmem:[#allocation8 + $0x498] sm:$0xf0]  ;;  %v7023_v18 = vld [vmem:[#allocation8 + $0x514] sm:$0xf] }
 0x1be   :  { %4422 = vmatpush.bf16.msrb.mxu2 %v5204_v53  ;;  %4435 = vmatpush.bf16.msrb.mxu3 %v5268_v59  ;;  %v6995_v59 = vld [vmem:[#allocation8 + $0x434] sm:$0xf] }
 0x1bf   :  { %4397 = vmatmul.bf16.vlgmr.msrb.gmra.mxu0 %v7713_v0  ;;  %4410 = vmatmul.bf16.vlgmr.msrb.gmra.mxu1 %v7715_v1  ;;  %v7013_v0 = vld [vmem:[#allocation8 + $0x4c4] sm:$0xf] }
 0x1c0   :  { %4441 = vmatpush.bf16.msra.mxu0 %v5388_v61  ;;  %4454 = vmatpush.bf16.msra.mxu1 %v5452_v46  ;;  %v7029_v1 = vld [vmem:[#allocation8 + $0x544] sm:$0xf]  ;;  %v5428_v53 = vor.u32 %v7013_v0, %v5425_v40  ;;  %v5353_v61 = vld [vmem:[#allocation8 + $0x438] sm:$0xf0] }
 0x1c1   :  { %4423 = vmatmul.bf16.vlgmr.msrb.gmra.mxu2 %v7717_v5  ;;  %4436 = vmatmul.bf16.vlgmr.msrb.gmra.mxu3 %v7707_v58  ;;  %v4203_v5 = vpop.f32.mrf.mxu1  ;;  %v4191_v58 = vadd.f32 %v4190_v55, %v7912_v60  ;;  %v5492_v46 = vor.u32 %v7029_v1, %v5489_v25  ;;  %v5356_v8 = vor.u32 %v6995_v59, %v5353_v61  ;;  %v6993_v60 = vld [vmem:[#allocation8 + $0x424] sm:$0xf]  ;;  %v7007_v25 = vld [vmem:[#allocation8 + $0x494] sm:$0xf]  ;;  %v5465_v55 = vld [vmem:[#allocation8 + $0x518] sm:$0xf0] }
 0x1c2   :  { %4467 = vmatpush.bf16.msra.mxu2 %v5516_v51  ;;  %4480 = vmatpush.bf16.msra.mxu3 %v5580_v52  ;;  %v5417_v51 = vld [vmem:[#allocation8 + $0x4b8] sm:$0xf0]  ;;  %v7027_v52 = vld [vmem:[#allocation8 + $0x534] sm:$0xf]  ;;  %v5540_v1 = vor.u32 %v7041_v45, %v5537_v13  ;;  %v5404_v59 = vor.u32 %v7007_v25, %v5401_v17  ;;  %v5329_v61 = vld [vmem:[#allocation8 + $0x408] sm:$0xf0] }
 0x1c3   :  { %v4204_v27 = vadd.f32 %v4203_v5, %v4191_v58  ;;  %v5420_v35 = vor.u32 %v7011_v49, %v5417_v51  ;;  %v7039_v5 = vld [vmem:[#allocation8 + $0x594] sm:$0xf]  ;;  %v5529_v58 = vld [vmem:[#allocation8 + $0x598] sm:$0xf0]  ;;  %v5468_v49 = vor.u32 %v7023_v18, %v5465_v55  ;;  %v7113_v25 = vld [vmem:[#allocation8 + $0x7e4] sm:$0xf] }
 0x1c4   :  { %4442 = vmatpush.bf16.msra.mxu0 %v5380_v12  ;;  %4455 = vmatpush.bf16.msra.mxu1 %v5444_v26  ;;  %v5345_v12 = vld [vmem:[#allocation8 + $0x428] sm:$0xf0]  ;;  %v5484_v26 = vor.u32 %v7027_v52, %v5481_v28  ;;  %v4216_v56 = vpop.f32.mrf.mxu2  ;;  %v4229_v54 = vpop.f32.mrf.mxu3  ;;  %v5532_v51 = vor.u32 %v7039_v5, %v5529_v58  ;;  %v7021_v52 = vld [vmem:[#allocation8 + $0x504] sm:$0xf]  ;;  %v7063_v5 = vld [vmem:[#allocation8 + $0x654] sm:$0xf] }
 0x1c5   :  { %v4217_v23 = vadd.f32 %v4216_v56, %v4204_v27  ;;  %v5348_v37 = vor.u32 %v6993_v60, %v5345_v12  ;;  %v5457_v27 = vld [vmem:[#allocation8 + $0x508] sm:$0xf0]  ;;  %v7037_v28 = vld [vmem:[#allocation8 + $0x584] sm:$0xf]  ;;  %v5641_v60 = vld [vmem:[#allocation8 + $0x678] sm:$0xf0] }
 0x1c6   :  { %4468 = vmatpush.bf16.msra.mxu2 %v5508_v47  ;;  %4481 = vmatpush.bf16.msra.mxu3 %v5572_v33  ;;  %v5409_v47 = vld [vmem:[#allocation8 + $0x4a8] sm:$0xf0]  ;;  %v7025_v33 = vld [vmem:[#allocation8 + $0x524] sm:$0xf]  ;;  %v7083_v12 = vld [vmem:[#allocation8 + $0x6f4] sm:$0xf] }
 0x1c7   :  { %v5412_v34 = vor.u32 %v7009_v7, %v5409_v47  ;;  %v7919_v0 = vadd.f32 %v4229_v54, %v4217_v23  ;;  %v5476_v40 = vor.u32 %v7025_v33, %v5473_v48  ;;  %v5769_v33 = vld [vmem:[#allocation8 + $0x778] sm:$0xf0]  ;;  %v7115_v56 = vld [vmem:[#allocation8 + $0x7f4] sm:$0xf]  ;;  %v5460_v48 = vor.u32 %v7021_v52, %v5457_v27  ;;  %v5825_v17 = vld [vmem:[#allocation8 + $0x7e8] sm:$0xf0] }
 0x1c8   :  { %4443 = vmatpush.bf16.msra.mxu0 %v5372_v3  ;;  %4456 = vmatpush.bf16.msra.mxu1 %v5436_v16  ;;  %v4192_v3 = vpop.f32.mrf.mxu0  ;;  %v5833_v54 = vld [vmem:[#allocation8 + $0x7f8] sm:$0xf0] }
 0x1c9   :  { %v4205_v16 = vpop.f32.mrf.mxu1  ;;  %v7065_v3 = vld [vmem:[#allocation8 + $0x664] sm:$0xf]  ;;  %v5625_v58 = vld [vmem:[#allocation8 + $0x658] sm:$0xf0] }
 0x1ca   :  { %4469 = vmatpush.bf16.msra.mxu2 %v5500_v39  ;;  %4482 = vmatpush.bf16.msra.mxu3 %v5564_v41  ;;  %v6991_v39 = vld [vmem:[#allocation8 + $0x414] sm:$0xf]  ;;  %v5337_v41 = vld [vmem:[#allocation8 + $0x418] sm:$0xf0]  ;;  %v5633_v16 = vld [vmem:[#allocation8 + $0x668] sm:$0xf0]  ;;  %v5628_v52 = vor.u32 %v7063_v5, %v5625_v58 }
 0x1cb   :  { %v5636_v18 = vor.u32 %v7065_v3, %v5633_v16  ;;  %v5737_v16 = vld [vmem:[#allocation8 + $0x738] sm:$0xf0] }
 0x1cc   :  { %4444 = vmatpush.bf16.msra.mxu0 %v5364_v10  ;;  %4457 = vmatpush.bf16.msra.mxu1 %v5428_v53  ;;  %v6989_v10 = vld [vmem:[#allocation8 + $0x404] sm:$0xf]  ;;  %v5340_v53 = vor.u32 %v6991_v39, %v5337_v41  ;;  %v4218_v15 = vpop.f32.mrf.mxu2  ;;  %v4231_v36 = vpop.f32.mrf.mxu3  ;;  %v5697_v41 = vld [vmem:[#allocation8 + $0x6e8] sm:$0xf0] }
 0x1cd   :  { %v5332_v7 = vor.u32 %v6989_v10, %v5329_v61  ;;  %v7081_v39 = vld [vmem:[#allocation8 + $0x6e4] sm:$0xf]  ;;  %v5689_v61 = vld [vmem:[#allocation8 + $0x6d8] sm:$0xf0]  ;;  %v5617_v15 = vld [vmem:[#allocation8 + $0x648] sm:$0xf0] }
 0x1ce   :  { %4470 = vmatpush.bf16.msra.mxu2 %v5492_v46  ;;  %4483 = vmatpush.bf16.msra.mxu3 %v5556_v62  ;;  %v7005_v46 = vld [vmem:[#allocation8 + $0x484] sm:$0xf]  ;;  %v5393_v62 = vld [vmem:[#allocation8 + $0x488] sm:$0xf0]  ;;  %v5700_v55 = vor.u32 %v7081_v39, %v5697_v41 }
 0x1cf   :  { %v5396_v47 = vor.u32 %v7005_v46, %v5393_v62  ;;  %v7095_v46 = vld [vmem:[#allocation8 + $0x754] sm:$0xf]  ;;  %v5753_v62 = vld [vmem:[#allocation8 + $0x758] sm:$0xf0] }
 0x1d0   :  { %4445 = vmatpush.bf16.msra.mxu0 %v5356_v8  ;;  %4458 = vmatpush.bf16.msra.mxu1 %v5420_v35  ;;  %v5521_v8 = vld [vmem:[#allocation8 + $0x588] sm:$0xf0]  ;;  %v7067_v35 = vld [vmem:[#allocation8 + $0x674] sm:$0xf]  ;;  %v5756_v36 = vor.u32 %v7095_v46, %v5753_v62 }
 0x1d1   :  { %v5524_v45 = vor.u32 %v7037_v28, %v5521_v8  ;;  %v5644_v13 = vor.u32 %v7067_v35, %v5641_v60  ;;  %v7061_v28 = vld [vmem:[#allocation8 + $0x644] sm:$0xf]  ;;  %v5681_v35 = vld [vmem:[#allocation8 + $0x6c8] sm:$0xf0] }
 0x1d2   :  { %4471 = vmatpush.bf16.msra.mxu2 %v5484_v26  ;;  %4484 = vmatpush.bf16.msra.mxu3 %v5548_v32  ;;  %v5705_v26 = vld [vmem:[#allocation8 + $0x6f8] sm:$0xf0]  ;;  %v7099_v32 = vld [vmem:[#allocation8 + $0x774] sm:$0xf]  ;;  %v5745_v60 = vld [vmem:[#allocation8 + $0x748] sm:$0xf0] }
 0x1d3   :  { %v5708_v23 = vor.u32 %v7083_v12, %v5705_v26  ;;  %v7109_v12 = vld [vmem:[#allocation8 + $0x7c4] sm:$0xf]  ;;  %v5809_v26 = vld [vmem:[#allocation8 + $0x7c8] sm:$0xf0] }
 0x1d4   :  { %4446 = vmatpush.bf16.msra.mxu0 %v5348_v37  ;;  %4459 = vmatpush.bf16.msra.mxu1 %v5412_v34  ;;  %v5772_v37 = vor.u32 %v7099_v32, %v5769_v33  ;;  %v5836_v34 = vor.u32 %v7115_v56, %v5833_v54  ;;  %v7059_v33 = vld [vmem:[#allocation8 + $0x634] sm:$0xf]  ;;  %v5609_v56 = vld [vmem:[#allocation8 + $0x638] sm:$0xf0] }
 0x1d5   :  { %v5612_v39 = vor.u32 %v7059_v33, %v5609_v56 }
 0x1d6   :  { %4472 = vmatpush.bf16.msra.mxu2 %v5476_v40  ;;  %4485 = vmatpush.bf16.msra.mxu3 %v5540_v1  ;;  %v7097_v40 = vld [vmem:[#allocation8 + $0x764] sm:$0xf]  ;;  %v5761_v1 = vld [vmem:[#allocation8 + $0x768] sm:$0xf0] }
 0x1d7   :  { %v5764_v10 = vor.u32 %v7097_v40, %v5761_v1  ;;  %v5601_v40 = vld [vmem:[#allocation8 + $0x628] sm:$0xf0] }
 0x1d8   :  { %4447 = vmatpush.bf16.msra.mxu0 %v5340_v53  ;;  %4460 = vmatpush.bf16.msra.mxu1 %v5404_v59  ;;  %v5828_v53 = vor.u32 %v7113_v25, %v5825_v17  ;;  %v7079_v59 = vld [vmem:[#allocation8 + $0x6d4] sm:$0xf]  ;;  %v7073_v17 = vld [vmem:[#allocation8 + $0x6a4] sm:$0xf] }
 0x1d9   :  { %v5692_v27 = vor.u32 %v7079_v59, %v5689_v61  ;;  %v5793_v59 = vld [vmem:[#allocation8 + $0x7a8] sm:$0xf0] }
 0x1da   :  { %4473 = vmatpush.bf16.msra.mxu2 %v5468_v49  ;;  %4486 = vmatpush.bf16.msra.mxu3 %v5532_v51  ;;  %v7111_v49 = vld [vmem:[#allocation8 + $0x7d4] sm:$0xf]  ;;  %v5817_v51 = vld [vmem:[#allocation8 + $0x7d8] sm:$0xf0] }
 0x1db   :  { %v5820_v8 = vor.u32 %v7111_v49, %v5817_v51 }
 0x1dc   :  { %4448 = vmatpush.bf16.msra.mxu0 %v5332_v7  ;;  %4461 = vmatpush.bf16.msra.mxu1 %v5396_v47  ;;  %v4242_v32 = vpop.f32.mrf.mxu0  ;;  %v5620_v7 = vor.u32 %v7061_v28, %v5617_v15 }
 0x1de   :  { %4474 = vmatpush.bf16.msra.mxu2 %v5460_v48  ;;  %4487 = vmatpush.bf16.msra.mxu3 %v5524_v45  ;;  %v5812_v48 = vor.u32 %v7109_v12, %v5809_v26  ;;  %v7075_v45 = vld [vmem:[#allocation8 + $0x6b4] sm:$0xf]  ;;  %v5785_v12 = vld [vmem:[#allocation8 + $0x798] sm:$0xf0]  ;;  %v7053_v26 = vld [vmem:[#allocation8 + $0x604] sm:$0xf] }
 0x1df   :  { %4449 = vmatmul.bf16.vlgmr.msra.gmra.mxu0 %v7745_v19  ;;  %4462 = vmatmul.bf16.vlgmr.msra.gmra.mxu1 %v7747_v20  ;;  %v7077_v19 = vld [vmem:[#allocation8 + $0x6c4] sm:$0xf] }
 0x1e0   :  { %4493 = vmatpush.bf16.msrb.mxu0 %v5644_v13  ;;  %4506 = vmatpush.bf16.msrb.mxu1 %v5708_v23  ;;  %v7093_v20 = vld [vmem:[#allocation8 + $0x744] sm:$0xf]  ;;  %v5684_v47 = vor.u32 %v7077_v19, %v5681_v35  ;;  %v5673_v13 = vld [vmem:[#allocation8 + $0x6b8] sm:$0xf0]  ;;  %v7091_v23 = vld [vmem:[#allocation8 + $0x734] sm:$0xf] }
 0x1e1   :  { %4475 = vmatmul.bf16.vlgmr.msra.gmra.mxu2 %v7749_v29  ;;  %4488 = vmatmul.bf16.vlgmr.msra.gmra.mxu3 %v7751_v30  ;;  %v4255_v29 = vpop.f32.mrf.mxu1  ;;  %v4243_v30 = vadd.f32 %v4242_v32, %v7919_v0  ;;  %v5748_v54 = vor.u32 %v7093_v20, %v5745_v60  ;;  %v5676_v41 = vor.u32 %v7075_v45, %v5673_v13  ;;  %v7057_v0 = vld [vmem:[#allocation8 + $0x624] sm:$0xf]  ;;  %v5657_v19 = vld [vmem:[#allocation8 + $0x698] sm:$0xf0]  ;;  %v7087_v35 = vld [vmem:[#allocation8 + $0x714] sm:$0xf] }
 0x1e2   :  { %4519 = vmatpush.bf16.msrb.mxu2 %v5772_v37  ;;  %4532 = vmatpush.bf16.msrb.mxu3 %v5836_v34  ;;  %v7107_v37 = vld [vmem:[#allocation8 + $0x7b4] sm:$0xf]  ;;  %v5801_v34 = vld [vmem:[#allocation8 + $0x7b8] sm:$0xf0]  ;;  %v5740_v1 = vor.u32 %v7091_v23, %v5737_v16  ;;  %v5604_v49 = vor.u32 %v7057_v0, %v5601_v40  ;;  %v7101_v45 = vld [vmem:[#allocation8 + $0x784] sm:$0xf] }
 0x1e3   :  { %v4256_v3 = vadd.f32 %v4255_v29, %v4243_v30  ;;  %v5804_v25 = vor.u32 %v7107_v37, %v5801_v34  ;;  %v5721_v20 = vld [vmem:[#allocation8 + $0x718] sm:$0xf0]  ;;  %v7103_v60 = vld [vmem:[#allocation8 + $0x794] sm:$0xf]  ;;  %v5585_v30 = vld [vmem:[#allocation8 + $0x608] sm:$0xf0] }
 0x1e4   :  { %4494 = vmatpush.bf16.msrb.mxu0 %v5636_v18  ;;  %4507 = vmatpush.bf16.msrb.mxu1 %v5700_v55  ;;  %v5665_v18 = vld [vmem:[#allocation8 + $0x6a8] sm:$0xf0]  ;;  %v7089_v55 = vld [vmem:[#allocation8 + $0x724] sm:$0xf]  ;;  %v4268_v5 = vpop.f32.mrf.mxu2  ;;  %v4281_v58 = vpop.f32.mrf.mxu3  ;;  %v5724_v33 = vor.u32 %v7087_v35, %v5721_v20  ;;  %v5788_v56 = vor.u32 %v7103_v60, %v5785_v12  ;;  %v7131_v16 = vld [vmem:[#allocation8 + $0x874] sm:$0xf]  ;;  %v5588_v0 = vor.u32 %v7053_v26, %v5585_v30 }
 0x1e5   :  { %v4269_v61 = vadd.f32 %v4268_v5, %v4256_v3  ;;  %v4244_v46 = vpop.f32.mrf.mxu0  ;;  %v5668_v51 = vor.u32 %v7073_v17, %v5665_v18  ;;  %v5777_v3 = vld [vmem:[#allocation8 + $0x788] sm:$0xf0]  ;;  %v5897_v37 = vld [vmem:[#allocation8 + $0x878] sm:$0xf0]  ;;  %v7147_v34 = vld [vmem:[#allocation8 + $0x8f4] sm:$0xf] }
 0x1e6   :  { %4520 = vmatpush.bf16.msrb.mxu2 %v5764_v10  ;;  %4533 = vmatpush.bf16.msrb.mxu3 %v5828_v53  ;;  %v5729_v10 = vld [vmem:[#allocation8 + $0x728] sm:$0xf0]  ;;  %v7105_v53 = vld [vmem:[#allocation8 + $0x7a4] sm:$0xf]  ;;  %v6089_v17 = vld [vmem:[#allocation8 + $0x9f8] sm:$0xf0]  ;;  %v5900_v5 = vor.u32 %v7131_v16, %v5897_v37 }
 0x1e7   :  { %v7926_v28 = vadd.f32 %v4281_v58, %v4269_v61  ;;  %v5732_v15 = vor.u32 %v7089_v55, %v5729_v10  ;;  %v5780_v55 = vor.u32 %v7101_v45, %v5777_v3  ;;  %v7129_v10 = vld [vmem:[#allocation8 + $0x864] sm:$0xf]  ;;  %v7143_v60 = vld [vmem:[#allocation8 + $0x8d4] sm:$0xf]  ;;  %v5945_v12 = vld [vmem:[#allocation8 + $0x8d8] sm:$0xf0] }
 0x1e8   :  { %4495 = vmatpush.bf16.msrb.mxu0 %v5628_v52  ;;  %4508 = vmatpush.bf16.msrb.mxu1 %v5692_v27  ;;  %v7055_v52 = vld [vmem:[#allocation8 + $0x614] sm:$0xf]  ;;  %v5593_v27 = vld [vmem:[#allocation8 + $0x618] sm:$0xf0]  ;;  %v7145_v46 = vld [vmem:[#allocation8 + $0x8e4] sm:$0xf] }
 0x1e9   :  { %v4257_v62 = vpop.f32.mrf.mxu1  ;;  %v5596_v32 = vor.u32 %v7055_v52, %v5593_v27  ;;  %v7177_v52 = vld [vmem:[#allocation8 + $0x9e4] sm:$0xf]  ;;  %v6081_v27 = vld [vmem:[#allocation8 + $0x9e8] sm:$0xf0]  ;;  %v7159_v26 = vld [vmem:[#allocation8 + $0x954] sm:$0xf] }
 0x1ea   :  { %4521 = vmatpush.bf16.msrb.mxu2 %v5756_v36  ;;  %4534 = vmatpush.bf16.msrb.mxu3 %v5820_v8  ;;  %v5796_v36 = vor.u32 %v7105_v53, %v5793_v59  ;;  %v7071_v8 = vld [vmem:[#allocation8 + $0x694] sm:$0xf]  ;;  %v5889_v53 = vld [vmem:[#allocation8 + $0x868] sm:$0xf0]  ;;  %v6084_v20 = vor.u32 %v7177_v52, %v6081_v27  ;;  %v6073_v30 = vld [vmem:[#allocation8 + $0x9d8] sm:$0xf0] }
 0x1eb   :  { %v5660_v29 = vor.u32 %v7071_v8, %v5657_v19  ;;  %v5953_v62 = vld [vmem:[#allocation8 + $0x8e8] sm:$0xf0]  ;;  %v7127_v8 = vld [vmem:[#allocation8 + $0x854] sm:$0xf]  ;;  %v5881_v19 = vld [vmem:[#allocation8 + $0x858] sm:$0xf0] }
 0x1ec   :  { %4496 = vmatpush.bf16.msrb.mxu0 %v5620_v7  ;;  %4509 = vmatpush.bf16.msrb.mxu1 %v5684_v47  ;;  %v7069_v7 = vld [vmem:[#allocation8 + $0x684] sm:$0xf]  ;;  %v5649_v47 = vld [vmem:[#allocation8 + $0x688] sm:$0xf0]  ;;  %v4270_v13 = vpop.f32.mrf.mxu2  ;;  %v4283_v23 = vpop.f32.mrf.mxu3 }
 0x1ed   :  { %v5652_v40 = vor.u32 %v7069_v7, %v5649_v47  ;;  %v5884_v7 = vor.u32 %v7127_v8, %v5881_v19  ;;  %v5948_v47 = vor.u32 %v7143_v60, %v5945_v12  ;;  %v5937_v45 = vld [vmem:[#allocation8 + $0x8c8] sm:$0xf0]  ;;  %v7173_v23 = vld [vmem:[#allocation8 + $0x9c4] sm:$0xf] }
 0x1ee   :  { %4522 = vmatpush.bf16.msrb.mxu2 %v5748_v54  ;;  %4535 = vmatpush.bf16.msrb.mxu3 %v5812_v48  ;;  %v7085_v54 = vld [vmem:[#allocation8 + $0x704] sm:$0xf]  ;;  %v5713_v48 = vld [vmem:[#allocation8 + $0x708] sm:$0xf0] }
 0x1ef   :  { %v5716_v18 = vor.u32 %v7085_v54, %v5713_v48  ;;  %v6001_v13 = vld [vmem:[#allocation8 + $0x948] sm:$0xf0] }
 0x1f0   :  { %4497 = vmatpush.bf16.msrb.mxu0 %v5612_v39  ;;  %4510 = vmatpush.bf16.msrb.mxu1 %v5676_v41  ;;  %v5961_v39 = vld [vmem:[#allocation8 + $0x8f8] sm:$0xf0]  ;;  %v7163_v41 = vld [vmem:[#allocation8 + $0x974] sm:$0xf]  ;;  %v6065_v3 = vld [vmem:[#allocation8 + $0x9c8] sm:$0xf0] }
 0x1f1   :  { %v5964_v58 = vor.u32 %v7147_v34, %v5961_v39  ;;  %v7123_v39 = vld [vmem:[#allocation8 + $0x834] sm:$0xf]  ;;  %v6049_v8 = vld [vmem:[#allocation8 + $0x9a8] sm:$0xf0] }
 0x1f2   :  { %4523 = vmatpush.bf16.msrb.mxu2 %v5740_v1  ;;  %4536 = vmatpush.bf16.msrb.mxu3 %v5804_v25  ;;  %v6025_v1 = vld [vmem:[#allocation8 + $0x978] sm:$0xf0]  ;;  %v7179_v25 = vld [vmem:[#allocation8 + $0x9f4] sm:$0xf] }
 0x1f3   :  { %v6028_v59 = vor.u32 %v7163_v41, %v6025_v1  ;;  %v6092_v61 = vor.u32 %v7179_v25, %v6089_v17  ;;  %v5865_v41 = vld [vmem:[#allocation8 + $0x838] sm:$0xf0]  ;;  %v7139_v1 = vld [vmem:[#allocation8 + $0x8b4] sm:$0xf] }
 0x1f4   :  { %4498 = vmatpush.bf16.msrb.mxu0 %v5604_v49  ;;  %4511 = vmatpush.bf16.msrb.mxu1 %v5668_v51  ;;  %v7161_v49 = vld [vmem:[#allocation8 + $0x964] sm:$0xf]  ;;  %v6017_v51 = vld [vmem:[#allocation8 + $0x968] sm:$0xf0]  ;;  %v5929_v25 = vld [vmem:[#allocation8 + $0x8b8] sm:$0xf0] }
 0x1f5   :  { %v6020_v35 = vor.u32 %v7161_v49, %v6017_v51  ;;  %v7155_v17 = vld [vmem:[#allocation8 + $0x934] sm:$0xf]  ;;  %v5921_v49 = vld [vmem:[#allocation8 + $0x8a8] sm:$0xf0]  ;;  %v7153_v51 = vld [vmem:[#allocation8 + $0x924] sm:$0xf] }
 0x1f6   :  { %4524 = vmatpush.bf16.msrb.mxu2 %v5732_v15  ;;  %4537 = vmatpush.bf16.msrb.mxu3 %v5796_v36  ;;  %v5892_v15 = vor.u32 %v7129_v10, %v5889_v53  ;;  %v5956_v36 = vor.u32 %v7145_v46, %v5953_v62  ;;  %v5868_v10 = vor.u32 %v7123_v39, %v5865_v41  ;;  %v7137_v62 = vld [vmem:[#allocation8 + $0x8a4] sm:$0xf] }
 0x1f7   :  { %v5932_v53 = vor.u32 %v7139_v1, %v5929_v25  ;;  %v5924_v12 = vor.u32 %v7137_v62, %v5921_v49  ;;  %v7165_v39 = vld [vmem:[#allocation8 + $0x984] sm:$0xf]  ;;  %v7195_v1 = vld [vmem:[#allocation8 + $0xa74] sm:$0xf]  ;;  %v6153_v25 = vld [vmem:[#allocation8 + $0xa78] sm:$0xf0] }
 0x1f8   :  { %4499 = vmatpush.bf16.msrb.mxu0 %v5596_v32  ;;  %4512 = vmatpush.bf16.msrb.mxu1 %v5660_v29  ;;  %v6009_v32 = vld [vmem:[#allocation8 + $0x958] sm:$0xf0]  ;;  %v7175_v29 = vld [vmem:[#allocation8 + $0x9d4] sm:$0xf]  ;;  %v7193_v49 = vld [vmem:[#allocation8 + $0xa64] sm:$0xf] }
 0x1f9   :  { %v6012_v54 = vor.u32 %v7159_v26, %v6009_v32  ;;  %v6076_v48 = vor.u32 %v7175_v29, %v6073_v30  ;;  %v7119_v26 = vld [vmem:[#allocation8 + $0x814] sm:$0xf]  ;;  %v5849_v32 = vld [vmem:[#allocation8 + $0x818] sm:$0xf0] }
 0x1fa   :  { %4525 = vmatpush.bf16.msrb.mxu2 %v5724_v33  ;;  %4538 = vmatpush.bf16.msrb.mxu3 %v5788_v56  ;;  %v7125_v33 = vld [vmem:[#allocation8 + $0x844] sm:$0xf]  ;;  %v5873_v56 = vld [vmem:[#allocation8 + $0x848] sm:$0xf0] }
 0x1fb   :  { %v5876_v37 = vor.u32 %v7125_v33, %v5873_v56  ;;  %v5913_v33 = vld [vmem:[#allocation8 + $0x898] sm:$0xf0]  ;;  %v7151_v56 = vld [vmem:[#allocation8 + $0x914] sm:$0xf] }
 0x1fc   :  { %4500 = vmatpush.bf16.msrb.mxu0 %v5588_v0  ;;  %4513 = vmatpush.bf16.msrb.mxu1 %v5652_v40  ;;  %v4294_v16 = vpop.f32.mrf.mxu0  ;;  %v6068_v40 = vor.u32 %v7173_v23, %v6065_v3  ;;  %v5841_v23 = vld [vmem:[#allocation8 + $0x808] sm:$0xf0]  ;;  %v7133_v3 = vld [vmem:[#allocation8 + $0x884] sm:$0xf] }
 0x1fe   :  { %4526 = vmatpush.bf16.msrb.mxu2 %v5716_v18  ;;  %4539 = vmatpush.bf16.msrb.mxu3 %v5780_v55  ;;  %v5993_v55 = vld [vmem:[#allocation8 + $0x938] sm:$0xf0] }
 0x1ff   :  { %4501 = vmatmul.bf16.vlgmr.msrb.gmra.mxu0 %v7781_v24  ;;  %4514 = vmatmul.bf16.vlgmr.msrb.gmra.mxu1 %v7783_v63  ;;  %v7141_v24 = vld [vmem:[#allocation8 + $0x8c4] sm:$0xf] }
 0x200   :  { %4545 = vmatpush.bf16.msra.mxu0 %v5900_v5  ;;  %4558 = vmatpush.bf16.msra.mxu1 %v5964_v58  ;;  %v7157_v63 = vld [vmem:[#allocation8 + $0x944] sm:$0xf]  ;;  %v5940_v34 = vor.u32 %v7141_v24, %v5937_v45  ;;  %v7171_v5 = vld [vmem:[#allocation8 + $0x9b4] sm:$0xf]  ;;  %v6057_v58 = vld [vmem:[#allocation8 + $0x9b8] sm:$0xf0] }
 0x201   :  { %4527 = vmatmul.bf16.vlgmr.msrb.gmra.mxu2 %v7785_v4  ;;  %4540 = vmatmul.bf16.vlgmr.msrb.gmra.mxu3 %v7787_v11  ;;  %v4307_v4 = vpop.f32.mrf.mxu1  ;;  %v4295_v11 = vadd.f32 %v4294_v16, %v7926_v28  ;;  %v6004_v0 = vor.u32 %v7157_v63, %v6001_v13  ;;  %v7121_v28 = vld [vmem:[#allocation8 + $0x824] sm:$0xf]  ;;  %v6060_v46 = vor.u32 %v7171_v5, %v6057_v58  ;;  %v6041_v24 = vld [vmem:[#allocation8 + $0x998] sm:$0xf0]  ;;  %v5905_v16 = vld [vmem:[#allocation8 + $0x888] sm:$0xf0] }
 0x202   :  { %4571 = vmatpush.bf16.msra.mxu2 %v6028_v59  ;;  %4584 = vmatpush.bf16.msra.mxu3 %v6092_v61  ;;  %v5857_v59 = vld [vmem:[#allocation8 + $0x828] sm:$0xf0]  ;;  %v5996_v61 = vor.u32 %v7155_v17, %v5993_v55  ;;  %v7117_v45 = vld [vmem:[#allocation8 + $0x804] sm:$0xf]  ;;  %v5852_v63 = vor.u32 %v7119_v26, %v5849_v32  ;;  %v7211_v17 = vld [vmem:[#allocation8 + $0xaf4] sm:$0xf]  ;;  %v5908_v58 = vor.u32 %v7133_v3, %v5905_v16 }
 0x203   :  { %v4308_v18 = vadd.f32 %v4307_v4, %v4295_v11  ;;  %v5860_v60 = vor.u32 %v7121_v28, %v5857_v59  ;;  %v7227_v55 = vld [vmem:[#allocation8 + $0xb74] sm:$0xf]  ;;  %v5844_v5 = vor.u32 %v7117_v45, %v5841_v23  ;;  %v6345_v28 = vld [vmem:[#allocation8 + $0xbf8] sm:$0xf0]  ;;  %v7973_v45 = vld [vmem:[#allocation16_spill] sm:$0xff] }
 0x204   :  { %4546 = vmatpush.bf16.msra.mxu0 %v5892_v15  ;;  %4559 = vmatpush.bf16.msra.mxu1 %v5956_v36  ;;  %v4320_v52 = vpop.f32.mrf.mxu2  ;;  %v4333_v27 = vpop.f32.mrf.mxu3  ;;  %v5985_v15 = vld [vmem:[#allocation8 + $0x928] sm:$0xf0]  ;;  %v7169_v36 = vld [vmem:[#allocation8 + $0x9a4] sm:$0xf]  ;;  %v7191_v26 = vld [vmem:[#allocation8 + $0xa54] sm:$0xf] }
 0x205   :  { %v4321_v19 = vadd.f32 %v4320_v52, %v4308_v18  ;;  %v5988_v30 = vor.u32 %v7153_v51, %v5985_v15  ;;  %v6217_v18 = vld [vmem:[#allocation8 + $0xaf8] sm:$0xf0]  ;;  %v6145_v51 = vld [vmem:[#allocation8 + $0xa68] sm:$0xf0]  ;;  %v7209_v15 = vld [vmem:[#allocation8 + $0xae4] sm:$0xf] }
 0x206   :  { %4572 = vmatpush.bf16.msra.mxu2 %v6020_v35  ;;  %4585 = vmatpush.bf16.msra.mxu3 %v6084_v20  ;;  %v4296_v35 = vpop.f32.mrf.mxu0  ;;  %v6220_v62 = vor.u32 %v7211_v17, %v6217_v18  ;;  %v6137_v32 = vld [vmem:[#allocation8 + $0xa58] sm:$0xf0]  ;;  %v7381_v3 = vld [vmem:[#allocation10] sm:$0x3] }
 0x207   :  { %v7933_v29 = vadd.f32 %v4333_v27, %v4321_v19  ;;  %v6273_v19 = vld [vmem:[#allocation8 + $0xb68] sm:$0xf0]  ;;  %v7241_v35 = vld [vmem:[#allocation8 + $0xbe4] sm:$0xf]  ;;  %v1358_v16 = vperm.slane %v7381_v3, 1 }
 0x208   :  { %4547 = vmatpush.bf16.msra.mxu0 %v5884_v7  ;;  %4560 = vmatpush.bf16.msra.mxu1 %v5948_v47  ;;  %v6052_v7 = vor.u32 %v7169_v36, %v6049_v8  ;;  %v7135_v47 = vld [vmem:[#allocation8 + $0x894] sm:$0xf]  ;;  %v6209_v36 = vld [vmem:[#allocation8 + $0xae8] sm:$0xf0]  ;;  %v7225_v8 = vld [vmem:[#allocation8 + $0xb64] sm:$0xf] }
 0x209   :  { %v4309_v20 = vpop.f32.mrf.mxu1  ;;  %v5916_v13 = vor.u32 %v7135_v47, %v5913_v33  ;;  %v7207_v47 = vld [vmem:[#allocation8 + $0xad4] sm:$0xf]  ;;  %v6201_v33 = vld [vmem:[#allocation8 + $0xad8] sm:$0xf0] }
 0x20a   :  { %4573 = vmatpush.bf16.msra.mxu2 %v6012_v54  ;;  %4586 = vmatpush.bf16.msra.mxu3 %v6076_v48  ;;  %v5977_v54 = vld [vmem:[#allocation8 + $0x918] sm:$0xf0]  ;;  %v7167_v48 = vld [vmem:[#allocation8 + $0x994] sm:$0xf]  ;;  %v6337_v20 = vld [vmem:[#allocation8 + $0xbe8] sm:$0xf0]  ;;  %v6204_v23 = vor.u32 %v7207_v47, %v6201_v33 }
 0x20b   :  { %v5980_v4 = vor.u32 %v7151_v56, %v5977_v54  ;;  %v6044_v11 = vor.u32 %v7167_v48, %v6041_v24  ;;  %v7223_v56 = vld [vmem:[#allocation8 + $0xb54] sm:$0xf]  ;;  %v6265_v54 = vld [vmem:[#allocation8 + $0xb58] sm:$0xf0] }
 0x20c   :  { %4548 = vmatpush.bf16.msra.mxu0 %v5876_v37  ;;  %4561 = vmatpush.bf16.msra.mxu1 %v5940_v34  ;;  %v7149_v37 = vld [vmem:[#allocation8 + $0x904] sm:$0xf]  ;;  %v5969_v34 = vld [vmem:[#allocation8 + $0x908] sm:$0xf0]  ;;  %v4322_v41 = vpop.f32.mrf.mxu2  ;;  %v7239_v48 = vld [vmem:[#allocation8 + $0xbd4] sm:$0xf] }
 0x20d   :  { %v5972_v59 = vor.u32 %v7149_v37, %v5969_v34  ;;  %v6329_v24 = vld [vmem:[#allocation8 + $0xbd8] sm:$0xf0]  ;;  %v6193_v34 = vld [vmem:[#allocation8 + $0xac8] sm:$0xf0]  ;;  %v7199_v3 = vld [vmem:[#allocation8 + $0xa94] sm:$0xf] }
 0x20e   :  { %4574 = vmatpush.bf16.msra.mxu2 %v6004_v0  ;;  %4587 = vmatpush.bf16.msra.mxu3 %v6068_v40  ;;  %v4335_v0 = vpop.f32.mrf.mxu3  ;;  %v6033_v40 = vld [vmem:[#allocation8 + $0x988] sm:$0xf0]  ;;  %v6332_v37 = vor.u32 %v7239_v48, %v6329_v24  ;;  %v7183_v24 = vld [vmem:[#allocation8 + $0xa14] sm:$0xf] }
 0x20f   :  { %v6257_v41 = vld [vmem:[#allocation8 + $0xb48] sm:$0xf0]  ;;  %v7237_v0 = vld [vmem:[#allocation8 + $0xbc4] sm:$0xf] }
 0x210   :  { %4549 = vmatpush.bf16.msra.mxu0 %v5868_v10  ;;  %4562 = vmatpush.bf16.msra.mxu1 %v5932_v53  ;;  %v6281_v10 = vld [vmem:[#allocation8 + $0xb78] sm:$0xf0]  ;;  %v7243_v53 = vld [vmem:[#allocation8 + $0xbf4] sm:$0xf] }
 0x211   :  { %v6284_v52 = vor.u32 %v7227_v55, %v6281_v10  ;;  %v6348_v27 = vor.u32 %v7243_v53, %v6345_v28  ;;  %v7203_v28 = vld [vmem:[#allocation8 + $0xab4] sm:$0xf] }
 0x212   :  { %4575 = vmatpush.bf16.msra.mxu2 %v5996_v61  ;;  %4588 = vmatpush.bf16.msra.mxu3 %v6060_v46  ;;  %v6036_v61 = vor.u32 %v7165_v39, %v6033_v40  ;;  %v6156_v46 = vor.u32 %v7195_v1, %v6153_v25  ;;  %v7221_v39 = vld [vmem:[#allocation8 + $0xb44] sm:$0xf]  ;;  %v6321_v40 = vld [vmem:[#allocation8 + $0xbc8] sm:$0xf0] }
 0x213   :  { %v6260_v10 = vor.u32 %v7221_v39, %v6257_v41  ;;  %v6324_v53 = vor.u32 %v7237_v0, %v6321_v40  ;;  %v6097_v41 = vld [vmem:[#allocation8 + $0xa08] sm:$0xf0]  ;;  %v7197_v0 = vld [vmem:[#allocation8 + $0xa84] sm:$0xf] }
 0x214   :  { %4550 = vmatpush.bf16.msra.mxu0 %v5860_v60  ;;  %4563 = vmatpush.bf16.msra.mxu1 %v5924_v12  ;;  %v6148_v60 = vor.u32 %v7193_v49, %v6145_v51  ;;  %v6212_v12 = vor.u32 %v7209_v15, %v6209_v36  ;;  %v7235_v49 = vld [vmem:[#allocation8 + $0xbb4] sm:$0xf]  ;;  %v6313_v51 = vld [vmem:[#allocation8 + $0xbb8] sm:$0xf0]  ;;  %v7185_v15 = vld [vmem:[#allocation8 + $0xa24] sm:$0xf] }
 0x215   :  { %v6113_v36 = vld [vmem:[#allocation8 + $0xa28] sm:$0xf0] }
 0x216   :  { %4576 = vmatpush.bf16.msra.mxu2 %v5988_v30  ;;  %4589 = vmatpush.bf16.msra.mxu3 %v6052_v7  ;;  %v6276_v30 = vor.u32 %v7225_v8, %v6273_v19  ;;  %v6340_v7 = vor.u32 %v7241_v35, %v6337_v20  ;;  %v6316_v19 = vor.u32 %v7235_v49, %v6313_v51  ;;  %v7201_v35 = vld [vmem:[#allocation8 + $0xaa4] sm:$0xf]  ;;  %v6177_v20 = vld [vmem:[#allocation8 + $0xaa8] sm:$0xf0]  ;;  %v6537_v51 = vld [vmem:[#allocation8 + $0xd78] sm:$0xf0] }
 0x217   :  { %v6180_v48 = vor.u32 %v7201_v35, %v6177_v20  ;;  %v6161_v40 = vld [vmem:[#allocation8 + $0xa88] sm:$0xf0]  ;;  %v7257_v35 = vld [vmem:[#allocation8 + $0xc64] sm:$0xf] }
 0x218   :  { %4551 = vmatpush.bf16.msra.mxu0 %v5852_v63  ;;  %4564 = vmatpush.bf16.msra.mxu1 %v5916_v13  ;;  %v7974_v63 = vld [vmem:[#allocation17_spill] sm:$0xff]  ;;  %v6140_v13 = vor.u32 %v7191_v26, %v6137_v32  ;;  %v6164_v49 = vor.u32 %v7197_v0, %v6161_v40 }
 0x219   :  { %v6241_v32 = vld [vmem:[#allocation8 + $0xb28] sm:$0xf0] }
 0x21a   :  { %4577 = vmatpush.bf16.msra.mxu2 %v5980_v4  ;;  %4590 = vmatpush.bf16.msra.mxu3 %v6044_v11  ;;  %v7189_v4 = vld [vmem:[#allocation8 + $0xa44] sm:$0xf]  ;;  %v6129_v11 = vld [vmem:[#allocation8 + $0xa48] sm:$0xf0] }
 0x21b   :  { %v6132_v18 = vor.u32 %v7189_v4, %v6129_v11  ;;  %v7215_v4 = vld [vmem:[#allocation8 + $0xb14] sm:$0xf]  ;;  %v6233_v11 = vld [vmem:[#allocation8 + $0xb18] sm:$0xf0]  ;;  %v6401_v20 = vld [vmem:[#allocation8 + $0xc68] sm:$0xf0] }
 0x21c   :  { %4552 = vmatpush.bf16.msra.mxu0 %v5844_v5  ;;  %4565 = vmatpush.bf16.msra.mxu1 %v5908_v58  ;;  %v4346_v1 = vpop.f32.mrf.mxu0  ;;  %v4359_v25 = vpop.f32.mrf.mxu1  ;;  %v7187_v5 = vld [vmem:[#allocation8 + $0xa34] sm:$0xf]  ;;  %v6121_v58 = vld [vmem:[#allocation8 + $0xa38] sm:$0xf0] }
 0x21d   :  { %v4347_v17 = vadd.f32 %v4346_v1, %v1358_v16  ;;  %v6169_v16 = vld [vmem:[#allocation8 + $0xa98] sm:$0xf0]  ;;  %v6236_v1 = vor.u32 %v7215_v4, %v6233_v11  ;;  %v7303_v11 = vld [vmem:[#allocation8 + $0xdd4] sm:$0xf] }
 0x21e   :  { %4578 = vmatpush.bf16.msra.mxu2 %v5972_v59  ;;  %4591 = vmatpush.bf16.msra.mxu3 %v6036_v61  ;;  %v6185_v59 = vld [vmem:[#allocation8 + $0xab8] sm:$0xf0]  ;;  %v7219_v61 = vld [vmem:[#allocation8 + $0xb34] sm:$0xf]  ;;  %v6172_v39 = vor.u32 %v7199_v3, %v6169_v16 }
 0x21f   :  { %4553 = vmatmul.bf16.vlgmr.msra.gmra.mxu0 %v7819_v6  ;;  %4566 = vmatmul.bf16.vlgmr.msra.gmra.mxu1 %v7821_v31  ;;  %v6268_v6 = vor.u32 %v7223_v56, %v6265_v54  ;;  %v7205_v31 = vld [vmem:[#allocation8 + $0xac4] sm:$0xf]  ;;  %v6116_v54 = vor.u32 %v7185_v15, %v6113_v36  ;;  %v6457_v3 = vld [vmem:[#allocation8 + $0xcd8] sm:$0xf0]  ;;  %v7287_v16 = vld [vmem:[#allocation8 + $0xd54] sm:$0xf] }
 0x220   :  { %4597 = vmatpush.bf16.msrb.mxu0 %v6156_v46  ;;  %4610 = vmatpush.bf16.msrb.mxu1 %v6220_v62  ;;  %v6196_v55 = vor.u32 %v7205_v31, %v6193_v34  ;;  %v4360_v46 = vadd.f32 %v4359_v25, %v4347_v17  ;;  %v6249_v62 = vld [vmem:[#allocation8 + $0xb38] sm:$0xf0]  ;;  %v7181_v31 = vld [vmem:[#allocation8 + $0xa04] sm:$0xf] }
 0x221   :  { %4579 = vmatmul.bf16.vlgmr.msra.gmra.mxu2 %v7973_v45  ;;  %4592 = vmatmul.bf16.vlgmr.msra.gmra.mxu3 %v7974_v63  ;;  %v6252_v8 = vor.u32 %v7219_v61, %v6249_v62  ;;  %v6105_v45 = vld [vmem:[#allocation8 + $0xa18] sm:$0xf0]  ;;  %v7213_v17 = vld [vmem:[#allocation8 + $0xb04] sm:$0xf]  ;;  %v6100_v62 = vor.u32 %v7181_v31, %v6097_v41  ;;  %v6385_v41 = vld [vmem:[#allocation8 + $0xc48] sm:$0xf0] }
 0x222   :  { %4623 = vmatpush.bf16.msrb.mxu2 %v6284_v52  ;;  %4636 = vmatpush.bf16.msrb.mxu3 %v6348_v27  ;;  %v6124_v52 = vor.u32 %v7187_v5, %v6121_v58  ;;  %v6188_v27 = vor.u32 %v7203_v28, %v6185_v59  ;;  %v6108_v34 = vor.u32 %v7183_v24, %v6105_v45  ;;  %v6409_v28 = vld [vmem:[#allocation8 + $0xc78] sm:$0xf0]  ;;  %v7275_v59 = vld [vmem:[#allocation8 + $0xcf4] sm:$0xf] }
 0x223   :  { %v6473_v61 = vld [vmem:[#allocation8 + $0xcf8] sm:$0xf0] }
 0x224   :  { %4598 = vmatpush.bf16.msrb.mxu0 %v6148_v60  ;;  %4611 = vmatpush.bf16.msrb.mxu1 %v6212_v12  ;;  %v7217_v60 = vld [vmem:[#allocation8 + $0xb24] sm:$0xf]  ;;  %v4372_v12 = vpop.f32.mrf.mxu2  ;;  %v4385_v26 = vpop.f32.mrf.mxu3  ;;  %v6393_v24 = vld [vmem:[#allocation8 + $0xc58] sm:$0xf0] }
 0x225   :  { %v4373_v47 = vadd.f32 %v4372_v12, %v4360_v46  ;;  %v4348_v33 = vpop.f32.mrf.mxu0  ;;  %v4361_v56 = vpop.f32.mrf.mxu1  ;;  %v7291_v46 = vld [vmem:[#allocation8 + $0xd74] sm:$0xf]  ;;  %v6521_v4 = vld [vmem:[#allocation8 + $0xd58] sm:$0xf0] }
 0x226   :  { %4624 = vmatpush.bf16.msrb.mxu2 %v6276_v30  ;;  %4637 = vmatpush.bf16.msrb.mxu3 %v6340_v7  ;;  %v7233_v30 = vld [vmem:[#allocation8 + $0xba4] sm:$0xf]  ;;  %v6305_v7 = vld [vmem:[#allocation8 + $0xba8] sm:$0xf0]  ;;  %v6404_v56 = vor.u32 %v7257_v35, %v6401_v20  ;;  %v6524_v0 = vor.u32 %v7287_v16, %v6521_v4 }
 0x227   :  { %v7939_v63 = vadd.f32 %v4385_v26, %v4373_v47  ;;  %v7273_v26 = vld [vmem:[#allocation8 + $0xce4] sm:$0xf]  ;;  %v6593_v33 = vld [vmem:[#allocation8 + $0xde8] sm:$0xf0] }
 0x228   :  { %4599 = vmatpush.bf16.msrb.mxu0 %v6140_v13  ;;  %4612 = vmatpush.bf16.msrb.mxu1 %v6204_v23  ;;  %v6244_v13 = vor.u32 %v7217_v60, %v6241_v32  ;;  %v6308_v23 = vor.u32 %v7233_v30, %v6305_v7  ;;  %v6540_v60 = vor.u32 %v7291_v46, %v6537_v51  ;;  %v6465_v32 = vld [vmem:[#allocation8 + $0xce8] sm:$0xf0]  ;;  %v7289_v30 = vld [vmem:[#allocation8 + $0xd64] sm:$0xf]  ;;  %v7267_v46 = vld [vmem:[#allocation8 + $0xcb4] sm:$0xf] }
 0x229   :  { %v6529_v7 = vld [vmem:[#allocation8 + $0xd68] sm:$0xf0]  ;;  %v7305_v47 = vld [vmem:[#allocation8 + $0xde4] sm:$0xf] }
 0x22a   :  { %4625 = vmatpush.bf16.msrb.mxu2 %v6268_v6  ;;  %4638 = vmatpush.bf16.msrb.mxu3 %v6332_v37  ;;  %v7231_v6 = vld [vmem:[#allocation8 + $0xb94] sm:$0xf]  ;;  %v6297_v37 = vld [vmem:[#allocation8 + $0xb98] sm:$0xf0]  ;;  %v6532_v45 = vor.u32 %v7289_v30, %v6529_v7  ;;  %v6497_v7 = vld [vmem:[#allocation8 + $0xd28] sm:$0xf0] }
 0x22b   :  { %v6300_v25 = vor.u32 %v7231_v6, %v6297_v37  ;;  %v6585_v6 = vld [vmem:[#allocation8 + $0xdd8] sm:$0xf0] }
 0x22c   :  { %4600 = vmatpush.bf16.msrb.mxu0 %v6132_v18  ;;  %4613 = vmatpush.bf16.msrb.mxu1 %v6196_v55  ;;  %v6225_v18 = vld [vmem:[#allocation8 + $0xb08] sm:$0xf0]  ;;  %v7229_v55 = vld [vmem:[#allocation8 + $0xb84] sm:$0xf]  ;;  %v4374_v5 = vpop.f32.mrf.mxu2  ;;  %v4387_v58 = vpop.f32.mrf.mxu3  ;;  %v7975_v37 = vld [vmem:[#allocation18_spill] sm:$0xff]  ;;  %v6588_v40 = vor.u32 %v7303_v11, %v6585_v6 }
 0x22d   :  { %v6228_v15 = vor.u32 %v7213_v17, %v6225_v18  ;;  %v7301_v17 = vld [vmem:[#allocation8 + $0xdc4] sm:$0xf]  ;;  %v6577_v18 = vld [vmem:[#allocation8 + $0xdc8] sm:$0xf0]  ;;  %v7263_v11 = vld [vmem:[#allocation8 + $0xc94] sm:$0xf] }
 0x22e   :  { %4626 = vmatpush.bf16.msrb.mxu2 %v6260_v10  ;;  %4639 = vmatpush.bf16.msrb.mxu3 %v6324_v53  ;;  %v6289_v10 = vld [vmem:[#allocation8 + $0xb88] sm:$0xf0]  ;;  %v7259_v53 = vld [vmem:[#allocation8 + $0xc74] sm:$0xf]  ;;  %v6425_v6 = vld [vmem:[#allocation8 + $0xc98] sm:$0xf0] }
 0x22f   :  { %v6292_v36 = vor.u32 %v7229_v55, %v6289_v10 }
 0x230   :  { %4601 = vmatpush.bf16.msrb.mxu0 %v6124_v52  ;;  %4614 = vmatpush.bf16.msrb.mxu1 %v6188_v27  ;;  %v7307_v52 = vld [vmem:[#allocation8 + $0xdf4] sm:$0xf]  ;;  %v6601_v27 = vld [vmem:[#allocation8 + $0xdf8] sm:$0xf0] }
 0x231   :  { %v6604_v12 = vor.u32 %v7307_v52, %v6601_v27  ;;  %v6505_v52 = vld [vmem:[#allocation8 + $0xd38] sm:$0xf0]  ;;  %v7299_v27 = vld [vmem:[#allocation8 + $0xdb4] sm:$0xf] }
 0x232   :  { %4627 = vmatpush.bf16.msrb.mxu2 %v6252_v8  ;;  %4640 = vmatpush.bf16.msrb.mxu3 %v6316_v19  ;;  %v6412_v8 = vor.u32 %v7259_v53, %v6409_v28  ;;  %v6476_v19 = vor.u32 %v7275_v59, %v6473_v61  ;;  %v7251_v53 = vld [vmem:[#allocation8 + $0xc34] sm:$0xf]  ;;  %v6377_v28 = vld [vmem:[#allocation8 + $0xc38] sm:$0xf0]  ;;  %v6580_v61 = vor.u32 %v7301_v17, %v6577_v18  ;;  %v7277_v18 = vld [vmem:[#allocation8 + $0xd04] sm:$0xf] }
 0x234   :  { %4602 = vmatpush.bf16.msrb.mxu0 %v6116_v54  ;;  %4615 = vmatpush.bf16.msrb.mxu1 %v6180_v48  ;;  %v6468_v54 = vor.u32 %v7273_v26, %v6465_v32  ;;  %v7255_v48 = vld [vmem:[#allocation8 + $0xc54] sm:$0xf]  ;;  %v7281_v26 = vld [vmem:[#allocation8 + $0xd24] sm:$0xf] }
 0x235   :  { %v6396_v31 = vor.u32 %v7255_v48, %v6393_v24  ;;  %v6500_v16 = vor.u32 %v7281_v26, %v6497_v7  ;;  %v6721_v26 = vld [vmem:[#allocation8 + $0xee8] sm:$0xf0]  ;;  %v7369_v7 = vld [vmem:[#allocation8 + $0xfe4] sm:$0xf] }
 0x236   :  { %4628 = vmatpush.bf16.msrb.mxu2 %v6244_v13  ;;  %4641 = vmatpush.bf16.msrb.mxu3 %v6308_v23  ;;  %v6596_v13 = vor.u32 %v7305_v47, %v6593_v33  ;;  %v7271_v23 = vld [vmem:[#allocation8 + $0xcd4] sm:$0xf]  ;;  %v7297_v47 = vld [vmem:[#allocation8 + $0xda4] sm:$0xf]  ;;  %v6561_v33 = vld [vmem:[#allocation8 + $0xda8] sm:$0xf0] }
 0x237   :  { %v6564_v4 = vor.u32 %v7297_v47, %v6561_v33  ;;  %v6849_v47 = vld [vmem:[#allocation8 + $0xfe8] sm:$0xf0] }
 0x238   :  { %4603 = vmatpush.bf16.msrb.mxu0 %v6108_v34  ;;  %4616 = vmatpush.bf16.msrb.mxu1 %v6172_v39  ;;  %v6460_v34 = vor.u32 %v7271_v23, %v6457_v3  ;;  %v7253_v39 = vld [vmem:[#allocation8 + $0xc44] sm:$0xf]  ;;  %v6361_v23 = vld [vmem:[#allocation8 + $0xc18] sm:$0xf0] }
 0x239   :  { %v6388_v58 = vor.u32 %v7253_v39, %v6385_v41  ;;  %v6553_v39 = vld [vmem:[#allocation8 + $0xd98] sm:$0xf0]  ;;  %v7245_v41 = vld [vmem:[#allocation8 + $0xc04] sm:$0xf] }
 0x23a   :  { %4629 = vmatpush.bf16.msrb.mxu2 %v6236_v1  ;;  %4642 = vmatpush.bf16.msrb.mxu3 %v6300_v25  ;;  %v6449_v1 = vld [vmem:[#allocation8 + $0xcc8] sm:$0xf0] }
 0x23b   :  { %v6513_v25 = vld [vmem:[#allocation8 + $0xd48] sm:$0xf0] }
 0x23c   :  { %4604 = vmatpush.bf16.msrb.mxu0 %v6100_v62  ;;  %4617 = vmatpush.bf16.msrb.mxu1 %v6164_v49  ;;  %v4398_v55 = vpop.f32.mrf.mxu0  ;;  %v6441_v62 = vld [vmem:[#allocation8 + $0xcb8] sm:$0xf0]  ;;  %v7283_v49 = vld [vmem:[#allocation8 + $0xd34] sm:$0xf] }
 0x23d   :  { %v4399_v5 = vadd.f32 %v4398_v55, %v7939_v63  ;;  %v7249_v63 = vld [vmem:[#allocation8 + $0xc24] sm:$0xf]  ;;  %v6508_v35 = vor.u32 %v7283_v49, %v6505_v52  ;;  %v6481_v55 = vld [vmem:[#allocation8 + $0xd08] sm:$0xf0]  ;;  %v7371_v52 = vld [vmem:[#allocation8 + $0xff4] sm:$0xf] }
 0x23e   :  { %4630 = vmatpush.bf16.msrb.mxu2 %v6228_v15  ;;  %4643 = vmatpush.bf16.msrb.mxu3 %v6292_v36  ;;  %v6569_v15 = vld [vmem:[#allocation8 + $0xdb8] sm:$0xf0]  ;;  %v6380_v36 = vor.u32 %v7251_v53, %v6377_v28  ;;  %v7323_v53 = vld [vmem:[#allocation8 + $0xe74] sm:$0xf] }
 0x23f   :  { %4605 = vmatmul.bf16.vlgmr.msrb.gmra.mxu0 %v7844_v44  ;;  %4618 = vmatmul.bf16.vlgmr.msrb.gmra.mxu1 %v7846_v57  ;;  %v7269_v44 = vld [vmem:[#allocation8 + $0xcc4] sm:$0xf]  ;;  %v6572_v20 = vor.u32 %v7299_v27, %v6569_v15  ;;  %v6665_v28 = vld [vmem:[#allocation8 + $0xe78] sm:$0xf0]  ;;  %v6484_v15 = vor.u32 %v7277_v18, %v6481_v55  ;;  %v7315_v55 = vld [vmem:[#allocation8 + $0xe34] sm:$0xf] }
 0x240   :  { %4649 = vmatpush.bf16.msra.mxu0 %v6412_v8  ;;  %4662 = vmatpush.bf16.msra.mxu1 %v6476_v19  ;;  %v7285_v57 = vld [vmem:[#allocation8 + $0xd44] sm:$0xf]  ;;  %v6452_v10 = vor.u32 %v7269_v44, %v6449_v1  ;;  %v6444_v8 = vor.u32 %v7267_v46, %v6441_v62  ;;  %v6369_v19 = vld [vmem:[#allocation8 + $0xc28] sm:$0xf0]  ;;  %v7355_v46 = vld [vmem:[#allocation8 + $0xf74] sm:$0xf] }
 0x241   :  { %4631 = vmatmul.bf16.vlgmr.msrb.gmra.mxu2 %v7848_v14  ;;  %4644 = vmatmul.bf16.vlgmr.msrb.gmra.mxu3 %v7975_v37  ;;  %v4411_v14 = vpop.f32.mrf.mxu1  ;;  %v6516_v59 = vor.u32 %v7285_v57, %v6513_v25  ;;  %v6372_v24 = vor.u32 %v7249_v63, %v6369_v19  ;;  %v7279_v37 = vld [vmem:[#allocation8 + $0xd14] sm:$0xf]  ;;  %v6353_v44 = vld [vmem:[#allocation8 + $0xc08] sm:$0xf0]  ;;  %v7261_v1 = vld [vmem:[#allocation8 + $0xc84] sm:$0xf] }
 0x242   :  { %4675 = vmatpush.bf16.msra.mxu2 %v6540_v60  ;;  %4688 = vmatpush.bf16.msra.mxu3 %v6604_v12  ;;  %v4412_v51 = vadd.f32 %v4411_v14, %v4399_v5  ;;  %v7265_v60 = vld [vmem:[#allocation8 + $0xca4] sm:$0xf]  ;;  %v6433_v12 = vld [vmem:[#allocation8 + $0xca8] sm:$0xf0]  ;;  %v6356_v62 = vor.u32 %v7245_v41, %v6353_v44  ;;  %v6857_v27 = vld [vmem:[#allocation8 + $0xff8] sm:$0xf0] }
 0x243   :  { %v6417_v57 = vld [vmem:[#allocation8 + $0xc88] sm:$0xf0]  ;;  %v7293_v14 = vld [vmem:[#allocation8 + $0xd84] sm:$0xf] }
 0x244   :  { %4650 = vmatpush.bf16.msra.mxu0 %v6404_v56  ;;  %4663 = vmatpush.bf16.msra.mxu1 %v6468_v54  ;;  %v4424_v32 = vpop.f32.mrf.mxu2  ;;  %v4437_v30 = vpop.f32.mrf.mxu3  ;;  %v6420_v49 = vor.u32 %v7261_v1, %v6417_v57  ;;  %v7321_v19 = vld [vmem:[#allocation8 + $0xe64] sm:$0xf]  ;;  %v6769_v44 = vld [vmem:[#allocation8 + $0xf48] sm:$0xf0] }
 0x245   :  { %v4425_v56 = vadd.f32 %v4424_v32, %v4412_v51  ;;  %v4400_v54 = vpop.f32.mrf.mxu0  ;;  %v6793_v51 = vld [vmem:[#allocation8 + $0xf78] sm:$0xf0]  ;;  %v7353_v32 = vld [vmem:[#allocation8 + $0xf64] sm:$0xf]  ;;  %v6833_v57 = vld [vmem:[#allocation8 + $0xfc8] sm:$0xf0] }
 0x246   :  { %4676 = vmatpush.bf16.msra.mxu2 %v6532_v45  ;;  %4689 = vmatpush.bf16.msra.mxu3 %v6596_v13  ;;  %v6436_v45 = vor.u32 %v7265_v60, %v6433_v12  ;;  %v7247_v13 = vld [vmem:[#allocation8 + $0xc14] sm:$0xf]  ;;  %v6860_v60 = vor.u32 %v7371_v52, %v6857_v27  ;;  %v7337_v12 = vld [vmem:[#allocation8 + $0xee4] sm:$0xf]  ;;  %v6625_v52 = vld [vmem:[#allocation8 + $0xe28] sm:$0xf0] }
 0x247   :  { %v7946_v3 = vadd.f32 %v4437_v30, %v4425_v56  ;;  %v6785_v30 = vld [vmem:[#allocation8 + $0xf68] sm:$0xf0]  ;;  %v6724_v56 = vor.u32 %v7337_v12, %v6721_v26  ;;  %v7319_v54 = vld [vmem:[#allocation8 + $0xe54] sm:$0xf]  ;;  %v7365_v1 = vld [vmem:[#allocation8 + $0xfc4] sm:$0xf] }
 0x248   :  { %4651 = vmatpush.bf16.msra.mxu0 %v6396_v31  ;;  %4664 = vmatpush.bf16.msra.mxu1 %v6460_v34  ;;  %v6489_v31 = vld [vmem:[#allocation8 + $0xd18] sm:$0xf0]  ;;  %v7295_v34 = vld [vmem:[#allocation8 + $0xd94] sm:$0xf]  ;;  %v6817_v12 = vld [vmem:[#allocation8 + $0xfa8] sm:$0xf0] }
 0x249   :  { %v4413_v48 = vpop.f32.mrf.mxu1  ;;  %v6492_v25 = vor.u32 %v7279_v37, %v6489_v31  ;;  %v6556_v17 = vor.u32 %v7295_v34, %v6553_v39  ;;  %v7317_v34 = vld [vmem:[#allocation8 + $0xe44] sm:$0xf]  ;;  %v6641_v39 = vld [vmem:[#allocation8 + $0xe48] sm:$0xf0] }
 0x24a   :  { %4677 = vmatpush.bf16.msra.mxu2 %v6524_v0  ;;  %4690 = vmatpush.bf16.msra.mxu3 %v6588_v40  ;;  %v6364_v0 = vor.u32 %v7247_v13, %v6361_v23  ;;  %v6428_v40 = vor.u32 %v7263_v11, %v6425_v6  ;;  %v6649_v48 = vld [vmem:[#allocation8 + $0xe58] sm:$0xf0]  ;;  %v7335_v13 = vld [vmem:[#allocation8 + $0xed4] sm:$0xf] }
 0x24b   :  { %v6713_v23 = vld [vmem:[#allocation8 + $0xed8] sm:$0xf0]  ;;  %v7367_v11 = vld [vmem:[#allocation8 + $0xfd4] sm:$0xf]  ;;  %v6652_v37 = vor.u32 %v7319_v54, %v6649_v48 }
 0x24c   :  { %4652 = vmatpush.bf16.msra.mxu0 %v6388_v58  ;;  %4665 = vmatpush.bf16.msra.mxu1 %v6452_v10  ;;  %v4426_v5 = vpop.f32.mrf.mxu2  ;;  %v4439_v58 = vpop.f32.mrf.mxu3  ;;  %v6545_v10 = vld [vmem:[#allocation8 + $0xd88] sm:$0xf0]  ;;  %v6841_v6 = vld [vmem:[#allocation8 + $0xfd8] sm:$0xf0]  ;;  %v6716_v31 = vor.u32 %v7335_v13, %v6713_v23  ;;  %v7343_v23 = vld [vmem:[#allocation8 + $0xf14] sm:$0xf] }
 0x24d   :  { %v6836_v58 = vor.u32 %v7365_v1, %v6833_v57  ;;  %v6681_v13 = vld [vmem:[#allocation8 + $0xe98] sm:$0xf0]  ;;  %v6737_v1 = vld [vmem:[#allocation8 + $0xf08] sm:$0xf0]  ;;  %v7357_v57 = vld [vmem:[#allocation8 + $0xf84] sm:$0xf] }
 0x24e   :  { %4678 = vmatpush.bf16.msra.mxu2 %v6516_v59  ;;  %4691 = vmatpush.bf16.msra.mxu3 %v6580_v61  ;;  %v7339_v59 = vld [vmem:[#allocation8 + $0xef4] sm:$0xf]  ;;  %v6729_v61 = vld [vmem:[#allocation8 + $0xef8] sm:$0xf0] }
 0x24f   :  { %v6732_v63 = vor.u32 %v7339_v59, %v6729_v61  ;;  %v6761_v61 = vld [vmem:[#allocation8 + $0xf38] sm:$0xf0] }
 0x250   :  { %4653 = vmatpush.bf16.msra.mxu0 %v6380_v36  ;;  %4666 = vmatpush.bf16.msra.mxu1 %v6444_v8  ;;  %v6548_v36 = vor.u32 %v7293_v14, %v6545_v10  ;;  %v6668_v8 = vor.u32 %v7323_v53, %v6665_v28  ;;  %v6633_v14 = vld [vmem:[#allocation8 + $0xe38] sm:$0xf0]  ;;  %v7331_v10 = vld [vmem:[#allocation8 + $0xeb4] sm:$0xf] }
 0x251   :  { %v6697_v53 = vld [vmem:[#allocation8 + $0xeb8] sm:$0xf0]  ;;  %v7347_v28 = vld [vmem:[#allocation8 + $0xf34] sm:$0xf] }
 0x252   :  { %4679 = vmatpush.bf16.msra.mxu2 %v6508_v35  ;;  %4692 = vmatpush.bf16.msra.mxu3 %v6572_v20  ;;  %v6657_v35 = vld [vmem:[#allocation8 + $0xe68] sm:$0xf0]  ;;  %v6796_v20 = vor.u32 %v7355_v46, %v6793_v51  ;;  %v7363_v46 = vld [vmem:[#allocation8 + $0xfb4] sm:$0xf]  ;;  %v6700_v51 = vor.u32 %v7331_v10, %v6697_v53  ;;  %v6764_v27 = vor.u32 %v7347_v28, %v6761_v61 }
 0x253   :  { %v6660_v33 = vor.u32 %v7321_v19, %v6657_v35 }
 0x254   :  { %4654 = vmatpush.bf16.msra.mxu0 %v6372_v24  ;;  %4667 = vmatpush.bf16.msra.mxu1 %v6436_v45  ;;  %v6788_v24 = vor.u32 %v7353_v32, %v6785_v30  ;;  %v6852_v45 = vor.u32 %v7369_v7, %v6849_v47 }
 0x256   :  { %4680 = vmatpush.bf16.msra.mxu2 %v6500_v16  ;;  %4693 = vmatpush.bf16.msra.mxu3 %v6564_v4  ;;  %v7351_v16 = vld [vmem:[#allocation8 + $0xf54] sm:$0xf]  ;;  %v6777_v4 = vld [vmem:[#allocation8 + $0xf58] sm:$0xf0] }
 0x257   :  { %v6780_v41 = vor.u32 %v7351_v16, %v6777_v4  ;;  %v6745_v16 = vld [vmem:[#allocation8 + $0xf18] sm:$0xf0]  ;;  %v7359_v4 = vld [vmem:[#allocation8 + $0xf94] sm:$0xf] }
 0x258   :  { %4655 = vmatpush.bf16.msra.mxu0 %v6364_v0  ;;  %4668 = vmatpush.bf16.msra.mxu1 %v6428_v40  ;;  %v6844_v0 = vor.u32 %v7367_v11, %v6841_v6  ;;  %v6705_v40 = vld [vmem:[#allocation8 + $0xec8] sm:$0xf0]  ;;  %v6809_v11 = vld [vmem:[#allocation8 + $0xf98] sm:$0xf0] }
 0x25a   :  { %4681 = vmatpush.bf16.msra.mxu2 %v6492_v25  ;;  %4694 = vmatpush.bf16.msra.mxu3 %v6556_v17  ;;  %v6644_v17 = vor.u32 %v7317_v34, %v6641_v39  ;;  %v6609_v34 = vld [vmem:[#allocation8 + $0xe08] sm:$0xf0]  ;;  %v6748_v39 = vor.u32 %v7343_v23, %v6745_v16 }
 0x25c   :  { %4656 = vmatpush.bf16.msra.mxu0 %v6356_v62  ;;  %4669 = vmatpush.bf16.msra.mxu1 %v6420_v49  ;;  %v4450_v25 = vpop.f32.mrf.mxu0  ;;  %v6825_v62 = vld [vmem:[#allocation8 + $0xfb8] sm:$0xf0]  ;;  %v6636_v49 = vor.u32 %v7315_v55, %v6633_v14 }
 0x25e   :  { %4682 = vmatpush.bf16.msra.mxu2 %v6484_v15  ;;  %4695 = vmatpush.bf16.msra.mxu3 %v6548_v36  ;;  %v6828_v15 = vor.u32 %v7363_v46, %v6825_v62  ;;  %v7329_v36 = vld [vmem:[#allocation8 + $0xea4] sm:$0xf] }
 0x25f   :  { %4657 = vmatmul.bf16.vlgmr.msra.gmra.mxu0 %v7869_v42  ;;  %4670 = vmatmul.bf16.vlgmr.msra.gmra.mxu1 %v7871_v50  ;;  %v7333_v42 = vld [vmem:[#allocation8 + $0xec4] sm:$0xf] }
 0x260   :  { %4701 = vmatpush.bf16.msrb.mxu0 %v6668_v8  ;;  %4714 = vmatpush.bf16.msrb.mxu1 %v6732_v63  ;;  %v7349_v50 = vld [vmem:[#allocation8 + $0xf44] sm:$0xf]  ;;  %v6708_v18 = vor.u32 %v7333_v42, %v6705_v40  ;;  %v6689_v8 = vld [vmem:[#allocation8 + $0xea8] sm:$0xf0] }
 0x261   :  { %4683 = vmatmul.bf16.vlgmr.msra.gmra.mxu2 %v7873_v38  ;;  %4696 = vmatmul.bf16.vlgmr.msra.gmra.mxu3 %v7875_v22  ;;  %v4463_v38 = vpop.f32.mrf.mxu1  ;;  %v4451_v22 = vadd.f32 %v4450_v25, %v7946_v3  ;;  %v6772_v5 = vor.u32 %v7349_v50, %v6769_v44  ;;  %v7313_v3 = vld [vmem:[#allocation8 + $0xe24] sm:$0xf]  ;;  %v6692_v47 = vor.u32 %v7329_v36, %v6689_v8  ;;  %v6673_v42 = vld [vmem:[#allocation8 + $0xe88] sm:$0xf0] }
 0x262   :  { %4727 = vmatpush.bf16.msrb.mxu2 %v6796_v20  ;;  %4740 = vmatpush.bf16.msrb.mxu3 %v6860_v60  ;;  %v7345_v63 = vld [vmem:[#allocation8 + $0xf24] sm:$0xf]  ;;  %v6753_v20 = vld [vmem:[#allocation8 + $0xf28] sm:$0xf0]  ;;  %v6628_v7 = vor.u32 %v7313_v3, %v6625_v52 }
 0x263   :  { %v4464_v59 = vadd.f32 %v4463_v38, %v4451_v22  ;;  %v7361_v60 = vld [vmem:[#allocation8 + $0xfa4] sm:$0xf]  ;;  %v6756_v48 = vor.u32 %v7345_v63, %v6753_v20  ;;  %v6801_v25 = vld [vmem:[#allocation8 + $0xf88] sm:$0xf0] }
 0x264   :  { %4702 = vmatpush.bf16.msrb.mxu0 %v6660_v33  ;;  %4715 = vmatpush.bf16.msrb.mxu1 %v6724_v56  ;;  %v4476_v19 = vpop.f32.mrf.mxu2  ;;  %v4489_v35 = vpop.f32.mrf.mxu3  ;;  %v7311_v33 = vld [vmem:[#allocation8 + $0xe14] sm:$0xf]  ;;  %v6617_v56 = vld [vmem:[#allocation8 + $0xe18] sm:$0xf0]  ;;  %v7341_v40 = vld [vmem:[#allocation8 + $0xf04] sm:$0xf] }
 0x265   :  { %v4477_v26 = vadd.f32 %v4476_v19, %v4464_v59  ;;  %v4452_v32 = vpop.f32.mrf.mxu0  ;;  %v6620_v6 = vor.u32 %v7311_v33, %v6617_v56 }
 0x266   :  { %4728 = vmatpush.bf16.msrb.mxu2 %v6788_v24  ;;  %4741 = vmatpush.bf16.msrb.mxu3 %v6852_v45  ;;  %v6820_v24 = vor.u32 %v7361_v60, %v6817_v12  ;;  %v7327_v45 = vld [vmem:[#allocation8 + $0xe94] sm:$0xf] }
 0x267   :  { %v4490_v54 = vadd.f32 %v4489_v35, %v4477_v26 }
 0x268   :  { %4703 = vmatpush.bf16.msrb.mxu0 %v6652_v37  ;;  %4716 = vmatpush.bf16.msrb.mxu1 %v6716_v31  ;;  %v6684_v37 = vor.u32 %v7327_v45, %v6681_v13  ;;  %v7309_v31 = vld [vmem:[#allocation8 + $0xe04] sm:$0xf] }
 0x269   :  { %v4465_v30 = vpop.f32.mrf.mxu1  ;;  %v6612_v38 = vor.u32 %v7309_v31, %v6609_v34 }
 0x26a   :  { %4729 = vmatpush.bf16.msrb.mxu2 %v6780_v41  ;;  %4742 = vmatpush.bf16.msrb.mxu3 %v6844_v0  ;;  %v6812_v41 = vor.u32 %v7359_v4, %v6809_v11  ;;  %v7325_v0 = vld [vmem:[#allocation8 + $0xe84] sm:$0xf] }
 0x26b   :  { %v6676_v22 = vor.u32 %v7325_v0, %v6673_v42 }
 0x26c   :  { %4704 = vmatpush.bf16.msrb.mxu0 %v6644_v17  ;;  %4717 = vmatpush.bf16.msrb.mxu1 %v6708_v18  ;;  %v4478_v50 = vpop.f32.mrf.mxu2  ;;  %v4491_v44 = vpop.f32.mrf.mxu3  ;;  %v6740_v17 = vor.u32 %v7341_v40, %v6737_v1  ;;  %v6804_v18 = vor.u32 %v7357_v57, %v6801_v25 }
 0x26e   :  { %4730 = vmatpush.bf16.msrb.mxu2 %v6772_v5  ;;  %4743 = vmatpush.bf16.msrb.mxu3 %v6836_v58 }
 0x270   :  { %4705 = vmatpush.bf16.msrb.mxu0 %v6636_v49  ;;  %4718 = vmatpush.bf16.msrb.mxu1 %v6700_v51 }
 0x272   :  { %4731 = vmatpush.bf16.msrb.mxu2 %v6764_v27  ;;  %4744 = vmatpush.bf16.msrb.mxu3 %v6828_v15 }
 0x274   :  { %4706 = vmatpush.bf16.msrb.mxu0 %v6628_v7  ;;  %4719 = vmatpush.bf16.msrb.mxu1 %v6692_v47 }
 0x276   :  { %4732 = vmatpush.bf16.msrb.mxu2 %v6756_v48  ;;  %4745 = vmatpush.bf16.msrb.mxu3 %v6820_v24 }
 0x278   :  { %4707 = vmatpush.bf16.msrb.mxu0 %v6620_v6  ;;  %4720 = vmatpush.bf16.msrb.mxu1 %v6684_v37 }
 0x27a   :  { %4733 = vmatpush.bf16.msrb.mxu2 %v6748_v39  ;;  %4746 = vmatpush.bf16.msrb.mxu3 %v6812_v41 }
 0x27c   :  { %4708 = vmatpush.bf16.msrb.mxu0 %v6612_v38  ;;  %4721 = vmatpush.bf16.msrb.mxu1 %v6676_v22  ;;  %v4502_v55 = vpop.f32.mrf.mxu0  ;;  %v4515_v14 = vpop.f32.mrf.mxu1  ;;  %v4753_v38 = vmax.f32 %v7933_v29, 0.0 }
 0x27d   :  { %v4503_v5 = vadd.f32 %v4502_v55, %v4490_v54 }
 0x27e   :  { %4734 = vmatpush.bf16.msrb.mxu2 %v6740_v17  ;;  %4747 = vmatpush.bf16.msrb.mxu3 %v6804_v18 }
 0x27f   :  { %4709 = vmatmul.bf16.vlgmr.msrb.gmra.mxu0 %v7892_v21  ;;  %4722 = vmatmul.bf16.vlgmr.msrb.gmra.mxu1 %v7894_v43  ;;  %v4516_v58 = vadd.f32 %v4515_v14, %v4503_v5 }
 0x281   :  { %4735 = vmatmul.bf16.vlgmr.msrb.gmra.mxu2 %v7896_v2  ;;  %4748 = vmatmul.bf16.vlgmr.msrb.gmra.mxu3 %v7898_v9 }
 0x284   :  { %v4528_v10 = vpop.f32.mrf.mxu2  ;;  %v4541_v53 = vpop.f32.mrf.mxu3 }
 0x285   :  { %v4529_v28 = vadd.f32 %v4528_v10, %v4516_v58  ;;  %v4504_v59 = vpop.f32.mrf.mxu0  ;;  %v4517_v61 = vpop.f32.mrf.mxu1 }
 0x287   :  { %v4542_v46 = vadd.f32 %v4541_v53, %v4529_v28 }
 0x28c   :  { %v4530_v62 = vpop.f32.mrf.mxu2  ;;  %v4543_v49 = vpop.f32.mrf.mxu3 }
 0x29c   :  { %v4554_v51 = vpop.f32.mrf.mxu0  ;;  %v4567_v21 = vpop.f32.mrf.mxu1 }
 0x29d   :  { %v4555_v3 = vadd.f32 %v4554_v51, %v4542_v46 }
 0x29f   :  { %v4568_v43 = vadd.f32 %v4567_v21, %v4555_v3 }
 0x2a4   :  { %v4580_v52 = vpop.f32.mrf.mxu2  ;;  %v4593_v2 = vpop.f32.mrf.mxu3 }
 0x2a5   :  { %v4581_v27 = vadd.f32 %v4580_v52, %v4568_v43  ;;  %v4556_v9 = vpop.f32.mrf.mxu0  ;;  %v4569_v15 = vpop.f32.mrf.mxu1 }
 0x2a7   :  { %v4594_v36 = vadd.f32 %v4593_v2, %v4581_v27 }
 0x2ac   :  { %v4582_v8 = vpop.f32.mrf.mxu2  ;;  %v4595_v63 = vpop.f32.mrf.mxu3 }
 0x2bc   :  { %v4606_v19 = vpop.f32.mrf.mxu0  ;;  %v4619_v35 = vpop.f32.mrf.mxu1 }
 0x2bd   :  { %v4607_v33 = vadd.f32 %v4606_v19, %v4594_v36 }
 0x2bf   :  { %v4620_v45 = vadd.f32 %v4619_v35, %v4607_v33 }
 0x2c4   :  { %v4632_v20 = vpop.f32.mrf.mxu2  ;;  %v4645_v60 = vpop.f32.mrf.mxu3 }
 0x2c5   :  { %v4608_v12 = vpop.f32.mrf.mxu0  ;;  %v4621_v26 = vpop.f32.mrf.mxu1  ;;  %v4633_v13 = vadd.f32 %v4632_v20, %v4620_v45 }
 0x2c7   :  { %v4646_v4 = vadd.f32 %v4645_v60, %v4633_v13 }
 0x2cc   :  { %v4634_v32 = vpop.f32.mrf.mxu2  ;;  %v4647_v30 = vpop.f32.mrf.mxu3 }
 0x2dc   :  { %v4658_v7 = vpop.f32.mrf.mxu0  ;;  %v4671_v47 = vpop.f32.mrf.mxu1 }
 0x2dd   :  { %v4659_v11 = vadd.f32 %v4658_v7, %v4646_v4 }
 0x2df   :  { %v4672_v6 = vadd.f32 %v4671_v47, %v4659_v11 }
 0x2e4   :  { %v4684_v56 = vpop.f32.mrf.mxu2  ;;  %v4697_v54 = vpop.f32.mrf.mxu3 }
 0x2e5   :  { %v4660_v48 = vpop.f32.mrf.mxu0  ;;  %v4673_v24 = vpop.f32.mrf.mxu1  ;;  %v4685_v37 = vadd.f32 %v4684_v56, %v4672_v6 }
 0x2e7   :  { %v4698_v31 = vadd.f32 %v4697_v54, %v4685_v37 }
 0x2ec   :  { %v4686_v23 = vpop.f32.mrf.mxu2  ;;  %v4699_v16 = vpop.f32.mrf.mxu3 }
 0x2fc   :  { %v4710_v34 = vpop.f32.mrf.mxu0  ;;  %v4723_v39 = vpop.f32.mrf.mxu1 }
 0x2fd   :  { %v4711_v41 = vadd.f32 %v4710_v34, %v4698_v31 }
 0x2ff   :  { %v4724_v0 = vadd.f32 %v4723_v39, %v4711_v41 }
 0x304   :  { %v4736_v42 = vpop.f32.mrf.mxu2  ;;  %v4749_v40 = vpop.f32.mrf.mxu3 }
 0x305   :  { %v4737_v50 = vadd.f32 %v4736_v42, %v4724_v0  ;;  %v4712_v44 = vpop.f32.mrf.mxu0  ;;  %v4725_v1 = vpop.f32.mrf.mxu1 }
 0x307   :  { %v4750_v57 = vadd.f32 %v4749_v40, %v4737_v50 }
 0x309   :  { %v4754_v25 = vmax.f32 %v4750_v57, 0.0 }
 0x30b   :  { %v4757_v22 = vrot.slane %v4754_v25, 6 }
 0x30c   :  { %v4738_v17 = vpop.f32.mrf.mxu2  ;;  %v4751_v18 = vpop.f32.mrf.mxu3 }
 0x30d   :  { %v4759_v55 = vsel %vm4758_vm2, %v4753_v38, %v4757_v22 }
 0x30e   :  { %4761 = vst [vmem:[#allocation11] sm:$0xf] %v4759_v55 }
 0x30f   :  { %4772 = dma.vmem_to_hbm [thread:$0]  %s4768_s4, 64, %s4770_s19, [#allocation4]  }
 0x310   :  { %7532 = dma.done.wait [#allocation4], 64  }
 0x311   :  { %7533 = vsyncadd [#allocation4], 4294967232 }
 0x312   :  { %4777 = vsyncpa [#allocation3], 1 }
 0x313   :  { %4778 = vsyncpa [#allocation6], 1 }
 0x314   :  { %4779 = vsyncpa [#allocation9], 1 }
 0x315   :  { %4780 = vsyncpa [#allocation4], 1 }

</bundles_post_ra>
